<compile_context>
chip_gen: v5e
topology: v5e:2x2
jax: 0.10.0
libtpu: 0.0.40
codegen_flags: <defaults>
</compile_context>

<pallas_src>
import functools
import math

import jax
import jax.numpy as jnp
from jax.experimental import pallas as pl
from jax.experimental.pallas import tpu as pltpu


def _dot(a, b):
    return jnp.dot(a, b, preferred_element_type=jnp.float32)


def _dot_nt(a, b):
    """a @ b.T without materializing the transpose (contract last dims)."""
    return jax.lax.dot_general(a, b, (((1,), (1,)), ((), ())),
                               preferred_element_type=jnp.float32)


def _erf(x):
    """Abramowitz & Stegun 7.1.26 erf approximation (|err| < 1.5e-7).

    Built only from ops with guaranteed Mosaic lowerings (exp, mul/add, abs,
    select) so exact-GELU semantics don't rely on a lax.erf lowering rule.
    """
    a1, a2, a3, a4, a5 = 0.254829592, -0.284496736, 1.421413741, -1.453152027, 1.061405429
    p = 0.3275911
    ax = jnp.abs(x)
    t = 1.0 / (1.0 + p * ax)
    poly = ((((a5 * t + a4) * t + a3) * t + a2) * t + a1) * t
    y = 1.0 - poly * jnp.exp(-ax * ax)
    return jnp.where(x < 0.0, -y, y)


def _gelu_erf(x):
    # PyTorch nn.GELU() default: exact erf-based GELU.
    return 0.5 * x * (1.0 + _erf(x * jnp.float32(1.0 / math.sqrt(2.0))))


def _layernorm(x, gamma, beta, eps=1e-5):
    mu = jnp.mean(x, axis=-1, keepdims=True)
    var = jnp.mean((x - mu) ** 2, axis=-1, keepdims=True)
    return (x - mu) * jax.lax.rsqrt(var + eps) * gamma + beta


def _flash_attention(q, k, v, key_tile, exp_bf16):
    """softmax(q @ k.T) @ v with an online softmax over key tiles.

    q: [Nq, dh_pad] bf16 (already scaled); k, v: [Nk, dh_pad] bf16.
    Score intermediates are bounded to [Nq, key_tile]; per-tile temporaries
    are consumed immediately so only (m, l, acc) stay live across tiles.
    """
    f32 = jnp.float32
    nq, nk = q.shape[0], k.shape[0]
    m_i = jnp.full((nq, 1), -jnp.inf, f32)
    l_i = jnp.zeros((nq, 1), f32)
    acc = jnp.zeros((nq, q.shape[1]), f32)
    start = 0
    while start < nk:                       # static unroll: nk, key_tile are Python ints
        size = min(key_tile, nk - start)
        kt = k[start:start + size]
        vt = v[start:start + size]
        s = _dot_nt(q, kt)                  # [nq, size] f32 on the MXU
        m_new = jnp.maximum(m_i, jnp.max(s, axis=-1, keepdims=True))
        alpha = jnp.exp(m_i - m_new)
        if exp_bf16:
            # v6e/v7x only: EUP bf16 exp ~2x throughput; max/sum stay in f32.
            p = jnp.exp((s - m_new).astype(jnp.bfloat16))
        else:
            p = jnp.exp(s - m_new)
        l_i = alpha * l_i + jnp.sum(p, axis=-1, keepdims=True, dtype=f32)
        acc = alpha * acc + _dot(p.astype(jnp.bfloat16), vt)
        m_i = m_new
        start += size
    # EUP reciprocal instead of a VPU divide.
    return acc * pl.reciprocal(l_i, approx=True)


def cross_block_kernel(x0_ref, x1_ref,
                       wqkv_ref, bqkv_ref, wout_ref, w1x_ref, w1m_ref, w2_ref,
                       b_d_ref, b_d2_ref,
                       o0_ref, o1_ref,
                       m0_sc, m1_sc, *, heads, dh_pad, key_tile, exp_bf16):
    bf16 = jnp.bfloat16
    Dp = heads * dh_pad

    x0 = x0_ref[0]                      # [N0, D] f32 (kept f32 for the residual)
    x1 = x1_ref[0]                      # [N1, D] f32

    bqkv = bqkv_ref[...]                # [1, 2*Dp] (qk half pre-scaled by dh**-0.25)
    bout = b_d_ref[0:1]                 # [1, D]
    b2 = b_d_ref[1:2]                   # [1, D]
    b1 = b_d2_ref[0:1]                  # [1, 2D]
    gamma = b_d2_ref[1:2]
    beta = b_d2_ref[2:3]

    x0b = x0.astype(bf16)
    x1b = x1.astype(bf16)

    # Fused qk|v projection: one MXU matmul per input instead of two.
    wqkv = wqkv_ref[...]
    qkv0 = (_dot(x0b, wqkv) + bqkv).astype(bf16)   # [N0, 2*Dp]
    qkv1 = (_dot(x1b, wqkv) + bqkv).astype(bf16)   # [N1, 2*Dp]

    # Per-head cross attention. dh is zero-padded to dh_pad (multiple of 128)
    # on the host, so every slice below is 128-lane aligned and every scratch
    # write is a full-width, lane-dense store. Padded q/k/v lanes are exactly
    # zero and the padded wout rows are zero, so numerics are unchanged.
    for h in range(heads):
        q_lo = h * dh_pad
        v_lo = Dp + h * dh_pad
        q0h = qkv0[:, q_lo:q_lo + dh_pad]
        q1h = qkv1[:, q_lo:q_lo + dh_pad]
        v0h = qkv0[:, v_lo:v_lo + dh_pad]
        v1h = qkv1[:, v_lo:v_lo + dh_pad]
        # sim10 is recomputed as a second MXU matmul so both softmaxes stay on
        # the lane axis (no [N0, N1] XLU transpose); recompute is the right
        # trade on v6e/v7x where the MXU has headroom.
        m0_sc[:, q_lo:q_lo + dh_pad] = _flash_attention(
            q0h, q1h, v1h, key_tile, exp_bf16).astype(bf16)
        m1_sc[:, q_lo:q_lo + dh_pad] = _flash_attention(
            q1h, q0h, v0h, key_tile, exp_bf16).astype(bf16)

    wout = wout_ref[...]
    m0 = _dot(m0_sc[...], wout) + bout                 # [N0, D] f32
    m1 = _dot(m1_sc[...], wout) + bout                 # [N1, D] f32

    w1x = w1x_ref[...]
    w1m = w1m_ref[...]
    w2 = w2_ref[...]

    def ffn(xb, m):
        # concat([x, m]) @ w1 == x @ w1[:D] + m @ w1[D:]  (no [N, 2D] temp)
        h1 = _dot(xb, w1x) + _dot(m.astype(bf16), w1m) + b1
        h1 = _gelu_erf(_layernorm(h1, gamma, beta))
        return _dot(h1.astype(bf16), w2) + b2

    o0_ref[0] = x0 + ffn(x0b, m0)
    o1_ref[0] = x1 + ffn(x1b, m1)


def _pad_head_cols(w, heads, dh, dh_pad):
    """[in, heads*dh] -> [in, heads*dh_pad]: zero-pad each head's column block."""
    if dh_pad == dh:
        return w
    n_in = w.shape[0]
    w = w.reshape(n_in, heads, dh)
    pad = jnp.zeros((n_in, heads, dh_pad - dh), w.dtype)
    return jnp.concatenate([w, pad], axis=-1).reshape(n_in, heads * dh_pad)


def _pad_head_rows(w, heads, dh, dh_pad):
    """[heads*dh, out] -> [heads*dh_pad, out]: zero-pad each head's row block."""
    if dh_pad == dh:
        return w
    n_out = w.shape[1]
    w = w.reshape(heads, dh, n_out)
    pad = jnp.zeros((heads, dh_pad - dh, n_out), w.dtype)
    return jnp.concatenate([w, pad], axis=1).reshape(heads * dh_pad, n_out)


def cross_block(x0, x1, params, heads, *, key_tile=None):
    B, N0, D = x0.shape
    _, N1, _ = x1.shape
    if D % heads != 0:
        raise ValueError("embed_dim must be divisible by num_heads")
    D2 = 2 * D
    dh = D // heads
    dh_pad = ((dh + 127) // 128) * 128          # full 128-lane head tiles
    Dp = heads * dh_pad
    s = float(dh) ** -0.25
    bf16 = jnp.bfloat16

    # Generation-aware tuning knobs.
    try:
        kind = jax.devices()[0].device_kind.lower()
    except Exception:
        kind = ""
    is_v7 = "v7" in kind
    exp_bf16 = ("v6" in kind) or is_v7          # bf16 EUP exp only on v6e/v7x
    if key_tile is None:
        key_tile = 512 if is_v7 else 1024       # 128 MiB parts keep keys resident
    if is_v7:
        vmem_limit = 40 * 1024 * 1024           # headroom under 64 MiB/TC
    elif ("v5" in kind) or ("v6" in kind):
        vmem_limit = 64 * 1024 * 1024
    else:
        vmem_limit = None

    # One-off host-side parameter prep: fold the q/k scale into wqk/bqk, pad
    # each head to dh_pad lanes, fuse qk|v into one projection, cast weights
    # to bf16, split the FFN input projection, pack the small vectors.
    wqk_p = _pad_head_cols(params["wqk"] * s, heads, dh, dh_pad)
    wv_p = _pad_head_cols(params["wv"], heads, dh, dh_pad)
    wqkv = jnp.concatenate([wqk_p, wv_p], axis=1).astype(bf16)          # [D, 2*Dp]
    bqk_p = _pad_head_cols(params["bqk"] * s, heads, dh, dh_pad)
    bv_p = _pad_head_cols(params["bv"], heads, dh, dh_pad)
    bqkv = jnp.concatenate([bqk_p, bv_p], axis=1)                        # [1, 2*Dp]
    wout_p = _pad_head_rows(params["wout"], heads, dh, dh_pad).astype(bf16)  # [Dp, D]
    w1x = params["w1"][:D].astype(bf16)
    w1m = params["w1"][D:].astype(bf16)
    w2 = params["w2"].astype(bf16)
    b_d = jnp.concatenate([params["bout"], params["b2"]], axis=0)        # [2, D]
    b_d2 = jnp.concatenate([params["b1"], params["gamma"],
                            params["beta"]], axis=0)                     # [3, 2D]

    def full(shape):
        nd = len(shape)
        return pl.BlockSpec(shape, lambda b, _nd=nd: (0,) * _nd)

    in_specs = [
        pl.BlockSpec((1, N0, D), lambda b: (b, 0, 0)),   # x0
        pl.BlockSpec((1, N1, D), lambda b: (b, 0, 0)),   # x1
        full((D, 2 * Dp)),    # fused, padded, pre-scaled wqk|wv (bf16)
        full((1, 2 * Dp)),    # fused, padded qk|v bias (f32)
        full((Dp, D)),        # wout (zero rows at per-head padding)
        full((D, D2)),        # ffn w1, x half
        full((D, D2)),        # ffn w1, m half
        full((D2, D)),        # ffn w2
        full((2, D)),         # packed D-sized biases: bout, b2
        full((3, D2)),        # packed 2D-sized params: b1, gamma, beta
    ]
    out_specs = (
        pl.BlockSpec((1, N0, D), lambda b: (b, 0, 0)),
        pl.BlockSpec((1, N1, D), lambda b: (b, 0, 0)),
    )

    # Advisory cost estimate so XLA schedules neighbouring ops sensibly.
    flops = B * (2 * (N0 + N1) * D * 2 * Dp          # fused qk|v projections
                 + 8 * heads * N0 * N1 * dh_pad      # scores + PV, both directions
                 + 2 * (N0 + N1) * Dp * D            # wout
                 + 12 * (N0 + N1) * D * D)           # FFN
    transcendentals = B * (2 * heads * N0 * N1 + 4 * (N0 + N1) * D)
    bytes_accessed = (8 * B * (N0 + N1) * D
                      + 2 * (D * 2 * Dp + Dp * D + 4 * D * D + 2 * D * D)
                      + 4 * (2 * Dp + 8 * D))

    kernel = functools.partial(cross_block_kernel, heads=heads, dh_pad=dh_pad,
                               key_tile=key_tile, exp_bf16=exp_bf16)

    compiler_kwargs = dict(dimension_semantics=("parallel",))
    if vmem_limit is not None:
        compiler_kwargs["vmem_limit_bytes"] = vmem_limit

    return pl.pallas_call(
        kernel,
        out_shape=(jax.ShapeDtypeStruct((B, N0, D), jnp.float32),
                   jax.ShapeDtypeStruct((B, N1, D), jnp.float32)),
        grid_spec=pltpu.PrefetchScalarGridSpec(
            num_scalar_prefetch=0,
            grid=(B,),
            in_specs=in_specs,
            out_specs=out_specs,
            scratch_shapes=[pltpu.VMEM((N0, Dp), bf16),
                            pltpu.VMEM((N1, Dp), bf16)],
        ),
        compiler_params=pltpu.CompilerParams(**compiler_kwargs),
        cost_estimate=pl.CostEstimate(flops=int(flops),
                                      transcendentals=int(transcendentals),
                                      bytes_accessed=int(bytes_accessed)),
    )(x0, x1, wqkv, bqkv, wout_p, w1x, w1m, w2, b_d, b_d2)


def ref_forward(x0, x1, p, heads):
    """Pure-JAX f32 reference mirroring the PyTorch CrossBlock forward (mask=None)."""
    B, N0, D = x0.shape
    dh = D // heads

    def unflatten(t):
        return t.reshape(t.shape[0], t.shape[1], heads, dh).transpose(0, 2, 1, 3)

    qk0 = unflatten(x0 @ p["wqk"] + p["bqk"])
    qk1 = unflatten(x1 @ p["wqk"] + p["bqk"])
    v0 = unflatten(x0 @ p["wv"] + p["bv"])
    v1 = unflatten(x1 @ p["wv"] + p["bv"])
    s = dh ** -0.25
    qk0 = qk0 * s
    qk1 = qk1 * s
    sim = jnp.einsum("bhid,bhjd->bhij", qk0, qk1)
    attn01 = jax.nn.softmax(sim, axis=-1)
    attn10 = jax.nn.softmax(jnp.swapaxes(sim, -2, -1), axis=-1)
    m0 = jnp.einsum("bhij,bhjd->bhid", attn01, v1)
    m1 = jnp.einsum("bhji,bhjd->bhid", jnp.swapaxes(attn10, -2, -1), v0)

    def flatten(t):
        return t.transpose(0, 2, 1, 3).reshape(t.shape[0], t.shape[2], D)

    m0 = flatten(m0) @ p["wout"] + p["bout"]
    m1 = flatten(m1) @ p["wout"] + p["bout"]

    def ffn(x, m):
        c = jnp.concatenate([x, m], -1)
        h = c @ p["w1"] + p["b1"]
        mu = h.mean(-1, keepdims=True)
        var = ((h - mu) ** 2).mean(-1, keepdims=True)
        h = (h - mu) / jnp.sqrt(var + 1e-5) * p["gamma"] + p["beta"]
        h = 0.5 * h * (1 + jax.lax.erf(h / jnp.sqrt(2.0)))
        return h @ p["w2"] + p["b2"]

    return x0 + ffn(x0, m0), x1 + ffn(x1, m1)


if __name__ == "__main__":
    B, N0, N1, D, H = 2, 24, 16, 64, 4
    D2 = 2 * D

    key = jax.random.PRNGKey(0)
    keys = jax.random.split(key, 16)

    def rnd(k, shape, scale=0.1):
        return jax.random.normal(k, shape, dtype=jnp.float32) * scale

    x0 = rnd(keys[0], (B, N0, D), 1.0)
    x1 = rnd(keys[1], (B, N1, D), 1.0)

    params = {
        "wqk":  rnd(keys[2], (D, D)),
        "bqk":  rnd(keys[3], (1, D)),
        "wv":   rnd(keys[4], (D, D)),
        "bv":   rnd(keys[5], (1, D)),
        "wout": rnd(keys[6], (D, D)),
        "bout": rnd(keys[7], (1, D)),
        "w1":   rnd(keys[8], (D2, D2)),
        "b1":   rnd(keys[9], (1, D2)),
        "gamma": jnp.ones((1, D2), jnp.float32),
        "beta":  jnp.zeros((1, D2), jnp.float32),
        "w2":   rnd(keys[10], (D2, D)),
        "b2":   rnd(keys[11], (1, D)),
    }

    # key_tile=16 forces multiple online-softmax key tiles (including a ragged
    # final tile on the N0=24 key side) even at this small test size.
    out0, out1 = cross_block(x0, x1, params, H, key_tile=16)
    jax.block_until_ready((out0, out1))

    r0, r1 = ref_forward(x0, x1, params, H)
    assert out0.shape == (B, N0, D) and out1.shape == (B, N1, D)
    # bf16 matmul operands (f32 accumulation) -> loosened tolerance vs. f32 ref.
    assert jnp.allclose(out0, r0, atol=5e-2, rtol=5e-2), \
        f"max diff {jnp.max(jnp.abs(out0 - r0))}"
    assert jnp.allclose(out1, r1, atol=5e-2, rtol=5e-2), \
        f"max diff {jnp.max(jnp.abs(out1 - r1))}"

    print("KERNEL_OK")
</pallas_src>

<mosaic_0001>
module attributes {stable_mosaic.version = 11 : i64} {
  func.func @cross_block_kernel(%arg0: i32, %arg1: memref<1x24x64xf32, #tpu.memory_space<vmem>>, %arg2: memref<1x16x64xf32, #tpu.memory_space<vmem>>, %arg3: memref<64x1024xbf16, #tpu.memory_space<vmem>>, %arg4: memref<1x1024xf32, #tpu.memory_space<vmem>>, %arg5: memref<512x64xbf16, #tpu.memory_space<vmem>>, %arg6: memref<64x128xbf16, #tpu.memory_space<vmem>>, %arg7: memref<64x128xbf16, #tpu.memory_space<vmem>>, %arg8: memref<128x64xbf16, #tpu.memory_space<vmem>>, %arg9: memref<2x64xf32, #tpu.memory_space<vmem>>, %arg10: memref<3x128xf32, #tpu.memory_space<vmem>>, %arg11: memref<1x24x64xf32, #tpu.memory_space<vmem>>, %arg12: memref<1x16x64xf32, #tpu.memory_space<vmem>>, %arg13: memref<24x512xbf16, #tpu.memory_space<vmem>>, %arg14: memref<16x512xbf16, #tpu.memory_space<vmem>>) attributes {dimension_semantics = [#tpu.dimension_semantics<parallel>], iteration_bounds = array<i64: 2>, scalar_prefetch = 0 : i64, scratch_operands = 2 : i64, tpu.core_type = #tpu.core_type<tc>, window_params = [{transform_indices = @transform_0, window_bounds = array<i64: 1, 24, 64>}, {transform_indices = @transform_1, window_bounds = array<i64: 1, 16, 64>}, {pipeline_mode = #tpu.pipeline_mode<synchronous>, transform_indices = @transform_2, window_bounds = array<i64: 64, 1024>}, {pipeline_mode = #tpu.pipeline_mode<synchronous>, transform_indices = @transform_3, window_bounds = array<i64: 1, 1024>}, {pipeline_mode = #tpu.pipeline_mode<synchronous>, transform_indices = @transform_4, window_bounds = array<i64: 512, 64>}, {pipeline_mode = #tpu.pipeline_mode<synchronous>, transform_indices = @transform_5, window_bounds = array<i64: 64, 128>}, {pipeline_mode = #tpu.pipeline_mode<synchronous>, transform_indices = @transform_6, window_bounds = array<i64: 64, 128>}, {pipeline_mode = #tpu.pipeline_mode<synchronous>, transform_indices = @transform_7, window_bounds = array<i64: 128, 64>}, {pipeline_mode = #tpu.pipeline_mode<synchronous>, transform_indices = @transform_8, window_bounds = array<i64: 2, 64>}, {pipeline_mode = #tpu.pipeline_mode<synchronous>, transform_indices = @transform_9, window_bounds = array<i64: 3, 128>}, {transform_indices = @transform_10, window_bounds = array<i64: 1, 24, 64>}, {transform_indices = @transform_11, window_bounds = array<i64: 1, 16, 64>}]} {
    %c0 = arith.constant 0 : index
    %c0_0 = arith.constant 0 : index
    %c0_1 = arith.constant 0 : index
    %0 = vector.load %arg1[%c0, %c0_0, %c0_1] : memref<1x24x64xf32, #tpu.memory_space<vmem>>, vector<1x24x64xf32>
    %1 = vector.shape_cast %0 : vector<1x24x64xf32> to vector<24x64xf32>
    %c0_2 = arith.constant 0 : index
    %c0_3 = arith.constant 0 : index
    %c0_4 = arith.constant 0 : index
    %2 = vector.load %arg2[%c0_2, %c0_3, %c0_4] : memref<1x16x64xf32, #tpu.memory_space<vmem>>, vector<1x16x64xf32>
    %3 = vector.shape_cast %2 : vector<1x16x64xf32> to vector<16x64xf32>
    %c0_5 = arith.constant 0 : index
    %c0_6 = arith.constant 0 : index
    %4 = vector.load %arg4[%c0_5, %c0_6] : memref<1x1024xf32, #tpu.memory_space<vmem>>, vector<1x1024xf32>
    %c0_7 = arith.constant 0 : index
    %c0_8 = arith.constant 0 : index
    %5 = vector.load %arg9[%c0_7, %c0_8] : memref<2x64xf32, #tpu.memory_space<vmem>>, vector<1x64xf32>
    %c1 = arith.constant 1 : index
    %c0_9 = arith.constant 0 : index
    %6 = vector.load %arg9[%c1, %c0_9] : memref<2x64xf32, #tpu.memory_space<vmem>>, vector<1x64xf32>
    %c0_10 = arith.constant 0 : index
    %c0_11 = arith.constant 0 : index
    %7 = vector.load %arg10[%c0_10, %c0_11] : memref<3x128xf32, #tpu.memory_space<vmem>>, vector<1x128xf32>
    %c1_12 = arith.constant 1 : index
    %c0_13 = arith.constant 0 : index
    %8 = vector.load %arg10[%c1_12, %c0_13] : memref<3x128xf32, #tpu.memory_space<vmem>>, vector<1x128xf32>
    %c2 = arith.constant 2 : index
    %c0_14 = arith.constant 0 : index
    %9 = vector.load %arg10[%c2, %c0_14] : memref<3x128xf32, #tpu.memory_space<vmem>>, vector<1x128xf32>
    %10 = arith.truncf %1 : vector<24x64xf32> to vector<24x64xbf16>
    %11 = arith.truncf %3 : vector<16x64xf32> to vector<16x64xbf16>
    %c0_15 = arith.constant 0 : index
    %c0_16 = arith.constant 0 : index
    %12 = vector.load %arg3[%c0_15, %c0_16] : memref<64x1024xbf16, #tpu.memory_space<vmem>>, vector<64x1024xbf16>
    %cst = arith.constant dense<0.000000e+00> : vector<24x1024xf32>
    %13 = tpu.matmul %10, %12, %cst {dimension_numbers = #tpu.dot_dimension_numbers<[1], [0], [0], [1], [0, 0, 1, 1], [], []>} : vector<24x64xbf16>, vector<64x1024xbf16>, vector<24x1024xf32> -> vector<24x1024xf32>
    %14 = vector.broadcast %4 : vector<1x1024xf32> to vector<24x1024xf32>
    %15 = arith.addf %13, %14 : vector<24x1024xf32>
    %16 = arith.truncf %15 : vector<24x1024xf32> to vector<24x1024xbf16>
    %cst_17 = arith.constant dense<0.000000e+00> : vector<16x1024xf32>
    %17 = tpu.matmul %11, %12, %cst_17 {dimension_numbers = #tpu.dot_dimension_numbers<[1], [0], [0], [1], [0, 0, 1, 1], [], []>} : vector<16x64xbf16>, vector<64x1024xbf16>, vector<16x1024xf32> -> vector<16x1024xf32>
    %18 = vector.broadcast %4 : vector<1x1024xf32> to vector<16x1024xf32>
    %19 = arith.addf %17, %18 : vector<16x1024xf32>
    %20 = arith.truncf %19 : vector<16x1024xf32> to vector<16x1024xbf16>
    %21 = vector.extract_strided_slice %16 {offsets = [0, 0], sizes = [24, 128], strides = [1, 1]} : vector<24x1024xbf16> to vector<24x128xbf16>
    %22 = vector.extract_strided_slice %20 {offsets = [0, 0], sizes = [16, 128], strides = [1, 1]} : vector<16x1024xbf16> to vector<16x128xbf16>
    %23 = vector.extract_strided_slice %16 {offsets = [0, 512], sizes = [24, 128], strides = [1, 1]} : vector<24x1024xbf16> to vector<24x128xbf16>
    %24 = vector.extract_strided_slice %20 {offsets = [0, 512], sizes = [16, 128], strides = [1, 1]} : vector<16x1024xbf16> to vector<16x128xbf16>
    %cst_18 = arith.constant 0xFF800000 : f32
    %25 = vector.broadcast %cst_18 : f32 to vector<24x1xf32>
    %cst_19 = arith.constant 0.000000e+00 : f32
    %26 = vector.broadcast %cst_19 : f32 to vector<24x1xf32>
    %cst_20 = arith.constant 0.000000e+00 : f32
    %27 = vector.broadcast %cst_20 : f32 to vector<24x128xf32>
    %cst_21 = arith.constant dense<0.000000e+00> : vector<24x16xf32>
    %28 = tpu.matmul %21, %22, %cst_21 {dimension_numbers = #tpu.dot_dimension_numbers<[1], [1], [0], [0], [0, 0, 1, 0], [], []>} : vector<24x128xbf16>, vector<16x128xbf16>, vector<24x16xf32> -> vector<24x16xf32>
    %cst_22 = arith.constant dense<0xFF800000> : vector<24xf32>
    %29 = vector.multi_reduction <maximumf>, %28, %cst_22 [1] : vector<24x16xf32> to vector<24xf32>
    %30 = vector.shape_cast %29 : vector<24xf32> to vector<24x1xf32>
    %31 = arith.maximumf %25, %30 : vector<24x1xf32>
    %32 = arith.subf %25, %31 : vector<24x1xf32>
    %33 = math.exp %32 : vector<24x1xf32>
    %34 = vector.broadcast %31 : vector<24x1xf32> to vector<24x16xf32>
    %35 = arith.subf %28, %34 : vector<24x16xf32>
    %36 = math.exp %35 : vector<24x16xf32>
    %37 = arith.mulf %33, %26 : vector<24x1xf32>
    %cst_23 = arith.constant dense<0.000000e+00> : vector<24xf32>
    %38 = vector.multi_reduction <add>, %36, %cst_23 [1] : vector<24x16xf32> to vector<24xf32>
    %39 = vector.shape_cast %38 : vector<24xf32> to vector<24x1xf32>
    %40 = arith.addf %37, %39 : vector<24x1xf32>
    %41 = vector.broadcast %33 : vector<24x1xf32> to vector<24x128xf32>
    %42 = arith.mulf %41, %27 : vector<24x128xf32>
    %43 = arith.truncf %36 : vector<24x16xf32> to vector<24x16xbf16>
    %cst_24 = arith.constant dense<0.000000e+00> : vector<24x128xf32>
    %44 = tpu.matmul %43, %24, %cst_24 {dimension_numbers = #tpu.dot_dimension_numbers<[1], [0], [0], [1], [0, 0, 1, 1], [], []>} : vector<24x16xbf16>, vector<16x128xbf16>, vector<24x128xf32> -> vector<24x128xf32>
    %45 = arith.addf %42, %44 : vector<24x128xf32>
    %46 = tpu.reciprocal %40 {approx = true} : vector<24x1xf32> -> vector<24x1xf32>
    %47 = vector.broadcast %46 : vector<24x1xf32> to vector<24x128xf32>
    %48 = arith.mulf %45, %47 : vector<24x128xf32>
    %49 = arith.truncf %48 : vector<24x128xf32> to vector<24x128xbf16>
    %c0_25 = arith.constant 0 : index
    %c0_26 = arith.constant 0 : index
    %50 = vector.load %arg13[%c0_25, %c0_26] : memref<24x512xbf16, #tpu.memory_space<vmem>>, vector<24x128xbf16>
    tpu.vector_store %arg13[%c0_25, %c0_26], %49 {strides = array<i32>} : memref<24x512xbf16, #tpu.memory_space<vmem>>, vector<24x128xbf16>,
    %cst_27 = arith.constant 0xFF800000 : f32
    %51 = vector.broadcast %cst_27 : f32 to vector<16x1xf32>
    %cst_28 = arith.constant 0.000000e+00 : f32
    %52 = vector.broadcast %cst_28 : f32 to vector<16x1xf32>
    %cst_29 = arith.constant 0.000000e+00 : f32
    %53 = vector.broadcast %cst_29 : f32 to vector<16x128xf32>
    %54 = vector.extract_strided_slice %21 {offsets = [0, 0], sizes = [16, 128], strides = [1, 1]} : vector<24x128xbf16> to vector<16x128xbf16>
    %55 = vector.extract_strided_slice %23 {offsets = [0, 0], sizes = [16, 128], strides = [1, 1]} : vector<24x128xbf16> to vector<16x128xbf16>
    %cst_30 = arith.constant dense<0.000000e+00> : vector<16x16xf32>
    %56 = tpu.matmul %22, %54, %cst_30 {dimension_numbers = #tpu.dot_dimension_numbers<[1], [1], [0], [0], [0, 0, 1, 0], [], []>} : vector<16x128xbf16>, vector<16x128xbf16>, vector<16x16xf32> -> vector<16x16xf32>
    %cst_31 = arith.constant dense<0xFF800000> : vector<16xf32>
    %57 = vector.multi_reduction <maximumf>, %56, %cst_31 [1] : vector<16x16xf32> to vector<16xf32>
    %58 = vector.shape_cast %57 : vector<16xf32> to vector<16x1xf32>
    %59 = arith.maximumf %51, %58 : vector<16x1xf32>
    %60 = arith.subf %51, %59 : vector<16x1xf32>
    %61 = math.exp %60 : vector<16x1xf32>
    %62 = vector.broadcast %59 : vector<16x1xf32> to vector<16x16xf32>
    %63 = arith.subf %56, %62 : vector<16x16xf32>
    %64 = math.exp %63 : vector<16x16xf32>
    %65 = arith.mulf %61, %52 : vector<16x1xf32>
    %cst_32 = arith.constant dense<0.000000e+00> : vector<16xf32>
    %66 = vector.multi_reduction <add>, %64, %cst_32 [1] : vector<16x16xf32> to vector<16xf32>
    %67 = vector.shape_cast %66 : vector<16xf32> to vector<16x1xf32>
    %68 = arith.addf %65, %67 : vector<16x1xf32>
    %69 = vector.broadcast %61 : vector<16x1xf32> to vector<16x128xf32>
    %70 = arith.mulf %69, %53 : vector<16x128xf32>
    %71 = arith.truncf %64 : vector<16x16xf32> to vector<16x16xbf16>
    %cst_33 = arith.constant dense<0.000000e+00> : vector<16x128xf32>
    %72 = tpu.matmul %71, %55, %cst_33 {dimension_numbers = #tpu.dot_dimension_numbers<[1], [0], [0], [1], [0, 0, 1, 1], [], []>} : vector<16x16xbf16>, vector<16x128xbf16>, vector<16x128xf32> -> vector<16x128xf32>
    %73 = arith.addf %70, %72 : vector<16x128xf32>
    %74 = vector.extract_strided_slice %21 {offsets = [16, 0], sizes = [8, 128], strides = [1, 1]} : vector<24x128xbf16> to vector<8x128xbf16>
    %75 = vector.extract_strided_slice %23 {offsets = [16, 0], sizes = [8, 128], strides = [1, 1]} : vector<24x128xbf16> to vector<8x128xbf16>
    %cst_34 = arith.constant dense<0.000000e+00> : vector<16x8xf32>
    %76 = tpu.matmul %22, %74, %cst_34 {dimension_numbers = #tpu.dot_dimension_numbers<[1], [1], [0], [0], [0, 0, 1, 0], [], []>} : vector<16x128xbf16>, vector<8x128xbf16>, vector<16x8xf32> -> vector<16x8xf32>
    %cst_35 = arith.constant dense<0xFF800000> : vector<16xf32>
    %77 = vector.multi_reduction <maximumf>, %76, %cst_35 [1] : vector<16x8xf32> to vector<16xf32>
    %78 = vector.shape_cast %77 : vector<16xf32> to vector<16x1xf32>
    %79 = arith.maximumf %59, %78 : vector<16x1xf32>
    %80 = arith.subf %59, %79 : vector<16x1xf32>
    %81 = math.exp %80 : vector<16x1xf32>
    %82 = vector.broadcast %79 : vector<16x1xf32> to vector<16x8xf32>
    %83 = arith.subf %76, %82 : vector<16x8xf32>
    %84 = math.exp %83 : vector<16x8xf32>
    %85 = arith.mulf %81, %68 : vector<16x1xf32>
    %cst_36 = arith.constant dense<0.000000e+00> : vector<16xf32>
    %86 = vector.multi_reduction <add>, %84, %cst_36 [1] : vector<16x8xf32> to vector<16xf32>
    %87 = vector.shape_cast %86 : vector<16xf32> to vector<16x1xf32>
    %88 = arith.addf %85, %87 : vector<16x1xf32>
    %89 = vector.broadcast %81 : vector<16x1xf32> to vector<16x128xf32>
    %90 = arith.mulf %89, %73 : vector<16x128xf32>
    %91 = arith.truncf %84 : vector<16x8xf32> to vector<16x8xbf16>
    %cst_37 = arith.constant dense<0.000000e+00> : vector<16x128xf32>
    %92 = tpu.matmul %91, %75, %cst_37 {dimension_numbers = #tpu.dot_dimension_numbers<[1], [0], [0], [1], [0, 0, 1, 1], [], []>} : vector<16x8xbf16>, vector<8x128xbf16>, vector<16x128xf32> -> vector<16x128xf32>
    %93 = arith.addf %90, %92 : vector<16x128xf32>
    %94 = tpu.reciprocal %88 {approx = true} : vector<16x1xf32> -> vector<16x1xf32>
    %95 = vector.broadcast %94 : vector<16x1xf32> to vector<16x128xf32>
    %96 = arith.mulf %93, %95 : vector<16x128xf32>
    %97 = arith.truncf %96 : vector<16x128xf32> to vector<16x128xbf16>
    %c0_38 = arith.constant 0 : index
    %c0_39 = arith.constant 0 : index
    %98 = vector.load %arg14[%c0_38, %c0_39] : memref<16x512xbf16, #tpu.memory_space<vmem>>, vector<16x128xbf16>
    tpu.vector_store %arg14[%c0_38, %c0_39], %97 {strides = array<i32>} : memref<16x512xbf16, #tpu.memory_space<vmem>>, vector<16x128xbf16>,
    %99 = vector.extract_strided_slice %16 {offsets = [0, 128], sizes = [24, 128], strides = [1, 1]} : vector<24x1024xbf16> to vector<24x128xbf16>
    %100 = vector.extract_strided_slice %20 {offsets = [0, 128], sizes = [16, 128], strides = [1, 1]} : vector<16x1024xbf16> to vector<16x128xbf16>
    %101 = vector.extract_strided_slice %16 {offsets = [0, 640], sizes = [24, 128], strides = [1, 1]} : vector<24x1024xbf16> to vector<24x128xbf16>
    %102 = vector.extract_strided_slice %20 {offsets = [0, 640], sizes = [16, 128], strides = [1, 1]} : vector<16x1024xbf16> to vector<16x128xbf16>
    %cst_40 = arith.constant 0xFF800000 : f32
    %103 = vector.broadcast %cst_40 : f32 to vector<24x1xf32>
    %cst_41 = arith.constant 0.000000e+00 : f32
    %104 = vector.broadcast %cst_41 : f32 to vector<24x1xf32>
    %cst_42 = arith.constant 0.000000e+00 : f32
    %105 = vector.broadcast %cst_42 : f32 to vector<24x128xf32>
    %cst_43 = arith.constant dense<0.000000e+00> : vector<24x16xf32>
    %106 = tpu.matmul %99, %100, %cst_43 {dimension_numbers = #tpu.dot_dimension_numbers<[1], [1], [0], [0], [0, 0, 1, 0], [], []>} : vector<24x128xbf16>, vector<16x128xbf16>, vector<24x16xf32> -> vector<24x16xf32>
    %cst_44 = arith.constant dense<0xFF800000> : vector<24xf32>
    %107 = vector.multi_reduction <maximumf>, %106, %cst_44 [1] : vector<24x16xf32> to vector<24xf32>
    %108 = vector.shape_cast %107 : vector<24xf32> to vector<24x1xf32>
    %109 = arith.maximumf %103, %108 : vector<24x1xf32>
    %110 = arith.subf %103, %109 : vector<24x1xf32>
    %111 = math.exp %110 : vector<24x1xf32>
    %112 = vector.broadcast %109 : vector<24x1xf32> to vector<24x16xf32>
    %113 = arith.subf %106, %112 : vector<24x16xf32>
    %114 = math.exp %113 : vector<24x16xf32>
    %115 = arith.mulf %111, %104 : vector<24x1xf32>
    %cst_45 = arith.constant dense<0.000000e+00> : vector<24xf32>
    %116 = vector.multi_reduction <add>, %114, %cst_45 [1] : vector<24x16xf32> to vector<24xf32>
    %117 = vector.shape_cast %116 : vector<24xf32> to vector<24x1xf32>
    %118 = arith.addf %115, %117 : vector<24x1xf32>
    %119 = vector.broadcast %111 : vector<24x1xf32> to vector<24x128xf32>
    %120 = arith.mulf %119, %105 : vector<24x128xf32>
    %121 = arith.truncf %114 : vector<24x16xf32> to vector<24x16xbf16>
    %cst_46 = arith.constant dense<0.000000e+00> : vector<24x128xf32>
    %122 = tpu.matmul %121, %102, %cst_46 {dimension_numbers = #tpu.dot_dimension_numbers<[1], [0], [0], [1], [0, 0, 1, 1], [], []>} : vector<24x16xbf16>, vector<16x128xbf16>, vector<24x128xf32> -> vector<24x128xf32>
    %123 = arith.addf %120, %122 : vector<24x128xf32>
    %124 = tpu.reciprocal %118 {approx = true} : vector<24x1xf32> -> vector<24x1xf32>
    %125 = vector.broadcast %124 : vector<24x1xf32> to vector<24x128xf32>
    %126 = arith.mulf %123, %125 : vector<24x128xf32>
    %127 = arith.truncf %126 : vector<24x128xf32> to vector<24x128xbf16>
    %c0_47 = arith.constant 0 : index
    %c128 = arith.constant 128 : index
    %128 = vector.load %arg13[%c0_47, %c128] : memref<24x512xbf16, #tpu.memory_space<vmem>>, vector<24x128xbf16>
    tpu.vector_store %arg13[%c0_47, %c128], %127 {strides = array<i32>} : memref<24x512xbf16, #tpu.memory_space<vmem>>, vector<24x128xbf16>,
    %cst_48 = arith.constant 0xFF800000 : f32
    %129 = vector.broadcast %cst_48 : f32 to vector<16x1xf32>
    %cst_49 = arith.constant 0.000000e+00 : f32
    %130 = vector.broadcast %cst_49 : f32 to vector<16x1xf32>
    %cst_50 = arith.constant 0.000000e+00 : f32
    %131 = vector.broadcast %cst_50 : f32 to vector<16x128xf32>
    %132 = vector.extract_strided_slice %99 {offsets = [0, 0], sizes = [16, 128], strides = [1, 1]} : vector<24x128xbf16> to vector<16x128xbf16>
    %133 = vector.extract_strided_slice %101 {offsets = [0, 0], sizes = [16, 128], strides = [1, 1]} : vector<24x128xbf16> to vector<16x128xbf16>
    %cst_51 = arith.constant dense<0.000000e+00> : vector<16x16xf32>
    %134 = tpu.matmul %100, %132, %cst_51 {dimension_numbers = #tpu.dot_dimension_numbers<[1], [1], [0], [0], [0, 0, 1, 0], [], []>} : vector<16x128xbf16>, vector<16x128xbf16>, vector<16x16xf32> -> vector<16x16xf32>
    %cst_52 = arith.constant dense<0xFF800000> : vector<16xf32>
    %135 = vector.multi_reduction <maximumf>, %134, %cst_52 [1] : vector<16x16xf32> to vector<16xf32>
    %136 = vector.shape_cast %135 : vector<16xf32> to vector<16x1xf32>
    %137 = arith.maximumf %129, %136 : vector<16x1xf32>
    %138 = arith.subf %129, %137 : vector<16x1xf32>
    %139 = math.exp %138 : vector<16x1xf32>
    %140 = vector.broadcast %137 : vector<16x1xf32> to vector<16x16xf32>
    %141 = arith.subf %134, %140 : vector<16x16xf32>
    %142 = math.exp %141 : vector<16x16xf32>
    %143 = arith.mulf %139, %130 : vector<16x1xf32>
    %cst_53 = arith.constant dense<0.000000e+00> : vector<16xf32>
    %144 = vector.multi_reduction <add>, %142, %cst_53 [1] : vector<16x16xf32> to vector<16xf32>
    %145 = vector.shape_cast %144 : vector<16xf32> to vector<16x1xf32>
    %146 = arith.addf %143, %145 : vector<16x1xf32>
    %147 = vector.broadcast %139 : vector<16x1xf32> to vector<16x128xf32>
    %148 = arith.mulf %147, %131 : vector<16x128xf32>
    %149 = arith.truncf %142 : vector<16x16xf32> to vector<16x16xbf16>
    %cst_54 = arith.constant dense<0.000000e+00> : vector<16x128xf32>
    %150 = tpu.matmul %149, %133, %cst_54 {dimension_numbers = #tpu.dot_dimension_numbers<[1], [0], [0], [1], [0, 0, 1, 1], [], []>} : vector<16x16xbf16>, vector<16x128xbf16>, vector<16x128xf32> -> vector<16x128xf32>
    %151 = arith.addf %148, %150 : vector<16x128xf32>
    %152 = vector.extract_strided_slice %99 {offsets = [16, 0], sizes = [8, 128], strides = [1, 1]} : vector<24x128xbf16> to vector<8x128xbf16>
    %153 = vector.extract_strided_slice %101 {offsets = [16, 0], sizes = [8, 128], strides = [1, 1]} : vector<24x128xbf16> to vector<8x128xbf16>
    %cst_55 = arith.constant dense<0.000000e+00> : vector<16x8xf32>
    %154 = tpu.matmul %100, %152, %cst_55 {dimension_numbers = #tpu.dot_dimension_numbers<[1], [1], [0], [0], [0, 0, 1, 0], [], []>} : vector<16x128xbf16>, vector<8x128xbf16>, vector<16x8xf32> -> vector<16x8xf32>
    %cst_56 = arith.constant dense<0xFF800000> : vector<16xf32>
    %155 = vector.multi_reduction <maximumf>, %154, %cst_56 [1] : vector<16x8xf32> to vector<16xf32>
    %156 = vector.shape_cast %155 : vector<16xf32> to vector<16x1xf32>
    %157 = arith.maximumf %137, %156 : vector<16x1xf32>
    %158 = arith.subf %137, %157 : vector<16x1xf32>
    %159 = math.exp %158 : vector<16x1xf32>
    %160 = vector.broadcast %157 : vector<16x1xf32> to vector<16x8xf32>
    %161 = arith.subf %154, %160 : vector<16x8xf32>
    %162 = math.exp %161 : vector<16x8xf32>
    %163 = arith.mulf %159, %146 : vector<16x1xf32>
    %cst_57 = arith.constant dense<0.000000e+00> : vector<16xf32>
    %164 = vector.multi_reduction <add>, %162, %cst_57 [1] : vector<16x8xf32> to vector<16xf32>
    %165 = vector.shape_cast %164 : vector<16xf32> to vector<16x1xf32>
    %166 = arith.addf %163, %165 : vector<16x1xf32>
    %167 = vector.broadcast %159 : vector<16x1xf32> to vector<16x128xf32>
    %168 = arith.mulf %167, %151 : vector<16x128xf32>
    %169 = arith.truncf %162 : vector<16x8xf32> to vector<16x8xbf16>
    %cst_58 = arith.constant dense<0.000000e+00> : vector<16x128xf32>
    %170 = tpu.matmul %169, %153, %cst_58 {dimension_numbers = #tpu.dot_dimension_numbers<[1], [0], [0], [1], [0, 0, 1, 1], [], []>} : vector<16x8xbf16>, vector<8x128xbf16>, vector<16x128xf32> -> vector<16x128xf32>
    %171 = arith.addf %168, %170 : vector<16x128xf32>
    %172 = tpu.reciprocal %166 {approx = true} : vector<16x1xf32> -> vector<16x1xf32>
    %173 = vector.broadcast %172 : vector<16x1xf32> to vector<16x128xf32>
    %174 = arith.mulf %171, %173 : vector<16x128xf32>
    %175 = arith.truncf %174 : vector<16x128xf32> to vector<16x128xbf16>
    %c0_59 = arith.constant 0 : index
    %c128_60 = arith.constant 128 : index
    %176 = vector.load %arg14[%c0_59, %c128_60] : memref<16x512xbf16, #tpu.memory_space<vmem>>, vector<16x128xbf16>
    tpu.vector_store %arg14[%c0_59, %c128_60], %175 {strides = array<i32>} : memref<16x512xbf16, #tpu.memory_space<vmem>>, vector<16x128xbf16>,
    %177 = vector.extract_strided_slice %16 {offsets = [0, 256], sizes = [24, 128], strides = [1, 1]} : vector<24x1024xbf16> to vector<24x128xbf16>
    %178 = vector.extract_strided_slice %20 {offsets = [0, 256], sizes = [16, 128], strides = [1, 1]} : vector<16x1024xbf16> to vector<16x128xbf16>
    %179 = vector.extract_strided_slice %16 {offsets = [0, 768], sizes = [24, 128], strides = [1, 1]} : vector<24x1024xbf16> to vector<24x128xbf16>
    %180 = vector.extract_strided_slice %20 {offsets = [0, 768], sizes = [16, 128], strides = [1, 1]} : vector<16x1024xbf16> to vector<16x128xbf16>
    %cst_61 = arith.constant 0xFF800000 : f32
    %181 = vector.broadcast %cst_61 : f32 to vector<24x1xf32>
    %cst_62 = arith.constant 0.000000e+00 : f32
    %182 = vector.broadcast %cst_62 : f32 to vector<24x1xf32>
    %cst_63 = arith.constant 0.000000e+00 : f32
    %183 = vector.broadcast %cst_63 : f32 to vector<24x128xf32>
    %cst_64 = arith.constant dense<0.000000e+00> : vector<24x16xf32>
    %184 = tpu.matmul %177, %178, %cst_64 {dimension_numbers = #tpu.dot_dimension_numbers<[1], [1], [0], [0], [0, 0, 1, 0], [], []>} : vector<24x128xbf16>, vector<16x128xbf16>, vector<24x16xf32> -> vector<24x16xf32>
    %cst_65 = arith.constant dense<0xFF800000> : vector<24xf32>
    %185 = vector.multi_reduction <maximumf>, %184, %cst_65 [1] : vector<24x16xf32> to vector<24xf32>
    %186 = vector.shape_cast %185 : vector<24xf32> to vector<24x1xf32>
    %187 = arith.maximumf %181, %186 : vector<24x1xf32>
    %188 = arith.subf %181, %187 : vector<24x1xf32>
    %189 = math.exp %188 : vector<24x1xf32>
    %190 = vector.broadcast %187 : vector<24x1xf32> to vector<24x16xf32>
    %191 = arith.subf %184, %190 : vector<24x16xf32>
    %192 = math.exp %191 : vector<24x16xf32>
    %193 = arith.mulf %189, %182 : vector<24x1xf32>
    %cst_66 = arith.constant dense<0.000000e+00> : vector<24xf32>
    %194 = vector.multi_reduction <add>, %192, %cst_66 [1] : vector<24x16xf32> to vector<24xf32>
    %195 = vector.shape_cast %194 : vector<24xf32> to vector<24x1xf32>
    %196 = arith.addf %193, %195 : vector<24x1xf32>
    %197 = vector.broadcast %189 : vector<24x1xf32> to vector<24x128xf32>
    %198 = arith.mulf %197, %183 : vector<24x128xf32>
    %199 = arith.truncf %192 : vector<24x16xf32> to vector<24x16xbf16>
    %cst_67 = arith.constant dense<0.000000e+00> : vector<24x128xf32>
    %200 = tpu.matmul %199, %180, %cst_67 {dimension_numbers = #tpu.dot_dimension_numbers<[1], [0], [0], [1], [0, 0, 1, 1], [], []>} : vector<24x16xbf16>, vector<16x128xbf16>, vector<24x128xf32> -> vector<24x128xf32>
    %201 = arith.addf %198, %200 : vector<24x128xf32>
    %202 = tpu.reciprocal %196 {approx = true} : vector<24x1xf32> -> vector<24x1xf32>
    %203 = vector.broadcast %202 : vector<24x1xf32> to vector<24x128xf32>
    %204 = arith.mulf %201, %203 : vector<24x128xf32>
    %205 = arith.truncf %204 : vector<24x128xf32> to vector<24x128xbf16>
    %c0_68 = arith.constant 0 : index
    %c256 = arith.constant 256 : index
    %206 = vector.load %arg13[%c0_68, %c256] : memref<24x512xbf16, #tpu.memory_space<vmem>>, vector<24x128xbf16>
    tpu.vector_store %arg13[%c0_68, %c256], %205 {strides = array<i32>} : memref<24x512xbf16, #tpu.memory_space<vmem>>, vector<24x128xbf16>,
    %cst_69 = arith.constant 0xFF800000 : f32
    %207 = vector.broadcast %cst_69 : f32 to vector<16x1xf32>
    %cst_70 = arith.constant 0.000000e+00 : f32
    %208 = vector.broadcast %cst_70 : f32 to vector<16x1xf32>
    %cst_71 = arith.constant 0.000000e+00 : f32
    %209 = vector.broadcast %cst_71 : f32 to vector<16x128xf32>
    %210 = vector.extract_strided_slice %177 {offsets = [0, 0], sizes = [16, 128], strides = [1, 1]} : vector<24x128xbf16> to vector<16x128xbf16>
    %211 = vector.extract_strided_slice %179 {offsets = [0, 0], sizes = [16, 128], strides = [1, 1]} : vector<24x128xbf16> to vector<16x128xbf16>
    %cst_72 = arith.constant dense<0.000000e+00> : vector<16x16xf32>
    %212 = tpu.matmul %178, %210, %cst_72 {dimension_numbers = #tpu.dot_dimension_numbers<[1], [1], [0], [0], [0, 0, 1, 0], [], []>} : vector<16x128xbf16>, vector<16x128xbf16>, vector<16x16xf32> -> vector<16x16xf32>
    %cst_73 = arith.constant dense<0xFF800000> : vector<16xf32>
    %213 = vector.multi_reduction <maximumf>, %212, %cst_73 [1] : vector<16x16xf32> to vector<16xf32>
    %214 = vector.shape_cast %213 : vector<16xf32> to vector<16x1xf32>
    %215 = arith.maximumf %207, %214 : vector<16x1xf32>
    %216 = arith.subf %207, %215 : vector<16x1xf32>
    %217 = math.exp %216 : vector<16x1xf32>
    %218 = vector.broadcast %215 : vector<16x1xf32> to vector<16x16xf32>
    %219 = arith.subf %212, %218 : vector<16x16xf32>
    %220 = math.exp %219 : vector<16x16xf32>
    %221 = arith.mulf %217, %208 : vector<16x1xf32>
    %cst_74 = arith.constant dense<0.000000e+00> : vector<16xf32>
    %222 = vector.multi_reduction <add>, %220, %cst_74 [1] : vector<16x16xf32> to vector<16xf32>
    %223 = vector.shape_cast %222 : vector<16xf32> to vector<16x1xf32>
    %224 = arith.addf %221, %223 : vector<16x1xf32>
    %225 = vector.broadcast %217 : vector<16x1xf32> to vector<16x128xf32>
    %226 = arith.mulf %225, %209 : vector<16x128xf32>
    %227 = arith.truncf %220 : vector<16x16xf32> to vector<16x16xbf16>
    %cst_75 = arith.constant dense<0.000000e+00> : vector<16x128xf32>
    %228 = tpu.matmul %227, %211, %cst_75 {dimension_numbers = #tpu.dot_dimension_numbers<[1], [0], [0], [1], [0, 0, 1, 1], [], []>} : vector<16x16xbf16>, vector<16x128xbf16>, vector<16x128xf32> -> vector<16x128xf32>
    %229 = arith.addf %226, %228 : vector<16x128xf32>
    %230 = vector.extract_strided_slice %177 {offsets = [16, 0], sizes = [8, 128], strides = [1, 1]} : vector<24x128xbf16> to vector<8x128xbf16>
    %231 = vector.extract_strided_slice %179 {offsets = [16, 0], sizes = [8, 128], strides = [1, 1]} : vector<24x128xbf16> to vector<8x128xbf16>
    %cst_76 = arith.constant dense<0.000000e+00> : vector<16x8xf32>
    %232 = tpu.matmul %178, %230, %cst_76 {dimension_numbers = #tpu.dot_dimension_numbers<[1], [1], [0], [0], [0, 0, 1, 0], [], []>} : vector<16x128xbf16>, vector<8x128xbf16>, vector<16x8xf32> -> vector<16x8xf32>
    %cst_77 = arith.constant dense<0xFF800000> : vector<16xf32>
    %233 = vector.multi_reduction <maximumf>, %232, %cst_77 [1] : vector<16x8xf32> to vector<16xf32>
    %234 = vector.shape_cast %233 : vector<16xf32> to vector<16x1xf32>
    %235 = arith.maximumf %215, %234 : vector<16x1xf32>
    %236 = arith.subf %215, %235 : vector<16x1xf32>
    %237 = math.exp %236 : vector<16x1xf32>
    %238 = vector.broadcast %235 : vector<16x1xf32> to vector<16x8xf32>
    %239 = arith.subf %232, %238 : vector<16x8xf32>
    %240 = math.exp %239 : vector<16x8xf32>
    %241 = arith.mulf %237, %224 : vector<16x1xf32>
    %cst_78 = arith.constant dense<0.000000e+00> : vector<16xf32>
    %242 = vector.multi_reduction <add>, %240, %cst_78 [1] : vector<16x8xf32> to vector<16xf32>
    %243 = vector.shape_cast %242 : vector<16xf32> to vector<16x1xf32>
    %244 = arith.addf %241, %243 : vector<16x1xf32>
    %245 = vector.broadcast %237 : vector<16x1xf32> to vector<16x128xf32>
    %246 = arith.mulf %245, %229 : vector<16x128xf32>
    %247 = arith.truncf %240 : vector<16x8xf32> to vector<16x8xbf16>
    %cst_79 = arith.constant dense<0.000000e+00> : vector<16x128xf32>
    %248 = tpu.matmul %247, %231, %cst_79 {dimension_numbers = #tpu.dot_dimension_numbers<[1], [0], [0], [1], [0, 0, 1, 1], [], []>} : vector<16x8xbf16>, vector<8x128xbf16>, vector<16x128xf32> -> vector<16x128xf32>
    %249 = arith.addf %246, %248 : vector<16x128xf32>
    %250 = tpu.reciprocal %244 {approx = true} : vector<16x1xf32> -> vector<16x1xf32>
    %251 = vector.broadcast %250 : vector<16x1xf32> to vector<16x128xf32>
    %252 = arith.mulf %249, %251 : vector<16x128xf32>
    %253 = arith.truncf %252 : vector<16x128xf32> to vector<16x128xbf16>
    %c0_80 = arith.constant 0 : index
    %c256_81 = arith.constant 256 : index
    %254 = vector.load %arg14[%c0_80, %c256_81] : memref<16x512xbf16, #tpu.memory_space<vmem>>, vector<16x128xbf16>
    tpu.vector_store %arg14[%c0_80, %c256_81], %253 {strides = array<i32>} : memref<16x512xbf16, #tpu.memory_space<vmem>>, vector<16x128xbf16>,
    %255 = vector.extract_strided_slice %16 {offsets = [0, 384], sizes = [24, 128], strides = [1, 1]} : vector<24x1024xbf16> to vector<24x128xbf16>
    %256 = vector.extract_strided_slice %20 {offsets = [0, 384], sizes = [16, 128], strides = [1, 1]} : vector<16x1024xbf16> to vector<16x128xbf16>
    %257 = vector.extract_strided_slice %16 {offsets = [0, 896], sizes = [24, 128], strides = [1, 1]} : vector<24x1024xbf16> to vector<24x128xbf16>
    %258 = vector.extract_strided_slice %20 {offsets = [0, 896], sizes = [16, 128], strides = [1, 1]} : vector<16x1024xbf16> to vector<16x128xbf16>
    %cst_82 = arith.constant 0xFF800000 : f32
    %259 = vector.broadcast %cst_82 : f32 to vector<24x1xf32>
    %cst_83 = arith.constant 0.000000e+00 : f32
    %260 = vector.broadcast %cst_83 : f32 to vector<24x1xf32>
    %cst_84 = arith.constant 0.000000e+00 : f32
    %261 = vector.broadcast %cst_84 : f32 to vector<24x128xf32>
    %cst_85 = arith.constant dense<0.000000e+00> : vector<24x16xf32>
    %262 = tpu.matmul %255, %256, %cst_85 {dimension_numbers = #tpu.dot_dimension_numbers<[1], [1], [0], [0], [0, 0, 1, 0], [], []>} : vector<24x128xbf16>, vector<16x128xbf16>, vector<24x16xf32> -> vector<24x16xf32>
    %cst_86 = arith.constant dense<0xFF800000> : vector<24xf32>
    %263 = vector.multi_reduction <maximumf>, %262, %cst_86 [1] : vector<24x16xf32> to vector<24xf32>
    %264 = vector.shape_cast %263 : vector<24xf32> to vector<24x1xf32>
    %265 = arith.maximumf %259, %264 : vector<24x1xf32>
    %266 = arith.subf %259, %265 : vector<24x1xf32>
    %267 = math.exp %266 : vector<24x1xf32>
    %268 = vector.broadcast %265 : vector<24x1xf32> to vector<24x16xf32>
    %269 = arith.subf %262, %268 : vector<24x16xf32>
    %270 = math.exp %269 : vector<24x16xf32>
    %271 = arith.mulf %267, %260 : vector<24x1xf32>
    %cst_87 = arith.constant dense<0.000000e+00> : vector<24xf32>
    %272 = vector.multi_reduction <add>, %270, %cst_87 [1] : vector<24x16xf32> to vector<24xf32>
    %273 = vector.shape_cast %272 : vector<24xf32> to vector<24x1xf32>
    %274 = arith.addf %271, %273 : vector<24x1xf32>
    %275 = vector.broadcast %267 : vector<24x1xf32> to vector<24x128xf32>
    %276 = arith.mulf %275, %261 : vector<24x128xf32>
    %277 = arith.truncf %270 : vector<24x16xf32> to vector<24x16xbf16>
    %cst_88 = arith.constant dense<0.000000e+00> : vector<24x128xf32>
    %278 = tpu.matmul %277, %258, %cst_88 {dimension_numbers = #tpu.dot_dimension_numbers<[1], [0], [0], [1], [0, 0, 1, 1], [], []>} : vector<24x16xbf16>, vector<16x128xbf16>, vector<24x128xf32> -> vector<24x128xf32>
    %279 = arith.addf %276, %278 : vector<24x128xf32>
    %280 = tpu.reciprocal %274 {approx = true} : vector<24x1xf32> -> vector<24x1xf32>
    %281 = vector.broadcast %280 : vector<24x1xf32> to vector<24x128xf32>
    %282 = arith.mulf %279, %281 : vector<24x128xf32>
    %283 = arith.truncf %282 : vector<24x128xf32> to vector<24x128xbf16>
    %c0_89 = arith.constant 0 : index
    %c384 = arith.constant 384 : index
    %284 = vector.load %arg13[%c0_89, %c384] : memref<24x512xbf16, #tpu.memory_space<vmem>>, vector<24x128xbf16>
    tpu.vector_store %arg13[%c0_89, %c384], %283 {strides = array<i32>} : memref<24x512xbf16, #tpu.memory_space<vmem>>, vector<24x128xbf16>,
    %cst_90 = arith.constant 0xFF800000 : f32
    %285 = vector.broadcast %cst_90 : f32 to vector<16x1xf32>
    %cst_91 = arith.constant 0.000000e+00 : f32
    %286 = vector.broadcast %cst_91 : f32 to vector<16x1xf32>
    %cst_92 = arith.constant 0.000000e+00 : f32
    %287 = vector.broadcast %cst_92 : f32 to vector<16x128xf32>
    %288 = vector.extract_strided_slice %255 {offsets = [0, 0], sizes = [16, 128], strides = [1, 1]} : vector<24x128xbf16> to vector<16x128xbf16>
    %289 = vector.extract_strided_slice %257 {offsets = [0, 0], sizes = [16, 128], strides = [1, 1]} : vector<24x128xbf16> to vector<16x128xbf16>
    %cst_93 = arith.constant dense<0.000000e+00> : vector<16x16xf32>
    %290 = tpu.matmul %256, %288, %cst_93 {dimension_numbers = #tpu.dot_dimension_numbers<[1], [1], [0], [0], [0, 0, 1, 0], [], []>} : vector<16x128xbf16>, vector<16x128xbf16>, vector<16x16xf32> -> vector<16x16xf32>
    %cst_94 = arith.constant dense<0xFF800000> : vector<16xf32>
    %291 = vector.multi_reduction <maximumf>, %290, %cst_94 [1] : vector<16x16xf32> to vector<16xf32>
    %292 = vector.shape_cast %291 : vector<16xf32> to vector<16x1xf32>
    %293 = arith.maximumf %285, %292 : vector<16x1xf32>
    %294 = arith.subf %285, %293 : vector<16x1xf32>
    %295 = math.exp %294 : vector<16x1xf32>
    %296 = vector.broadcast %293 : vector<16x1xf32> to vector<16x16xf32>
    %297 = arith.subf %290, %296 : vector<16x16xf32>
    %298 = math.exp %297 : vector<16x16xf32>
    %299 = arith.mulf %295, %286 : vector<16x1xf32>
    %cst_95 = arith.constant dense<0.000000e+00> : vector<16xf32>
    %300 = vector.multi_reduction <add>, %298, %cst_95 [1] : vector<16x16xf32> to vector<16xf32>
    %301 = vector.shape_cast %300 : vector<16xf32> to vector<16x1xf32>
    %302 = arith.addf %299, %301 : vector<16x1xf32>
    %303 = vector.broadcast %295 : vector<16x1xf32> to vector<16x128xf32>
    %304 = arith.mulf %303, %287 : vector<16x128xf32>
    %305 = arith.truncf %298 : vector<16x16xf32> to vector<16x16xbf16>
    %cst_96 = arith.constant dense<0.000000e+00> : vector<16x128xf32>
    %306 = tpu.matmul %305, %289, %cst_96 {dimension_numbers = #tpu.dot_dimension_numbers<[1], [0], [0], [1], [0, 0, 1, 1], [], []>} : vector<16x16xbf16>, vector<16x128xbf16>, vector<16x128xf32> -> vector<16x128xf32>
    %307 = arith.addf %304, %306 : vector<16x128xf32>
    %308 = vector.extract_strided_slice %255 {offsets = [16, 0], sizes = [8, 128], strides = [1, 1]} : vector<24x128xbf16> to vector<8x128xbf16>
    %309 = vector.extract_strided_slice %257 {offsets = [16, 0], sizes = [8, 128], strides = [1, 1]} : vector<24x128xbf16> to vector<8x128xbf16>
    %cst_97 = arith.constant dense<0.000000e+00> : vector<16x8xf32>
    %310 = tpu.matmul %256, %308, %cst_97 {dimension_numbers = #tpu.dot_dimension_numbers<[1], [1], [0], [0], [0, 0, 1, 0], [], []>} : vector<16x128xbf16>, vector<8x128xbf16>, vector<16x8xf32> -> vector<16x8xf32>
    %cst_98 = arith.constant dense<0xFF800000> : vector<16xf32>
    %311 = vector.multi_reduction <maximumf>, %310, %cst_98 [1] : vector<16x8xf32> to vector<16xf32>
    %312 = vector.shape_cast %311 : vector<16xf32> to vector<16x1xf32>
    %313 = arith.maximumf %293, %312 : vector<16x1xf32>
    %314 = arith.subf %293, %313 : vector<16x1xf32>
    %315 = math.exp %314 : vector<16x1xf32>
    %316 = vector.broadcast %313 : vector<16x1xf32> to vector<16x8xf32>
    %317 = arith.subf %310, %316 : vector<16x8xf32>
    %318 = math.exp %317 : vector<16x8xf32>
    %319 = arith.mulf %315, %302 : vector<16x1xf32>
    %cst_99 = arith.constant dense<0.000000e+00> : vector<16xf32>
    %320 = vector.multi_reduction <add>, %318, %cst_99 [1] : vector<16x8xf32> to vector<16xf32>
    %321 = vector.shape_cast %320 : vector<16xf32> to vector<16x1xf32>
    %322 = arith.addf %319, %321 : vector<16x1xf32>
    %323 = vector.broadcast %315 : vector<16x1xf32> to vector<16x128xf32>
    %324 = arith.mulf %323, %307 : vector<16x128xf32>
    %325 = arith.truncf %318 : vector<16x8xf32> to vector<16x8xbf16>
    %cst_100 = arith.constant dense<0.000000e+00> : vector<16x128xf32>
    %326 = tpu.matmul %325, %309, %cst_100 {dimension_numbers = #tpu.dot_dimension_numbers<[1], [0], [0], [1], [0, 0, 1, 1], [], []>} : vector<16x8xbf16>, vector<8x128xbf16>, vector<16x128xf32> -> vector<16x128xf32>
    %327 = arith.addf %324, %326 : vector<16x128xf32>
    %328 = tpu.reciprocal %322 {approx = true} : vector<16x1xf32> -> vector<16x1xf32>
    %329 = vector.broadcast %328 : vector<16x1xf32> to vector<16x128xf32>
    %330 = arith.mulf %327, %329 : vector<16x128xf32>
    %331 = arith.truncf %330 : vector<16x128xf32> to vector<16x128xbf16>
    %c0_101 = arith.constant 0 : index
    %c384_102 = arith.constant 384 : index
    %332 = vector.load %arg14[%c0_101, %c384_102] : memref<16x512xbf16, #tpu.memory_space<vmem>>, vector<16x128xbf16>
    tpu.vector_store %arg14[%c0_101, %c384_102], %331 {strides = array<i32>} : memref<16x512xbf16, #tpu.memory_space<vmem>>, vector<16x128xbf16>,
    %c0_103 = arith.constant 0 : index
    %c0_104 = arith.constant 0 : index
    %333 = vector.load %arg5[%c0_103, %c0_104] : memref<512x64xbf16, #tpu.memory_space<vmem>>, vector<512x64xbf16>
    %c0_105 = arith.constant 0 : index
    %c0_106 = arith.constant 0 : index
    %334 = vector.load %arg13[%c0_105, %c0_106] : memref<24x512xbf16, #tpu.memory_space<vmem>>, vector<24x512xbf16>
    %cst_107 = arith.constant dense<0.000000e+00> : vector<24x64xf32>
    %335 = tpu.matmul %334, %333, %cst_107 {dimension_numbers = #tpu.dot_dimension_numbers<[1], [0], [0], [1], [0, 0, 1, 1], [], []>} : vector<24x512xbf16>, vector<512x64xbf16>, vector<24x64xf32> -> vector<24x64xf32>
    %336 = vector.broadcast %5 : vector<1x64xf32> to vector<24x64xf32>
    %337 = arith.addf %335, %336 : vector<24x64xf32>
    %c0_108 = arith.constant 0 : index
    %c0_109 = arith.constant 0 : index
    %338 = vector.load %arg14[%c0_108, %c0_109] : memref<16x512xbf16, #tpu.memory_space<vmem>>, vector<16x512xbf16>
    %cst_110 = arith.constant dense<0.000000e+00> : vector<16x64xf32>
    %339 = tpu.matmul %338, %333, %cst_110 {dimension_numbers = #tpu.dot_dimension_numbers<[1], [0], [0], [1], [0, 0, 1, 1], [], []>} : vector<16x512xbf16>, vector<512x64xbf16>, vector<16x64xf32> -> vector<16x64xf32>
    %340 = vector.broadcast %5 : vector<1x64xf32> to vector<16x64xf32>
    %341 = arith.addf %339, %340 : vector<16x64xf32>
    %c0_111 = arith.constant 0 : index
    %c0_112 = arith.constant 0 : index
    %342 = vector.load %arg6[%c0_111, %c0_112] : memref<64x128xbf16, #tpu.memory_space<vmem>>, vector<64x128xbf16>
    %c0_113 = arith.constant 0 : index
    %c0_114 = arith.constant 0 : index
    %343 = vector.load %arg7[%c0_113, %c0_114] : memref<64x128xbf16, #tpu.memory_space<vmem>>, vector<64x128xbf16>
    %c0_115 = arith.constant 0 : index
    %c0_116 = arith.constant 0 : index
    %344 = vector.load %arg8[%c0_115, %c0_116] : memref<128x64xbf16, #tpu.memory_space<vmem>>, vector<128x64xbf16>
    %cst_117 = arith.constant dense<0.000000e+00> : vector<24x128xf32>
    %345 = tpu.matmul %10, %342, %cst_117 {dimension_numbers = #tpu.dot_dimension_numbers<[1], [0], [0], [1], [0, 0, 1, 1], [], []>} : vector<24x64xbf16>, vector<64x128xbf16>, vector<24x128xf32> -> vector<24x128xf32>
    %346 = arith.truncf %337 : vector<24x64xf32> to vector<24x64xbf16>
    %cst_118 = arith.constant dense<0.000000e+00> : vector<24x128xf32>
    %347 = tpu.matmul %346, %343, %cst_118 {dimension_numbers = #tpu.dot_dimension_numbers<[1], [0], [0], [1], [0, 0, 1, 1], [], []>} : vector<24x64xbf16>, vector<64x128xbf16>, vector<24x128xf32> -> vector<24x128xf32>
    %348 = arith.addf %345, %347 : vector<24x128xf32>
    %349 = vector.broadcast %7 : vector<1x128xf32> to vector<24x128xf32>
    %350 = arith.addf %348, %349 : vector<24x128xf32>
    %cst_119 = arith.constant dense<0.000000e+00> : vector<24xf32>
    %351 = vector.multi_reduction <add>, %350, %cst_119 [1] : vector<24x128xf32> to vector<24xf32>
    %352 = vector.shape_cast %351 : vector<24xf32> to vector<24x1xf32>
    %cst_120 = arith.constant 1.280000e+02 : f32
    %353 = vector.broadcast %cst_120 : f32 to vector<24x1xf32>
    %354 = arith.divf %352, %353 : vector<24x1xf32>
    %355 = vector.broadcast %354 : vector<24x1xf32> to vector<24x128xf32>
    %356 = arith.subf %350, %355 : vector<24x128xf32>
    %357 = arith.mulf %356, %356 : vector<24x128xf32>
    %cst_121 = arith.constant dense<0.000000e+00> : vector<24xf32>
    %358 = vector.multi_reduction <add>, %357, %cst_121 [1] : vector<24x128xf32> to vector<24xf32>
    %359 = vector.shape_cast %358 : vector<24xf32> to vector<24x1xf32>
    %cst_122 = arith.constant 1.280000e+02 : f32
    %360 = vector.broadcast %cst_122 : f32 to vector<24x1xf32>
    %361 = arith.divf %359, %360 : vector<24x1xf32>
    %362 = vector.broadcast %354 : vector<24x1xf32> to vector<24x128xf32>
    %363 = arith.subf %350, %362 : vector<24x128xf32>
    %cst_123 = arith.constant 9.99999974E-6 : f32
    %364 = vector.broadcast %cst_123 : f32 to vector<24x1xf32>
    %365 = arith.addf %361, %364 : vector<24x1xf32>
    %366 = math.rsqrt %365 : vector<24x1xf32>
    %367 = vector.broadcast %366 : vector<24x1xf32> to vector<24x128xf32>
    %368 = arith.mulf %363, %367 : vector<24x128xf32>
    %369 = vector.broadcast %8 : vector<1x128xf32> to vector<24x128xf32>
    %370 = arith.mulf %368, %369 : vector<24x128xf32>
    %371 = vector.broadcast %9 : vector<1x128xf32> to vector<24x128xf32>
    %372 = arith.addf %370, %371 : vector<24x128xf32>
    %cst_124 = arith.constant 5.000000e-01 : f32
    %373 = vector.broadcast %cst_124 : f32 to vector<24x128xf32>
    %374 = arith.mulf %373, %372 : vector<24x128xf32>
    %cst_125 = arith.constant 0.707106769 : f32
    %375 = vector.broadcast %cst_125 : f32 to vector<24x128xf32>
    %376 = arith.mulf %372, %375 : vector<24x128xf32>
    %377 = math.absf %376 : vector<24x128xf32>
    %cst_126 = arith.constant 0.327591091 : f32
    %378 = vector.broadcast %cst_126 : f32 to vector<24x128xf32>
    %379 = arith.mulf %378, %377 : vector<24x128xf32>
    %cst_127 = arith.constant 1.000000e+00 : f32
    %380 = vector.broadcast %cst_127 : f32 to vector<24x128xf32>
    %381 = arith.addf %380, %379 : vector<24x128xf32>
    %cst_128 = arith.constant 1.000000e+00 : f32
    %382 = vector.broadcast %cst_128 : f32 to vector<24x128xf32>
    %383 = arith.divf %382, %381 : vector<24x128xf32>
    %cst_129 = arith.constant 1.06140542 : f32
    %384 = vector.broadcast %cst_129 : f32 to vector<24x128xf32>
    %385 = arith.mulf %384, %383 : vector<24x128xf32>
    %cst_130 = arith.constant -1.45315206 : f32
    %386 = vector.broadcast %cst_130 : f32 to vector<24x128xf32>
    %387 = arith.addf %385, %386 : vector<24x128xf32>
    %388 = arith.mulf %387, %383 : vector<24x128xf32>
    %cst_131 = arith.constant 1.42141378 : f32
    %389 = vector.broadcast %cst_131 : f32 to vector<24x128xf32>
    %390 = arith.addf %388, %389 : vector<24x128xf32>
    %391 = arith.mulf %390, %383 : vector<24x128xf32>
    %cst_132 = arith.constant -0.284496725 : f32
    %392 = vector.broadcast %cst_132 : f32 to vector<24x128xf32>
    %393 = arith.addf %391, %392 : vector<24x128xf32>
    %394 = arith.mulf %393, %383 : vector<24x128xf32>
    %cst_133 = arith.constant 0.254829586 : f32
    %395 = vector.broadcast %cst_133 : f32 to vector<24x128xf32>
    %396 = arith.addf %394, %395 : vector<24x128xf32>
    %397 = arith.mulf %396, %383 : vector<24x128xf32>
    %cst_134 = arith.constant 0.000000e+00 : f32
    %398 = vector.broadcast %cst_134 : f32 to vector<24x128xf32>
    %399 = arith.subf %398, %377 : vector<24x128xf32>
    %400 = arith.mulf %399, %377 : vector<24x128xf32>
    %401 = math.exp %400 : vector<24x128xf32>
    %402 = arith.mulf %397, %401 : vector<24x128xf32>
    %cst_135 = arith.constant 1.000000e+00 : f32
    %403 = vector.broadcast %cst_135 : f32 to vector<24x128xf32>
    %404 = arith.subf %403, %402 : vector<24x128xf32>
    %cst_136 = arith.constant 0.000000e+00 : f32
    %405 = vector.broadcast %cst_136 : f32 to vector<24x128xf32>
    %406 = arith.cmpf olt, %376, %405 : vector<24x128xf32>
    %cst_137 = arith.constant 0.000000e+00 : f32
    %407 = vector.broadcast %cst_137 : f32 to vector<24x128xf32>
    %408 = arith.subf %407, %404 : vector<24x128xf32>
    %409 = arith.select %406, %408, %404 : vector<24x128xi1>, vector<24x128xf32>
    %cst_138 = arith.constant 1.000000e+00 : f32
    %410 = vector.broadcast %cst_138 : f32 to vector<24x128xf32>
    %411 = arith.addf %410, %409 : vector<24x128xf32>
    %412 = arith.mulf %374, %411 : vector<24x128xf32>
    %413 = arith.truncf %412 : vector<24x128xf32> to vector<24x128xbf16>
    %cst_139 = arith.constant dense<0.000000e+00> : vector<24x64xf32>
    %414 = tpu.matmul %413, %344, %cst_139 {dimension_numbers = #tpu.dot_dimension_numbers<[1], [0], [0], [1], [0, 0, 1, 1], [], []>} : vector<24x128xbf16>, vector<128x64xbf16>, vector<24x64xf32> -> vector<24x64xf32>
    %415 = vector.broadcast %6 : vector<1x64xf32> to vector<24x64xf32>
    %416 = arith.addf %414, %415 : vector<24x64xf32>
    %417 = arith.addf %1, %416 : vector<24x64xf32>
    %c0_140 = arith.constant 0 : index
    %c0_141 = arith.constant 0 : index
    %c0_142 = arith.constant 0 : index
    %418 = vector.load %arg11[%c0_140, %c0_141, %c0_142] : memref<1x24x64xf32, #tpu.memory_space<vmem>>, vector<1x24x64xf32>
    %419 = vector.shape_cast %418 : vector<1x24x64xf32> to vector<24x64xf32>
    %420 = vector.shape_cast %417 : vector<24x64xf32> to vector<1x24x64xf32>
    tpu.vector_store %arg11[%c0_140, %c0_141, %c0_142], %420 {strides = array<i32>} : memref<1x24x64xf32, #tpu.memory_space<vmem>>, vector<1x24x64xf32>,
    %cst_143 = arith.constant dense<0.000000e+00> : vector<16x128xf32>
    %421 = tpu.matmul %11, %342, %cst_143 {dimension_numbers = #tpu.dot_dimension_numbers<[1], [0], [0], [1], [0, 0, 1, 1], [], []>} : vector<16x64xbf16>, vector<64x128xbf16>, vector<16x128xf32> -> vector<16x128xf32>
    %422 = arith.truncf %341 : vector<16x64xf32> to vector<16x64xbf16>
    %cst_144 = arith.constant dense<0.000000e+00> : vector<16x128xf32>
    %423 = tpu.matmul %422, %343, %cst_144 {dimension_numbers = #tpu.dot_dimension_numbers<[1], [0], [0], [1], [0, 0, 1, 1], [], []>} : vector<16x64xbf16>, vector<64x128xbf16>, vector<16x128xf32> -> vector<16x128xf32>
    %424 = arith.addf %421, %423 : vector<16x128xf32>
    %425 = vector.broadcast %7 : vector<1x128xf32> to vector<16x128xf32>
    %426 = arith.addf %424, %425 : vector<16x128xf32>
    %cst_145 = arith.constant dense<0.000000e+00> : vector<16xf32>
    %427 = vector.multi_reduction <add>, %426, %cst_145 [1] : vector<16x128xf32> to vector<16xf32>
    %428 = vector.shape_cast %427 : vector<16xf32> to vector<16x1xf32>
    %cst_146 = arith.constant 1.280000e+02 : f32
    %429 = vector.broadcast %cst_146 : f32 to vector<16x1xf32>
    %430 = arith.divf %428, %429 : vector<16x1xf32>
    %431 = vector.broadcast %430 : vector<16x1xf32> to vector<16x128xf32>
    %432 = arith.subf %426, %431 : vector<16x128xf32>
    %433 = arith.mulf %432, %432 : vector<16x128xf32>
    %cst_147 = arith.constant dense<0.000000e+00> : vector<16xf32>
    %434 = vector.multi_reduction <add>, %433, %cst_147 [1] : vector<16x128xf32> to vector<16xf32>
    %435 = vector.shape_cast %434 : vector<16xf32> to vector<16x1xf32>
    %cst_148 = arith.constant 1.280000e+02 : f32
    %436 = vector.broadcast %cst_148 : f32 to vector<16x1xf32>
    %437 = arith.divf %435, %436 : vector<16x1xf32>
    %438 = vector.broadcast %430 : vector<16x1xf32> to vector<16x128xf32>
    %439 = arith.subf %426, %438 : vector<16x128xf32>
    %cst_149 = arith.constant 9.99999974E-6 : f32
    %440 = vector.broadcast %cst_149 : f32 to vector<16x1xf32>
    %441 = arith.addf %437, %440 : vector<16x1xf32>
    %442 = math.rsqrt %441 : vector<16x1xf32>
    %443 = vector.broadcast %442 : vector<16x1xf32> to vector<16x128xf32>
    %444 = arith.mulf %439, %443 : vector<16x128xf32>
    %445 = vector.broadcast %8 : vector<1x128xf32> to vector<16x128xf32>
    %446 = arith.mulf %444, %445 : vector<16x128xf32>
    %447 = vector.broadcast %9 : vector<1x128xf32> to vector<16x128xf32>
    %448 = arith.addf %446, %447 : vector<16x128xf32>
    %cst_150 = arith.constant 5.000000e-01 : f32
    %449 = vector.broadcast %cst_150 : f32 to vector<16x128xf32>
    %450 = arith.mulf %449, %448 : vector<16x128xf32>
    %cst_151 = arith.constant 0.707106769 : f32
    %451 = vector.broadcast %cst_151 : f32 to vector<16x128xf32>
    %452 = arith.mulf %448, %451 : vector<16x128xf32>
    %453 = math.absf %452 : vector<16x128xf32>
    %cst_152 = arith.constant 0.327591091 : f32
    %454 = vector.broadcast %cst_152 : f32 to vector<16x128xf32>
    %455 = arith.mulf %454, %453 : vector<16x128xf32>
    %cst_153 = arith.constant 1.000000e+00 : f32
    %456 = vector.broadcast %cst_153 : f32 to vector<16x128xf32>
    %457 = arith.addf %456, %455 : vector<16x128xf32>
    %cst_154 = arith.constant 1.000000e+00 : f32
    %458 = vector.broadcast %cst_154 : f32 to vector<16x128xf32>
    %459 = arith.divf %458, %457 : vector<16x128xf32>
    %cst_155 = arith.constant 1.06140542 : f32
    %460 = vector.broadcast %cst_155 : f32 to vector<16x128xf32>
    %461 = arith.mulf %460, %459 : vector<16x128xf32>
    %cst_156 = arith.constant -1.45315206 : f32
    %462 = vector.broadcast %cst_156 : f32 to vector<16x128xf32>
    %463 = arith.addf %461, %462 : vector<16x128xf32>
    %464 = arith.mulf %463, %459 : vector<16x128xf32>
    %cst_157 = arith.constant 1.42141378 : f32
    %465 = vector.broadcast %cst_157 : f32 to vector<16x128xf32>
    %466 = arith.addf %464, %465 : vector<16x128xf32>
    %467 = arith.mulf %466, %459 : vector<16x128xf32>
    %cst_158 = arith.constant -0.284496725 : f32
    %468 = vector.broadcast %cst_158 : f32 to vector<16x128xf32>
    %469 = arith.addf %467, %468 : vector<16x128xf32>
    %470 = arith.mulf %469, %459 : vector<16x128xf32>
    %cst_159 = arith.constant 0.254829586 : f32
    %471 = vector.broadcast %cst_159 : f32 to vector<16x128xf32>
    %472 = arith.addf %470, %471 : vector<16x128xf32>
    %473 = arith.mulf %472, %459 : vector<16x128xf32>
    %cst_160 = arith.constant 0.000000e+00 : f32
    %474 = vector.broadcast %cst_160 : f32 to vector<16x128xf32>
    %475 = arith.subf %474, %453 : vector<16x128xf32>
    %476 = arith.mulf %475, %453 : vector<16x128xf32>
    %477 = math.exp %476 : vector<16x128xf32>
    %478 = arith.mulf %473, %477 : vector<16x128xf32>
    %cst_161 = arith.constant 1.000000e+00 : f32
    %479 = vector.broadcast %cst_161 : f32 to vector<16x128xf32>
    %480 = arith.subf %479, %478 : vector<16x128xf32>
    %cst_162 = arith.constant 0.000000e+00 : f32
    %481 = vector.broadcast %cst_162 : f32 to vector<16x128xf32>
    %482 = arith.cmpf olt, %452, %481 : vector<16x128xf32>
    %cst_163 = arith.constant 0.000000e+00 : f32
    %483 = vector.broadcast %cst_163 : f32 to vector<16x128xf32>
    %484 = arith.subf %483, %480 : vector<16x128xf32>
    %485 = arith.select %482, %484, %480 : vector<16x128xi1>, vector<16x128xf32>
    %cst_164 = arith.constant 1.000000e+00 : f32
    %486 = vector.broadcast %cst_164 : f32 to vector<16x128xf32>
    %487 = arith.addf %486, %485 : vector<16x128xf32>
    %488 = arith.mulf %450, %487 : vector<16x128xf32>
    %489 = arith.truncf %488 : vector<16x128xf32> to vector<16x128xbf16>
    %cst_165 = arith.constant dense<0.000000e+00> : vector<16x64xf32>
    %490 = tpu.matmul %489, %344, %cst_165 {dimension_numbers = #tpu.dot_dimension_numbers<[1], [0], [0], [1], [0, 0, 1, 1], [], []>} : vector<16x128xbf16>, vector<128x64xbf16>, vector<16x64xf32> -> vector<16x64xf32>
    %491 = vector.broadcast %6 : vector<1x64xf32> to vector<16x64xf32>
    %492 = arith.addf %490, %491 : vector<16x64xf32>
    %493 = arith.addf %3, %492 : vector<16x64xf32>
    %c0_166 = arith.constant 0 : index
    %c0_167 = arith.constant 0 : index
    %c0_168 = arith.constant 0 : index
    %494 = vector.load %arg12[%c0_166, %c0_167, %c0_168] : memref<1x16x64xf32, #tpu.memory_space<vmem>>, vector<1x16x64xf32>
    %495 = vector.shape_cast %494 : vector<1x16x64xf32> to vector<16x64xf32>
    %496 = vector.shape_cast %493 : vector<16x64xf32> to vector<1x16x64xf32>
    tpu.vector_store %arg12[%c0_166, %c0_167, %c0_168], %496 {strides = array<i32>} : memref<1x16x64xf32, #tpu.memory_space<vmem>>, vector<1x16x64xf32>,
    return
  }
  func.func @transform_0(%arg0: i32) -> (i32, i32, i32) {
    %c0_i32 = arith.constant 0 : i32
    %c0_i32_0 = arith.constant 0 : i32
    %c0_i32_1 = arith.constant 0 : i32
    return %arg0, %c0_i32, %c0_i32_0 : i32, i32, i32
  }
  func.func @transform_1(%arg0: i32) -> (i32, i32, i32) {
    %c0_i32 = arith.constant 0 : i32
    %c0_i32_0 = arith.constant 0 : i32
    %c0_i32_1 = arith.constant 0 : i32
    return %arg0, %c0_i32, %c0_i32_0 : i32, i32, i32
  }
  func.func @transform_2(%arg0: i32) -> (i32, i32) {
    %c0_i32 = arith.constant 0 : i32
    %c0_i32_0 = arith.constant 0 : i32
    %c0_i32_1 = arith.constant 0 : i32
    return %c0_i32, %c0_i32_0 : i32, i32
  }
  func.func @transform_3(%arg0: i32) -> (i32, i32) {
    %c0_i32 = arith.constant 0 : i32
    %c0_i32_0 = arith.constant 0 : i32
    %c0_i32_1 = arith.constant 0 : i32
    return %c0_i32, %c0_i32_0 : i32, i32
  }
  func.func @transform_4(%arg0: i32) -> (i32, i32) {
    %c0_i32 = arith.constant 0 : i32
    %c0_i32_0 = arith.constant 0 : i32
    %c0_i32_1 = arith.constant 0 : i32
    return %c0_i32, %c0_i32_0 : i32, i32
  }
  func.func @transform_5(%arg0: i32) -> (i32, i32) {
    %c0_i32 = arith.constant 0 : i32
    %c0_i32_0 = arith.constant 0 : i32
    %c0_i32_1 = arith.constant 0 : i32
    return %c0_i32, %c0_i32_0 : i32, i32
  }
  func.func @transform_6(%arg0: i32) -> (i32, i32) {
    %c0_i32 = arith.constant 0 : i32
    %c0_i32_0 = arith.constant 0 : i32
    %c0_i32_1 = arith.constant 0 : i32
    return %c0_i32, %c0_i32_0 : i32, i32
  }
  func.func @transform_7(%arg0: i32) -> (i32, i32) {
    %c0_i32 = arith.constant 0 : i32
    %c0_i32_0 = arith.constant 0 : i32
    %c0_i32_1 = arith.constant 0 : i32
    return %c0_i32, %c0_i32_0 : i32, i32
  }
  func.func @transform_8(%arg0: i32) -> (i32, i32) {
    %c0_i32 = arith.constant 0 : i32
    %c0_i32_0 = arith.constant 0 : i32
    %c0_i32_1 = arith.constant 0 : i32
    return %c0_i32, %c0_i32_0 : i32, i32
  }
  func.func @transform_9(%arg0: i32) -> (i32, i32) {
    %c0_i32 = arith.constant 0 : i32
    %c0_i32_0 = arith.constant 0 : i32
    %c0_i32_1 = arith.constant 0 : i32
    return %c0_i32, %c0_i32_0 : i32, i32
  }
  func.func @transform_10(%arg0: i32) -> (i32, i32, i32) {
    %c0_i32 = arith.constant 0 : i32
    %c0_i32_0 = arith.constant 0 : i32
    %c0_i32_1 = arith.constant 0 : i32
    return %arg0, %c0_i32, %c0_i32_0 : i32, i32, i32
  }
  func.func @transform_11(%arg0: i32) -> (i32, i32, i32) {
    %c0_i32 = arith.constant 0 : i32
    %c0_i32_0 = arith.constant 0 : i32
    %c0_i32_1 = arith.constant 0 : i32
    return %arg0, %c0_i32, %c0_i32_0 : i32, i32, i32
  }
}

</mosaic_0001>

<bundles_post_ra>
// kernel: tpu_custom_call.1
= control target key start
LH: loop header
LB: loop body
LE: loop exit
PB: predicated region body
PF: predicated region fallthrough
CT: control target
= control target key end

     0   :  { %s5607_s0 = inlined_call_operand.vmem [shape: f32[2,24,64], index: 0, kind: input, shape index: {}]   ;;  %s5608_s1 = inlined_call_operand.vmem [shape: f32[2,16,64], index: 1, kind: input, shape index: {}]   ;;  %s5609_s2 = inlined_call_operand.vmem [shape: bf16[64,1024], index: 2, kind: input, shape index: {}]   ;;  %s5610_s3 = inlined_call_operand.vmem [shape: f32[1,1024], index: 3, kind: input, shape index: {}]   ;;  %s5611_s4 = inlined_call_operand.vmem [shape: bf16[512,64], index: 4, kind: input, shape index: {}]   ;;  %s5612_s5 = inlined_call_operand.vmem [shape: bf16[64,128], index: 5, kind: input, shape index: {}]   ;;  %s5613_s6 = inlined_call_operand.vmem [shape: bf16[64,128], index: 6, kind: input, shape index: {}]   ;;  %s5614_s7 = inlined_call_operand.vmem [shape: bf16[128,64], index: 7, kind: input, shape index: {}]   ;;  %s5615_s8 = inlined_call_operand.vmem [shape: f32[2,64], index: 8, kind: input, shape index: {}]   ;;  %s5616_s9 = inlined_call_operand.vmem [shape: f32[3,128], index: 9, kind: input, shape index: {}]   ;;  %s5617_s10 = inlined_call_operand.hbm [shape: f32[2,24,64], index: 10, kind: output, shape index: {0}]   ;;  %s5618_s11 = inlined_call_operand.hbm [shape: f32[2,16,64], index: 11, kind: output, shape index: {1}]  }
   0x1   :  { %5622 = sst [smem:[#allocation13_spill]] %s5607_s0 }
   0x2   :  { %5623 = sst [smem:[#allocation14_spill]] %s5608_s1 }
   0x3   :  { %17 = vsyncpa [#allocation5], 0 }
   0x4   :  { %19 = vsyncpa [#allocation5 + $0x1], 0 }
   0x5   :  { %20 = vsyncpa [#allocation7], 0 }
   0x6   :  { %22 = vsyncpa [#allocation7 + $0x1], 0  ;;  %s4067_s17 = smov 0   ;;  %s4069_s18 = smov 0  }
   0x7   :  { %s4071_s19 = smov 0   ;;  %s4073_s20 = smov 0  }
   0x8 LB: > { %5624 = sst [smem:[#allocation10_spill]] %s3998_s19  ;;  %s4088_s21 = sadd.s32 4294967295, %s4002_s20   ;;  %s4002_s20 = sphi %s4073_s20, %s5631_s20   ;;  %s3998_s19 = sphi %s4071_s19, %s5633_s19   ;;  %s3994_s18 = sphi %s4069_s18, %s5635_s18   ;;  %s3990_s17 = sphi %s4067_s17, %s5634_s17  }
   0x9   : > { %s3158_s22 = sadd.s32 4294967294, %s4002_s20   ;;  %s4092_s23 = sadd.s32 1, %s4002_s20  }
   0xa   : > { %5625 = sst [smem:[#allocation11_spill]] %s4092_s23  ;;  %s255_s24 = sadd.s32 1, %s3998_s19 }
   0xb   : > { %s252_s25 = ssub.s32 %s4002_s20, %s4092_s23  ;;  %p265_p0 = scmp.ne.s32.totalorder %s3998_s19, %s3994_s18 }
   0xc   : > { %p253_p1 = scmp.eq.s32.totalorder %s252_s25, 0  ;;  %p266_p2 = scmp.eq.s32.totalorder %s4088_s21, 1 }
   0xd   : > { %p271_p3 = scmp.ne.s32.totalorder %s3994_s18, %s3990_s17  ;;  %p272_p4 = scmp.eq.s32.totalorder %s3158_s22, 1 }
   0xe   : > { %s4103_s26 = scalar_select %p253_p1, %s3998_s19, %s255_s24  }
   0xf   : > { %p4105_p5 = por %p266_p2, %p265_p0  ;;  %p4109_p6 = por %p272_p4, %p271_p3 }
  0x10   : > { %5626 = sst [smem:[#allocation12_spill]] %s4103_s26  ;;  %p3161_p7 = scmp.ge.s32.totalorder %s4002_s20, 1 }
  0x11   : > { %p356_p8 = scmp.lt.s32.totalorder %s4002_s20, 3 }
  0x13   : > { %p357_p9 = pnand %p3161_p7, %p356_p8 }
  0x14   : > { %p406_p10 = scmp.lt.s32.totalorder (!%p357_p9), %s4088_s21, 1  ;;  %s5629_s0 = sld [smem:[#allocation13_spill]] (!%p357_p9) }
  0x15   : > { %360 = sbr.rel (%p357_p9) target bundleno = 1555 (0x613), region = 60  ;;  %s5630_s1 = sld [smem:[#allocation14_spill]] (!%p357_p9) }
  0x16   : > { %s5537_s29 = sand.u32 (!%p357_p9), 1, %s3994_s18   ;;  %s3666_s14 = smul.u32 (!%p357_p9), 24, %s4088_s21 }
  0x17   : > { %s3664_s12 = smul.u32 (!%p357_p9), 24, %s5537_s29  ;;  %s3928_s16 = scalar_lea.hbm (!%p357_p9), %s5617_s10, 48 }
  0x18   : > { %s3030_s24 = scalar_lea.hbm (!%p357_p9), %s5617_s10, %s3666_s14 }
  0x19   : > { %s3033_s25 = sshll.u32 (!%p357_p9), %s3030_s24, 4  ;;  %s3034_s25 = int_to_ptr.hbm [resolvable:$true] %s3033_s25 }
  0x1a   : > { %v3264_v0 = vld [vmem:[%s5609_s2 + $0xc0] sm:$0xf]  ;;  %v3595_v2 = vld [vmem:[%s5609_s2 + $0xc4] sm:$0xf]  ;;  %s4180_s30 = scalar_select %p406_p10, %s4088_s21, 1  ;;  %vm640_vm0 = vcmask 523264  }
  0x1b   : > { %v3599_v1 = vld [vmem:[%s5609_s2 + $0xdc] sm:$0xf0]  ;;  %v3266_v4 = vld [vmem:[%s5609_s2 + $0xe0] sm:$0xf0]  ;;  %v3280_v22 = vld [vmem:[%s5609_s2 + $0xd0] sm:$0xf] }
  0x1c   : > { %v4124_v3 = vor.u32 %v3599_v1, %v3264_v0  ;;  %v3232_v5 = vld [vmem:[%s5609_s2 + $0x80] sm:$0xf]  ;;  %v4135_v7 = vor.u32 %v3595_v2, %v3266_v4  ;;  %v3587_v8 = vld [vmem:[%s5609_s2 + $0x84] sm:$0xf]  ;;  %v3601_v23 = vld [vmem:[%s5609_s2 + $0xec] sm:$0xf0] }
  0x1d   : > { %v3591_v6 = vld [vmem:[%s5609_s2 + $0x9c] sm:$0xf0]  ;;  %v3234_v9 = vld [vmem:[%s5609_s2 + $0xa0] sm:$0xf0]  ;;  %v3597_v24 = vld [vmem:[%s5609_s2 + $0xd4] sm:$0xf]  ;;  %v4232_v37 = vor.u32 %v3601_v23, %v3280_v22 }
  0x1e   : > { %651 = vmatpush.bf16.msra.mxu0 %v4124_v3  ;;  %v4144_v10 = vor.u32 %v3591_v6, %v3232_v5  ;;  %3660 = vmatpush.bf16.msra.mxu2 %v4124_v3  ;;  %v4148_v11 = vor.u32 %v3587_v8, %v3234_v9  ;;  %v3200_v12 = vld [vmem:[%s5609_s2 + $0x40] sm:$0xf]  ;;  %v3579_v14 = vld [vmem:[%s5609_s2 + $0x44] sm:$0xf]  ;;  %s3665_s22 = smul.u32 24, %s4180_s30  ;;  %s3570_s26 = sshll.u32 %s4180_s30, 4 }
  0x1f   : > { %669 = vmatpush.bf16.msra.mxu1 %v4135_v7  ;;  %v3583_v13 = vld [vmem:[%s5609_s2 + $0x5c] sm:$0xf0]  ;;  %v3202_v15 = vld [vmem:[%s5609_s2 + $0x60] sm:$0xf0]  ;;  %v3282_v25 = vld [vmem:[%s5609_s2 + $0xf0] sm:$0xf0]  ;;  %s4440_s13 = scalar_lea.vmem %s5630_s1, %s3570_s26 }
  0x20   : > { %v3168_v16 = vld [vmem:[%s5609_s2] sm:$0xf]  ;;  %v4170_v18 = vor.u32 %v3583_v13, %v3200_v12  ;;  %v3571_v19 = vld [vmem:[%s5609_s2 + $0x4] sm:$0xf]  ;;  %v4183_v21 = vor.u32 %v3579_v14, %v3202_v15  ;;  %v3272_v26 = vld [vmem:[%s5609_s2 + $0xc8] sm:$0xf]  ;;  %s4216_s19 = scalar_lea.vmem %s5629_s0, %s3665_s22  ;;  %v4235_v39 = vor.u32 %v3597_v24, %v3282_v25 }
  0x21   : > { %v3575_v17 = vld [vmem:[%s5609_s2 + $0x1c] sm:$0xf0]  ;;  %v3170_v20 = vld [vmem:[%s5609_s2 + $0x20] sm:$0xf0]  ;;  %v3600_v27 = vld [vmem:[%s5609_s2 + $0xe4] sm:$0xf0] }
  0x22   : > { %652 = vmatpush.bf16.msra.mxu0 %v4144_v10  ;;  %3661 = vmatpush.bf16.msra.mxu2 %v4144_v10  ;;  %v3596_v28 = vld [vmem:[%s5609_s2 + $0xcc] sm:$0xf]  ;;  %v4211_v30 = vor.u32 %v3575_v17, %v3168_v16  ;;  %v3248_v31 = vld [vmem:[%s5609_s2 + $0x90] sm:$0xf]  ;;  %v4228_v34 = vor.u32 %v3571_v19, %v3170_v20  ;;  %v417_v35 = vld [vmem:[%s4216_s19] sm:$0xff]  ;;  %v4240_v41 = vor.u32 %v3600_v27, %v3272_v26  ;;  %vm1169_vm1 = vcmask 1043456  }
  0x23   : > { %670 = vmatpush.bf16.msra.mxu1 %v4148_v11  ;;  %v3274_v29 = vld [vmem:[%s5609_s2 + $0xe8] sm:$0xf0]  ;;  %v3593_v32 = vld [vmem:[%s5609_s2 + $0xac] sm:$0xf0]  ;;  %v3589_v40 = vld [vmem:[%s5609_s2 + $0x94] sm:$0xf] }
  0x24   : > { %v4225_v33 = vor.u32 %v3596_v28, %v3274_v29  ;;  %v418_v36 = vld [vmem:[%s4216_s19 + $0x8] sm:$0xff]  ;;  %v419_v38 = vld [vmem:[%s4216_s19 + $0x10] sm:$0xff]  ;;  %v4274_v52 = vor.u32 %v3593_v32, %v3248_v31  ;;  %v3288_v17 = vld [vmem:[%s5609_s2 + $0xd8] sm:$0xf]  ;;  %vm960_vm2 = vcmask 130048   ;;  %vm1132_vm3 = vcmask 64512  }
  0x25   : > { %v3588_v42 = vld [vmem:[%s5609_s2 + $0x8c] sm:$0xf]  ;;  %v4249_v44 = vpack.c.bf16 %v418_v36, %v417_v35  ;;  %v4251_v45 = vpack.c.bf16 %v419_v38, %v419_v38  ;;  %v3250_v46 = vld [vmem:[%s5609_s2 + $0xb0] sm:$0xf0]  ;;  %v3240_v47 = vld [vmem:[%s5609_s2 + $0x88] sm:$0xf] }
  0x26   : > { %653 = vmatpush.bf16.msra.mxu0 %v4170_v18  ;;  %3662 = vmatpush.bf16.msra.mxu2 %v4170_v18  ;;  %v3242_v43 = vld [vmem:[%s5609_s2 + $0xa8] sm:$0xf0]  ;;  %v3592_v48 = vld [vmem:[%s5609_s2 + $0xa4] sm:$0xf0]  ;;  %v3216_v49 = vld [vmem:[%s5609_s2 + $0x50] sm:$0xf]  ;;  %v4286_v56 = vor.u32 %v3589_v40, %v3250_v46 }
  0x27   : > { %671 = vmatpush.bf16.msra.mxu1 %v4183_v21  ;;  %705 = vmatpush.bf16.msra.mxu3 %v4225_v33  ;;  %v3585_v50 = vld [vmem:[%s5609_s2 + $0x6c] sm:$0xf0]  ;;  %v4270_v51 = vor.u32 %v3588_v42, %v3242_v43  ;;  %v3581_v53 = vld [vmem:[%s5609_s2 + $0x54] sm:$0xf]  ;;  %v3580_v54 = vld [vmem:[%s5609_s2 + $0x4c] sm:$0xf]  ;;  %v4289_v57 = vor.u32 %v3592_v48, %v3240_v47 }
  0x28   : > { %v3210_v55 = vld [vmem:[%s5609_s2 + $0x68] sm:$0xf0]  ;;  %v3218_v58 = vld [vmem:[%s5609_s2 + $0x70] sm:$0xf0]  ;;  %v3208_v59 = vld [vmem:[%s5609_s2 + $0x48] sm:$0xf]  ;;  %v4310_v62 = vor.u32 %v3585_v50, %v3216_v49 }
  0x29   : > { %v3584_v60 = vld [vmem:[%s5609_s2 + $0x64] sm:$0xf0]  ;;  %v4307_v61 = vor.u32 %v3580_v54, %v3210_v55  ;;  %v3572_v63 = vld [vmem:[%s5609_s2 + $0xc] sm:$0xf]  ;;  %v3184_v1 = vld [vmem:[%s5609_s2 + $0x10] sm:$0xf]  ;;  %v4326_v4 = vor.u32 %v3581_v53, %v3218_v58 }
  0x2a   : > { %654 = vmatpush.bf16.msra.mxu0 %v4211_v30  ;;  %3663 = vmatpush.bf16.msra.mxu2 %v4211_v30  ;;  %v3178_v0 = vld [vmem:[%s5609_s2 + $0x28] sm:$0xf0]  ;;  %v3577_v2 = vld [vmem:[%s5609_s2 + $0x2c] sm:$0xf0]  ;;  %v4328_v5 = vor.u32 %v3584_v60, %v3208_v59  ;;  %v3573_v6 = vld [vmem:[%s5609_s2 + $0x14] sm:$0xf] }
  0x2b   : > { %672 = vmatpush.bf16.msra.mxu1 %v4228_v34  ;;  %706 = vmatpush.bf16.msra.mxu3 %v4270_v51  ;;  %v3186_v8 = vld [vmem:[%s5609_s2 + $0x30] sm:$0xf0]  ;;  %v3176_v9 = vld [vmem:[%s5609_s2 + $0x8] sm:$0xf]  ;;  %v4343_v13 = vor.u32 %v3572_v63, %v3178_v0  ;;  %v4346_v14 = vor.u32 %v3577_v2, %v3184_v1  ;;  %v3290_v20 = vld [vmem:[%s5609_s2 + $0xf8] sm:$0xf0] }
  0x2c   : > { %v3576_v12 = vld [vmem:[%s5609_s2 + $0x24] sm:$0xf0]  ;;  %v4350_v15 = vor.u32 %v3573_v6, %v3186_v8  ;;  %v3594_v22 = vld [vmem:[%s5609_s2 + $0xb4] sm:$0xf0]  ;;  %v3590_v24 = vld [vmem:[%s5609_s2 + $0x9c] sm:$0xf] }
  0x2d   : > { %3294 = vmatmul.msk.bf16.vlgmr.msra.gmra.mxu0 %vm640_vm0, %v4249_v44  ;;  %3295 = vmatmul.msk.bf16.vlgmr.msra.gmra.mxu2 %vm640_vm0, %v4251_v45  ;;  %v4352_v16 = vor.u32 %v3576_v12, %v3176_v9  ;;  %v3224_v27 = vld [vmem:[%s5609_s2 + $0x58] sm:$0xf]  ;;  %v3582_v29 = vld [vmem:[%s5609_s2 + $0x5c] sm:$0xf]  ;;  %v4485_v40 = vld [vmem:[%s5610_s3] sm:$0xff]  ;;  %s398_s30 = scalar_lea.vmem [#allocation4], %s3664_s12 }
  0x2e   : > { %723 = vmatpush.bf16.msrb.mxu0 %v4232_v37  ;;  %687 = vmatpush.bf16.msrb.mxu2 %v4240_v41  ;;  %v3586_v28 = vld [vmem:[%s5609_s2 + $0x74] sm:$0xf0]  ;;  %v3574_v36 = vld [vmem:[%s5609_s2 + $0x1c] sm:$0xf]  ;;  %v4488_v43 = vperm.slane %v4485_v40, 0  ;;  %v4491_v46 = vperm.slane %v4485_v40, 1 }
  0x2f   : > { %741 = vmatpush.bf16.msrb.mxu1 %v4235_v39  ;;  %707 = vmatpush.bf16.msra.mxu3 %v4307_v61  ;;  %v3225_v31 = vor.u32 %v3586_v28, %v3224_v27  ;;  %v3578_v35 = vld [vmem:[%s5609_s2 + $0x34] sm:$0xf0]  ;;  %v4503_v2 = vperm.slane %v4485_v40, 3  ;;  %v4508_v6 = vperm.slane %v4485_v40, 2  ;;  %s3031_s23 = sshll.u32 %s398_s30, 4  ;;  %s3014_s26 = scalar_lea.sflag [#allocation5], %s5537_s29  ;;  %s3032_s23 = int_to_ptr.vmem [resolvable:$true] %s3031_s23 }
  0x30   : > { %3296 = vmatmul.msk.bf16.vlgmr.msra.gmra.mxu1 %vm640_vm0, %v4249_v44  ;;  %s3922_s22 = sshra.s32 %s3034_s25, 4  ;;  %s3923_s22 = int_to_ptr.hbm [resolvable:$true] %s3922_s22 }
  0x31   : > { %s3924_s12 = scalar_lea.hbm %s3923_s22, 24  ;;  %p3929_p0 = scmp.lt.s32.totalorder %s3923_s22, %s5617_s10 }
  0x32   : > { %724 = vmatpush.bf16.msrb.mxu0 %v4274_v52  ;;  %688 = vmatpush.bf16.msrb.mxu2 %v4289_v57  ;;  %p3925_p11 = scmp.ne.s32.totalorder %s3923_s22, %s3924_s12  ;;  %p3930_p1 = scmp.lt.s32.totalorder %s3928_s16, %s3924_s12 }
  0x33   : > { %742 = vmatpush.bf16.msrb.mxu1 %v4286_v56  ;;  %708 = vmatpush.bf16.msra.mxu3 %v4343_v13 }
  0x34   : > { %p3926_p12 = pnand %p3925_p11, %p4105_p5  ;;  %p3931_p2 = por %p3930_p1, %p3929_p0 }
  0x36   : > { %725 = vmatpush.bf16.msrb.mxu0 %v4310_v62  ;;  %689 = vmatpush.bf16.msrb.mxu2 %v4328_v5  ;;  %p3927_p13 = pneg %p3926_p12 }
  0x37   : > { %743 = vmatpush.bf16.msrb.mxu1 %v4326_v4  ;;  %3300 = vmatmul.msk.bf16.vlgmr.msra.gmra.mxu3 %vm640_vm0, %v4249_v44 }
  0x38   : > { %p3932_p3 = pnand %p3931_p2, %p3927_p13 }
  0x3a   : > { %726 = vmatpush.bf16.msrb.mxu0 %v4346_v14  ;;  %690 = vmatpush.bf16.msrb.mxu2 %v4352_v16 }
  0x3b   : > { %744 = vmatpush.bf16.msrb.mxu1 %v4350_v15 }
  0x3d   : > { %3302 = vmatmul.msk.bf16.vlgmr.msrb.gmra.mxu0 %vm640_vm0, %v4249_v44  ;;  %3298 = vmatmul.msk.bf16.vlgmr.msrb.gmra.mxu2 %vm640_vm0, %v4249_v44 }
  0x3e   : > { %810 = vmatpush.bf16.msra.mxu0 %v4124_v3  ;;  %v3602_v3 = vld [vmem:[%s5609_s2 + $0xf4] sm:$0xf0] }
  0x3f   : > { %824 = vmatpush.bf16.msra.mxu1 %v4135_v7  ;;  %v3598_v7 = vld [vmem:[%s5609_s2 + $0xdc] sm:$0xf]  ;;  %v3289_v19 = vor.u32 %v3602_v3, %v3288_v17 }
  0x40   : > { %3297 = vmatmul.msk.bf16.gmra.mxu1 %vm640_vm0, %v4251_v45  ;;  %v3293_v23 = vor.u32 %v3598_v7, %v3290_v20  ;;  %v4522_v20 = vperm.slane %v4485_v40, 4 }
  0x41   : > { %759 = vmatpush.bf16.msra.mxu2 %v3289_v19 }
  0x42   : > { %811 = vmatpush.bf16.msra.mxu0 %v4144_v10  ;;  %v3256_v10 = vld [vmem:[%s5609_s2 + $0x98] sm:$0xf]  ;;  %777 = vmatpush.bf16.msrb.mxu3 %v3293_v23 }
  0x43   : > { %825 = vmatpush.bf16.msra.mxu1 %v4148_v11  ;;  %v3258_v11 = vld [vmem:[%s5609_s2 + $0xb8] sm:$0xf0]  ;;  %v3257_v25 = vor.u32 %v3594_v22, %v3256_v10  ;;  %v4525_v10 = vperm.slane %v4485_v40, 5 }
  0x44   : > { %v3261_v26 = vor.u32 %v3590_v24, %v3258_v11 }
  0x45   : > { %760 = vmatpush.bf16.msra.mxu2 %v3257_v25 }
  0x46   : > { %812 = vmatpush.bf16.msra.mxu0 %v4170_v18  ;;  %v3226_v18 = vld [vmem:[%s5609_s2 + $0x78] sm:$0xf0]  ;;  %778 = vmatpush.bf16.msrb.mxu3 %v3261_v26 }
  0x47   : > { %826 = vmatpush.bf16.msra.mxu1 %v4183_v21  ;;  %v3229_v32 = vor.u32 %v3582_v29, %v3226_v18  ;;  %v3192_v21 = vld [vmem:[%s5609_s2 + $0x18] sm:$0xf]  ;;  %3301 = vmatmul.msk.bf16.gmra.mxu3 %vm640_vm0, %v4251_v45 }
  0x49   : > { %761 = vmatpush.bf16.msra.mxu2 %v3225_v31 }
  0x4a   : > { %813 = vmatpush.bf16.msra.mxu0 %v4211_v30  ;;  %v3194_v30 = vld [vmem:[%s5609_s2 + $0x38] sm:$0xf0]  ;;  %779 = vmatpush.bf16.msrb.mxu3 %v3229_v32 }
  0x4b   : > { %827 = vmatpush.bf16.msra.mxu1 %v4228_v34  ;;  %v3193_v34 = vor.u32 %v3578_v35, %v3192_v21  ;;  %v3197_v38 = vor.u32 %v3574_v36, %v3194_v30 }
  0x4d   : > { %3303 = vmatmul.msk.bf16.gmra.mxu0 %vm640_vm0, %v4251_v45  ;;  %3299 = vmatmul.msk.bf16.gmra.mxu2 %vm640_vm0, %v4251_v45 }
  0x4e   : > { %866 = vmatpush.bf16.msrb.mxu0 %v4232_v37  ;;  %762 = vmatpush.bf16.msra.mxu2 %v3193_v34  ;;  %v421_v37 = vld [vmem:[%s4440_s13 + $0x8] sm:$0xff] }
  0x4f   : > { %780 = vmatpush.bf16.msrb.mxu3 %v3197_v38 }
  0x50   : > { %3304 = vmatmul.msk.bf16.vlgmr.msrb.gmra.mxu1 %vm640_vm0, %v4249_v44 }
  0x51   : > { %880 = vmatpush.bf16.msrb.mxu1 %v4235_v39 }
  0x52   : > { %867 = vmatpush.bf16.msrb.mxu0 %v4274_v52  ;;  %838 = vmatpush.bf16.msrb.mxu2 %v4240_v41 }
  0x53   : > { %852 = vmatpush.bf16.msra.mxu3 %v4225_v33  ;;  %v420_v33 = vld [vmem:[%s4440_s13] sm:$0xff] }
  0x54   : > { %v4451_v39 = vpack.c.bf16 %v421_v37, %v420_v33 }
  0x55   : > { %881 = vmatpush.bf16.msrb.mxu1 %v4286_v56 }
  0x56   : > { %868 = vmatpush.bf16.msrb.mxu0 %v4310_v62  ;;  %839 = vmatpush.bf16.msrb.mxu2 %v4289_v57 }
  0x57   : > { %853 = vmatpush.bf16.msra.mxu3 %v4270_v51 }
  0x58   : > { %3308 = vmatmul.msk.bf16.vlgmr.msrb.gmra.mxu3 %vm640_vm0, %v4249_v44 }
  0x59   : > { %882 = vmatpush.bf16.msrb.mxu1 %v4326_v4 }
  0x5a   : > { %869 = vmatpush.bf16.msrb.mxu0 %v4346_v14  ;;  %840 = vmatpush.bf16.msrb.mxu2 %v4328_v5 }
  0x5b   : > { %854 = vmatpush.bf16.msra.mxu3 %v4307_v61 }
  0x5d   : > { %883 = vmatpush.bf16.msrb.mxu1 %v4350_v15  ;;  %3310 = vmatmul.msk.bf16.vlgmr.msra.gmra.mxu0 %vm640_vm0, %v4451_v39 }
  0x5e   : > { %841 = vmatpush.bf16.msrb.mxu2 %v4352_v16 }
  0x5f   : > { %855 = vmatpush.bf16.msra.mxu3 %v4343_v13  ;;  %3306 = vmatmul.msk.bf16.vlgmr.msra.gmra.mxu2 %vm640_vm0, %v4249_v44 }
  0x60   : > { %3305 = vmatmul.msk.bf16.gmra.mxu1 %vm640_vm0, %v4251_v45 }
  0x62   : > { %894 = vmatpush.bf16.msra.mxu2 %v3289_v19 }
  0x63   : > { %908 = vmatpush.bf16.msrb.mxu3 %v3293_v23 }
  0x66   : > { %895 = vmatpush.bf16.msra.mxu2 %v3257_v25 }
  0x67   : > { %909 = vmatpush.bf16.msrb.mxu3 %v3261_v26 }
  0x68   : > { %3309 = vmatmul.msk.bf16.gmra.mxu3 %vm640_vm0, %v4251_v45 }
  0x6a   : > { %896 = vmatpush.bf16.msra.mxu2 %v3225_v31 }
  0x6b   : > { %910 = vmatpush.bf16.msrb.mxu3 %v3229_v32 }
  0x6d   : > { %3314 = vmatmul.msk.bf16.vlgmr.msrb.gmra.mxu0 %vm640_vm0, %v4451_v39 }
  0x6e   : > { %897 = vmatpush.bf16.msra.mxu2 %v3193_v34 }
  0x6f   : > { %911 = vmatpush.bf16.msrb.mxu3 %v3197_v38  ;;  %3307 = vmatmul.msk.bf16.gmra.mxu2 %vm640_vm0, %v4251_v45 }
  0x70   : > { %3311 = vmatmul.msk.bf16.vlgmr.msra.gmra.mxu1 %vm640_vm0, %v4451_v39 }
  0x78   : > { %3313 = vmatmul.msk.bf16.vlgmr.msra.gmra.mxu3 %vm640_vm0, %v4451_v39 }
  0x7f   : > { %3312 = vmatmul.msk.bf16.vlgmr.msrb.gmra.mxu2 %vm640_vm0, %v4451_v39 }
  0x80   : > { %3315 = vmatmul.msk.bf16.vlgmr.msrb.gmra.mxu1 %vm640_vm0, %v4451_v39 }
  0x88   : > { %3317 = vmatmul.msk.bf16.vlgmr.msrb.gmra.mxu3 %vm640_vm0, %v4451_v39 }
  0x8f   : > { %3316 = vmatmul.msk.bf16.vlgmr.msra.gmra.mxu2 %vm640_vm0, %v4451_v39 }
  0xaa   : > { %v656_v41 = vpop.f32.mrf.mxu0 }
  0xab   : > { %v657_v47 = vadd.f32 %v656_v41, %v4488_v43 }
  0xad   : > { %v674_v42 = vpop.f32.mrf.mxu1 }
  0xae   : > { %v675_v48 = vadd.f32 %v674_v42, %v4491_v46 }
  0xb0   : > { %v661_v49 = vpop.f32.mrf.mxu2  ;;  %v791_v53 = vpack.c.bf16 %v675_v48, %v657_v47  ;;  %v4539_v48 = vperm.slane %v4485_v40, 7 }
  0xb1   : > { %v662_v61 = vadd.f32 %v661_v49, %v4488_v43 }
  0xb2   : > { %v658_v50 = vpop.f32.mrf.mxu0  ;;  %v929_v56 = vunpack.c.l.b16 %v791_v53  ;;  %v1197_v57 = vunpack.c.h.b16 %v791_v53 }
  0xb3   : > { %v659_v51 = vadd.f32 %v658_v50, %v4488_v43 }
  0xb5   : > { %v676_v52 = vpop.f32.mrf.mxu1 }
  0xb6   : > { %v677_v54 = vadd.f32 %v676_v52, %v4491_v46 }
  0xb8   : > { %v795_v55 = vpack.c.bf16 %v677_v54, %v659_v51  ;;  %v663_v60 = vpop.f32.mrf.mxu2  ;;  %v4543_v51 = vperm.slane %v4485_v40, 6 }
  0xba   : > { %v930_v58 = vunpack.c.l.b16 %v795_v55  ;;  %v1198_v59 = vunpack.c.h.b16 %v795_v55  ;;  %v728_v63 = vpop.f32.mrf.mxu0  ;;  %v710_v5 = vpop.f32.mrf.mxu3 }
  0xbb   : > { %v711_v9 = vadd.f32 %v710_v5, %v4503_v2  ;;  %v729_v24 = vadd.f32 %v728_v63, %v4522_v20 }
  0xbc   : > { %v4498_v62 = vpack.c.b16 %v930_v58, %v929_v56  ;;  %v4500_v0 = vpack.c.b16 %v1198_v59, %v1197_v57 }
  0xbd   : > { %v679_v1 = vpop.f32.mrf.mxu1 }
  0xbe   : > { %v680_v4 = vadd.f32 %v679_v1, %v4491_v46  ;;  %1057 = vmatpush.bf16.xpose.msrb.mxu2 %v4498_v62 }
  0xc0   : > { %v4510_v8 = vpack.c.bf16 %v680_v4, %v662_v61  ;;  %v692_v12 = vpop.f32.mrf.mxu2 }
  0xc1   : > { %v693_v13 = vadd.f32 %v692_v12, %v4508_v6 }
  0xc2   : > { %v730_v14 = vpop.f32.mrf.mxu0  ;;  %v4517_v17 = vpop.f32.mrf.mxu3 }
  0xc3   : > { %v4515_v16 = vpack.c.bf16 %v711_v9, %v693_v13  ;;  %v731_v18 = vadd.f32 %v730_v14, %v4522_v20 }
  0xc5   : > { %v681_v15 = vpop.f32.mrf.mxu1 }
  0xc6   : > { %1125 = vmatpush.bf16.xpose.msra.mxu2 %v4510_v8 }
  0xc8   : > { %v4519_v3 = vpop.f32.mrf.mxu2 }
  0xca   : > { %v733_v7 = vpop.f32.mrf.mxu0  ;;  %v715_v22 = vpop.f32.mrf.mxu3 }
  0xcb   : > { %v716_v23 = vadd.f32 %v715_v22, %v4503_v2  ;;  %v734_v37 = vadd.f32 %v733_v7, %v4522_v20 }
  0xcd   : > { %v746_v19 = vpop.f32.mrf.mxu1 }
  0xce   : > { %v747_v11 = vadd.f32 %v746_v19, %v4525_v10 }
  0xd0   : > { %v697_v25 = vpop.f32.mrf.mxu2  ;;  %v793_v31 = vpack.c.bf16 %v747_v11, %v729_v24 }
  0xd1   : > { %v698_v26 = vadd.f32 %v697_v25, %v4508_v6 }
  0xd2   : > { %v735_v27 = vpop.f32.mrf.mxu0  ;;  %v717_v21 = vpop.f32.mrf.mxu3  ;;  %v1095_v36 = vunpack.c.l.b16 %v793_v31  ;;  %v1356_v30 = vunpack.c.h.b16 %v793_v31 }
  0xd3   : > { %v4531_v29 = vpack.c.bf16 %v716_v23, %v698_v26 }
  0xd5   : > { %v748_v28 = vpop.f32.mrf.mxu1 }
  0xd6   : > { %v749_v32 = vadd.f32 %v748_v28, %v4525_v10 }
  0xd8   : > { %v797_v35 = vpack.c.bf16 %v749_v32, %v731_v18  ;;  %v699_v33 = vpop.f32.mrf.mxu2 }
  0xda   : > { %v1096_v34 = vunpack.c.l.b16 %v797_v35  ;;  %v1357_v38 = vunpack.c.h.b16 %v797_v35  ;;  %v815_v40 = vpop.f32.mrf.mxu0 }
  0xdb   : > { %v782_v50 = vpop.f32.mrf.mxu3  ;;  %v816_v4 = vadd.f32 %v815_v40, %v4488_v43 }
  0xdc   : > { %v1097_v41 = vpack.c.b16 %v1096_v34, %v1095_v36  ;;  %v4536_v42 = vpack.c.b16 %v1357_v38, %v1356_v30  ;;  %v783_v53 = vadd.f32 %v782_v50, %v4539_v48 }
  0xdd   : > { %v751_v47 = vpop.f32.mrf.mxu1 }
  0xde   : > { %v752_v49 = vadd.f32 %v751_v47, %v4525_v10  ;;  %1109 = vmatpush.bf16.msra.mxu3 %v1097_v41  ;;  %v1199_v41 = vunpack.c.h.b16 %v4510_v8 }
  0xe0   : > { %v801_v52 = vpack.c.bf16 %v752_v49, %v734_v37 }
  0xe2   : > { %v1427_v54 = vunpack.c.h.b16 %v801_v52  ;;  %v1171_v55 = vsel %vm1169_vm1, %v801_v52, 0  ;;  %v764_v56 = vpop.f32.mrf.mxu2  ;;  %v817_v7 = vpop.f32.mrf.mxu0 }
  0xe3   : > { %1180 = vmatpush.bf16.msrb.mxu3 %v1171_v55  ;;  %v765_v57 = vadd.f32 %v764_v56, %v4543_v51  ;;  %v4550_v61 = vpop.f32.mrf.mxu3  ;;  %v818_v24 = vadd.f32 %v817_v7, %v4488_v43  ;;  %v931_v56 = vunpack.c.l.b16 %v4510_v8 }
  0xe4   : > { %v1428_v58 = vpack.c.b16 %v1427_v54, %v1427_v54 }
  0xe5   : > { %v753_v59 = vpop.f32.mrf.mxu1  ;;  %v4548_v60 = vpack.c.bf16 %v783_v53, %v765_v57 }
  0xe6   : > { %v4553_v63 = vsel %vm1169_vm1, %v1428_v58, 0  ;;  %v695_v58 = vadd.f32 %v4519_v3, %v4508_v6  ;;  %v713_v59 = vadd.f32 %v4517_v17, %v4503_v2  ;;  %v1729_v3 = vunpack.c.h.b16 %v4531_v29 }
  0xea   : > { %v4555_v1 = vpop.f32.mrf.mxu2  ;;  %v871_v7 = vpop.f32.mrf.mxu0 }
  0xeb   : > { %v787_v12 = vpop.f32.mrf.mxu3 }
  0xec   : > { %v788_v14 = vadd.f32 %v787_v12, %v4539_v48 }
  0xed   : > { %v829_v5 = vpop.f32.mrf.mxu1 }
  0xee   : > { %v830_v9 = vadd.f32 %v829_v5, %v4491_v46  ;;  %v796_v5 = vpack.c.bf16 %v713_v59, %v695_v58 }
  0xf0   : > { %v918_v13 = vpack.c.bf16 %v830_v9, %v816_v4  ;;  %v933_v4 = vpack.c.b16 %v931_v56, %v931_v56  ;;  %v1462_v9 = vunpack.c.l.b16 %v4515_v16  ;;  %v1463_v12 = vunpack.c.l.b16 %v796_v5 }
  0xf2   : > { %v769_v15 = vpop.f32.mrf.mxu2  ;;  %v938_v27 = vunpack.c.l.b16 %v918_v13  ;;  %v1204_v28 = vunpack.c.h.b16 %v918_v13  ;;  %v1465_v13 = vpack.c.b16 %v1463_v12, %v1462_v9 }
  0xf3   : > { %v770_v19 = vadd.f32 %v769_v15, %v4543_v51  ;;  %v789_v25 = vpop.f32.mrf.mxu3 }
  0xf5   : > { %v831_v22 = vpop.f32.mrf.mxu1  ;;  %v802_v23 = vpack.c.bf16 %v788_v14, %v770_v19 }
  0xf6   : > { %v832_v11 = vadd.f32 %v831_v22, %v4491_v46  ;;  %v1731_v22 = vpack.c.b16 %v1729_v3, %v1729_v3 }
  0xf7   : > { %v1957_v30 = vunpack.c.h.b16 %v802_v23  ;;  %v4568_v33 = vsel %vm1169_vm1, %v802_v23, 0 }
  0xf8   : > { %v922_v26 = vpack.c.bf16 %v832_v11, %v818_v24  ;;  %v1464_v24 = vunpack.c.l.b16 %v4531_v29 }
  0xf9   : > { %v1958_v43 = vpack.c.b16 %v1957_v30, %v1957_v30 }
  0xfa   : > { %v939_v18 = vunpack.c.l.b16 %v922_v26  ;;  %v1205_v31 = vunpack.c.h.b16 %v922_v26  ;;  %v771_v32 = vpop.f32.mrf.mxu2  ;;  %v1466_v26 = vpack.c.b16 %v1464_v24, %v1464_v24 }
  0xfb   : > { %v857_v36 = vpop.f32.mrf.mxu3  ;;  %v4573_v50 = vsel %vm1169_vm1, %v1958_v43, 0 }
  0xfc   : > { %v940_v21 = vpack.c.b16 %v939_v18, %v938_v27  ;;  %v1206_v35 = vpack.c.b16 %v1205_v31, %v1204_v28  ;;  %v858_v38 = vadd.f32 %v857_v36, %v4503_v2 }
  0xfd   : > { %v885_v19 = vpop.f32.mrf.mxu1 }
  0xfe   : > { %949 = vmatpush.bf16.xpose.msra.mxu0 %v940_v21  ;;  %1058 = vmatmul.bf16.vlgmr.msrb.gmra.mxu2 %v940_v21  ;;  %v886_v23 = vadd.f32 %v885_v19, %v4525_v10 }
  0xff   : > { %1320 = vmatpush.bf16.xpose.msrb.mxu2 %v4500_v0 }
 0x102   : > { %v843_v34 = vpop.f32.mrf.mxu2 }
 0x103   : > { %v844_v46 = vadd.f32 %v843_v34, %v4508_v6  ;;  %v859_v37 = vpop.f32.mrf.mxu3 }
 0x104   : > { %v860_v49 = vadd.f32 %v859_v37, %v4503_v2  ;;  %v1727_v2 = vunpack.c.h.b16 %v4515_v16  ;;  %v873_v16 = vpop.f32.mrf.mxu0 }
 0x105   : > { %950 = vmatmul.bf16.vlgmr.msra.gmra.mxu0 %v4498_v62  ;;  %v919_v47 = vpack.c.bf16 %v858_v38, %v844_v46  ;;  %v1201_v62 = vpack.c.b16 %v1199_v41, %v1199_v41  ;;  %v887_v25 = vpop.f32.mrf.mxu1  ;;  %v874_v27 = vadd.f32 %v873_v16, %v4522_v20 }
 0x106   : > { %1215 = vmatpush.bf16.xpose.msrb.mxu0 %v1206_v35  ;;  %v888_v28 = vadd.f32 %v887_v25, %v4525_v10 }
 0x107   : > { %v1471_v54 = vunpack.c.l.b16 %v919_v47  ;;  %v1734_v14 = vunpack.c.h.b16 %v919_v47 }
 0x108   : > { %v924_v31 = vpack.c.bf16 %v888_v28, %v874_v27 }
 0x10a   : > { %v845_v52 = vpop.f32.mrf.mxu2 }
 0x10b   : > { %v846_v53 = vadd.f32 %v845_v52, %v4508_v6  ;;  %v1728_v6 = vunpack.c.h.b16 %v796_v5 }
 0x10d   : > { %v923_v55 = vpack.c.bf16 %v860_v49, %v846_v53  ;;  %v1730_v17 = vpack.c.b16 %v1728_v6, %v1727_v2 }
 0x10e   : > { %1126 = vmatmul.bf16.vlgmr.msra.gmra.mxu2 %v940_v21  ;;  %v1008_v21 = vunpack.c.l.b16 %v924_v31 }
 0x10f   : > { %1386 = vmatpush.bf16.xpose.msra.mxu2 %v1201_v62  ;;  %v1472_v57 = vunpack.c.l.b16 %v923_v55  ;;  %v1735_v15 = vunpack.c.h.b16 %v923_v55 }
 0x111   : > { %v1473_v40 = vpack.c.b16 %v1472_v57, %v1471_v54  ;;  %v1736_v8 = vpack.c.b16 %v1735_v15, %v1734_v14 }
 0x113   : > { %1482 = vmatpush.bf16.xpose.msra.mxu0 %v1473_v40 }
 0x115   : > { %955 = vmatmul.bf16.gmra.mxu0 %v933_v4 }
 0x11e   : > { %1321 = vmatmul.bf16.vlgmr.msrb.gmra.mxu2 %v1206_v35 }
 0x11f   : > { %1589 = vmatpush.bf16.xpose.msrb.mxu2 %v1465_v13 }
 0x125   : > { %1216 = vmatmul.bf16.vlgmr.msrb.gmra.mxu0 %v4500_v0  ;;  %v872_v0 = vadd.f32 %v871_v7, %v4522_v20 }
 0x126   : > { %1745 = vmatpush.bf16.xpose.msrb.mxu0 %v1736_v8 }
 0x127   : > { %v920_v11 = vpack.c.bf16 %v886_v23, %v872_v0 }
 0x129   : > { %v1007_v18 = vunpack.c.l.b16 %v920_v11  ;;  %v1270_v32 = vunpack.c.h.b16 %v920_v11 }
 0x12b   : > { %v1009_v36 = vpack.c.b16 %v1008_v21, %v1007_v18 }
 0x12d   : > { %1024 = vmatpush.bf16.msra.mxu1 %v1009_v36 }
 0x12e   : > { %1387 = vmatmul.bf16.vlgmr.msra.gmra.mxu2 %v1206_v35  ;;  %v1271_v35 = vunpack.c.h.b16 %v924_v31 }
 0x12f   : > { %1657 = vmatpush.bf16.xpose.msra.mxu2 %v4531_v29  ;;  %v4591_v29 = vpop.f32.mrf.mxu2 }
 0x130   : > { %v1272_v30 = vpack.c.b16 %v1271_v35, %v1270_v32 }
 0x132   : > { %1287 = vmatpush.bf16.msrb.mxu1 %v1272_v30 }
 0x135   : > { %1221 = vmatmul.bf16.gmra.mxu0 %v1201_v62 }
 0x137   : > { %v4593_v34 = vpop.f32.mrf.mxu2 }
 0x13e   : > { %1590 = vmatmul.bf16.vlgmr.msrb.gmra.mxu2 %v1473_v40 }
 0x13f   : > { %1850 = vmatpush.bf16.xpose.msrb.mxu2 %v1730_v17 }
 0x145   : > { %1483 = vmatmul.bf16.vlgmr.msra.gmra.mxu0 %v1465_v13 }
 0x14e   : > { %1658 = vmatmul.bf16.vlgmr.msra.gmra.mxu2 %v1473_v40 }
 0x14f   : > { %1916 = vmatpush.bf16.xpose.msra.mxu2 %v1731_v22 }
 0x155   : > { %1488 = vmatmul.bf16.gmra.mxu0 %v1466_v26 }
 0x15e   : > { %1851 = vmatmul.bf16.vlgmr.msrb.gmra.mxu2 %v1736_v8 }
 0x165   : > { %1746 = vmatmul.bf16.vlgmr.msrb.gmra.mxu0 %v1730_v17 }
 0x16e   : > { %1917 = vmatmul.bf16.vlgmr.msra.gmra.mxu2 %v1736_v8 }
 0x175   : > { %1751 = vmatmul.bf16.gmra.mxu0 %v1731_v22 }
 0x181   : > { %v4595_v20 = vpop.f32.mrf.mxu2 }
 0x182   : > { %v4597_v10 = vpop.f32.mrf.mxu0  ;;  %v1064_v43 = vsel %vm960_vm2, %v4595_v20, -inf }
 0x183   : > { %1065 = vmax.xlane.f32.xlu1 %v1064_v43  ;;  %v961_v46 = vsel %vm960_vm2, %v4597_v10, -inf }
 0x184   : > { %962 = vmax.xlane.f32.xlu0 %v961_v46 }
 0x189   : > { %v4603_v38 = vpop.f32.mrf.mxu2 }
 0x18a   : > { %v4605_v37 = vpop.f32.mrf.mxu0  ;;  %v1067_v41 = vsel %vm960_vm2, %v4603_v38, -inf }
 0x18b   : > { %1068 = vmax.xlane.f32.xlu1 %v1067_v41  ;;  %v964_v47 = vsel %vm960_vm2, %v4605_v37, -inf }
 0x18c   : > { %965 = vmax.xlane.f32.xlu0 %v964_v47 }
 0x191   : > { %v4611_v49 = vpop.f32.mrf.mxu2 }
 0x192   : > { %v4613_v52 = vpop.f32.mrf.mxu0  ;;  %v1133_v56 = vsel %vm1132_vm3, %v4611_v49, -inf }
 0x193   : > { %v967_v53 = vsel %vm960_vm2, %v4613_v52, -inf }
 0x194   : > { %968 = vmax.xlane.f32.xlu2 %v967_v53 }
 0x199   : > { %v4617_v62 = vpop.f32.mrf.mxu2 }
 0x19a   : > { %v958_v54 = vpop.f32.mrf.mxu0  ;;  %v1136_v55 = vsel %vm1132_vm3, %v4617_v62, -inf }
 0x19b   : > { %1137 = vmax.xlane.f32.xlu0 %v1136_v55 }
 0x19c   : > { %1134 = vmax.xlane.f32.xlu2 %v1133_v56  ;;  %v913_v56 = vpop.f32.mrf.mxu3 }
 0x1a1   : > { %v4623_v57 = vpop.f32.mrf.mxu2 }
 0x1a2   : > { %v4625_v58 = vpop.f32.mrf.mxu0  ;;  %v1327_v59 = vsel %vm960_vm2, %v4623_v57, -inf }
 0x1a3   : > { %1328 = vmax.xlane.f32.xlu0 %v1327_v59  ;;  %v1226_v40 = vsel %vm960_vm2, %v4625_v58, -inf }
 0x1a4   : > { %1227 = vmax.xlane.f32.xlu1 %v1226_v40 }
 0x1a9   : > { %v4631_v4 = vpop.f32.mrf.mxu2 }
 0x1aa   : > { %v4633_v5 = vpop.f32.mrf.mxu0  ;;  %v1330_v9 = vsel %vm960_vm2, %v4631_v4, -inf }
 0x1ab   : > { %v1229_v12 = vsel %vm960_vm2, %v4633_v5, -inf }
 0x1ac   : > { %1331 = vmax.xlane.f32.xlu1 %v1330_v9  ;;  %1230 = vmax.xlane.f32.xlu2 %v1229_v12 }
 0x1b1   : > { %v4639_v13 = vpop.f32.mrf.mxu2 }
 0x1b2   : > { %v4641_v14 = vpop.f32.mrf.mxu0  ;;  %v1393_v15 = vsel %vm1132_vm3, %v4639_v13, -inf }
 0x1b3   : > { %1394 = vmax.xlane.f32.xlu0 %v1393_v15  ;;  %v1232_v8 = vsel %vm960_vm2, %v4641_v14, -inf }
 0x1b4   : > { %1233 = vmax.xlane.f32.xlu2 %v1232_v8 }
 0x1b9   : > { %v4647_v2 = vpop.f32.mrf.mxu2 }
 0x1ba   : > { %v1224_v6 = vpop.f32.mrf.mxu0  ;;  %v1396_v17 = vsel %vm1132_vm3, %v4647_v2, -inf }
 0x1bb   : > { %1397 = vmax.xlane.f32.xlu1 %v1396_v17 }
 0x1c1   : > { %v4651_v3 = vpop.f32.mrf.mxu2 }
 0x1c2   : > { %v4653_v7 = vpop.f32.mrf.mxu0  ;;  %v1596_v19 = vsel %vm960_vm2, %v4651_v3, -inf }
 0x1c3   : > { %1597 = vmax.xlane.f32.xlu1 %v1596_v19  ;;  %v1493_v22 = vsel %vm960_vm2, %v4653_v7, -inf  ;;  %v915_v19 = vpop.f32.mrf.mxu3 }
 0x1c4   : > { %1494 = vmax.xlane.f32.xlu2 %v1493_v22 }
 0x1c9   : > { %v4659_v0 = vpop.f32.mrf.mxu2 }
 0x1ca   : > { %v4661_v23 = vpop.f32.mrf.mxu0  ;;  %v1599_v24 = vsel %vm960_vm2, %v4659_v0, -inf }
 0x1cb   : > { %v1496_v11 = vsel %vm960_vm2, %v4661_v23, -inf }
 0x1cc   : > { %1600 = vmax.xlane.f32.xlu2 %v1599_v24  ;;  %1497 = vmax.xlane.f32.xlu0 %v1496_v11 }
 0x1d1   : > { %v4667_v16 = vpop.f32.mrf.mxu2 }
 0x1d2   : > { %v4669_v25 = vpop.f32.mrf.mxu0  ;;  %v1664_v26 = vsel %vm1132_vm3, %v4667_v16, -inf }
 0x1d3   : > { %1665 = vmax.xlane.f32.xlu1 %v1664_v26  ;;  %v1499_v27 = vsel %vm960_vm2, %v4669_v25, -inf  ;;  %v900_v26 = vadd.f32 %v4591_v29, %v4543_v51 }
 0x1d4   : > { %1500 = vmax.xlane.f32.xlu0 %v1499_v27  ;;  %v902_v27 = vadd.f32 %v4593_v34, %v4543_v51 }
 0x1d9   : > { %v4675_v28 = vpop.f32.mrf.mxu2 }
 0x1da   : > { %v1491_v18 = vpop.f32.mrf.mxu0  ;;  %v1667_v31 = vsel %vm1132_vm3, %v4675_v28, -inf }
 0x1db   : > { %1668 = vmax.xlane.f32.xlu2 %v1667_v31  ;;  %v914_v18 = vadd.f32 %v913_v56, %v4539_v48  ;;  %v916_v31 = vadd.f32 %v915_v19, %v4539_v48 }
 0x1dd   : > { %v4732_v29 = vpack.c.bf16 %v916_v31, %v902_v27 }
 0x1e1   : > { %v4679_v32 = vpop.f32.mrf.mxu2 }
 0x1e2   : > { %v4681_v21 = vpop.f32.mrf.mxu0  ;;  %v1857_v35 = vsel %vm960_vm2, %v4679_v32, -inf }
 0x1e3   : > { %1858 = vmax.xlane.f32.xlu2 %v1857_v35  ;;  %v1756_v36 = vsel %vm960_vm2, %v4681_v21, -inf }
 0x1e4   : > { %1757 = vmax.xlane.f32.xlu0 %v1756_v36 }
 0x1e9   : > { %v4687_v30 = vpop.f32.mrf.mxu2 }
 0x1ea   : > { %v4689_v43 = vpop.f32.mrf.mxu0  ;;  %v1860_v46 = vsel %vm960_vm2, %v4687_v30, -inf }
 0x1eb   : > { %v1759_v41 = vsel %vm960_vm2, %v4689_v43, -inf }
 0x1ec   : > { %1861 = vmax.xlane.f32.xlu0 %v1860_v46  ;;  %1760 = vmax.xlane.f32.xlu1 %v1759_v41  ;;  %v4730_v41 = vpack.c.bf16 %v914_v18, %v900_v26 }
 0x1ee   : > { %v1539_v56 = vunpack.c.l.b16 %v4730_v41 }
 0x1f1   : > { %v4695_v47 = vpop.f32.mrf.mxu2 }
 0x1f2   : > { %v4697_v53 = vpop.f32.mrf.mxu0  ;;  %v1923_v54 = vsel %vm1132_vm3, %v4695_v47, -inf }
 0x1f3   : > { %1924 = vmax.xlane.f32.xlu2 %v1923_v54  ;;  %v1762_v55 = vsel %vm960_vm2, %v4697_v53, -inf }
 0x1f4   : > { %1763 = vmax.xlane.f32.xlu1 %v1762_v55 }
 0x1f6   : > { %v4703_v59 = vpop.xlane.xlu1 %1065 }
 0x1f7   : > { %v4705_v40 = vpop.xlane.xlu0 %962  ;;  %v1076_v15 = vsub.f32 %v4595_v20, %v4703_v59 }
 0x1f8   : > { %v979_v9 = vsub.f32 %v4597_v10, %v4705_v40 }
 0x1f9   : > { %v4709_v12 = vpop.f32.mrf.mxu2  ;;  %v1078_v22 = vmul.f32 1.442695, %v1076_v15 }
 0x1fa   : > { %v982_v8 = vmul.f32 1.442695, %v979_v9  ;;  %v1754_v6 = vpop.f32.mrf.mxu0  ;;  %v1926_v17 = vsel %vm1132_vm3, %v4709_v12, -inf  ;;  %v1540_v9 = vunpack.c.l.b16 %v4732_v29 }
 0x1fb   : > { %1927 = vmax.xlane.f32.xlu0 %v1926_v17 }
 0x1fc   : > { %3719 = vpow2.f32 %v982_v8 }
 0x1fd   : > { %3721 = vpow2.f32 %v1078_v22 }
 0x1fe   : > { %v4715_v24 = vpop.xlane.xlu1 %1068 }
 0x1ff   : > { %v1077_v11 = vsub.f32 %v4603_v38, %v4715_v24  ;;  %v4719_v10 = vpop.xlane.xlu0 %965 }
 0x200   : > { %v980_v20 = vsub.f32 %v4605_v37, %v4719_v10 }
 0x201   : > { %v1080_v35 = vmul.f32 1.442695, %v1077_v11 }
 0x202   : > { %v984_v36 = vmul.f32 1.442695, %v980_v20  ;;  %v3720_v46 = vpop.eup %3719 }
 0x203   : > { %3723 = vpow2.f32 %v1080_v35  ;;  %v991_v38 = vsel %vm960_vm2, %v3720_v46, 0.0  ;;  %v4736_v34 = vpop.eup %3721 }
 0x204   : > { %3725 = vpow2.f32 %v984_v36  ;;  %992 = vadd.xlane.f32.xlu0 %v991_v38 }
 0x207   : > { %v4734_v37 = vpop.xlane.xlu2 %968 }
 0x208   : > { %v981_v54 = vsub.f32 %v4613_v52, %v4734_v37  ;;  %v1541_v52 = vpack.c.b16 %v1540_v9, %v1539_v56 }
 0x209   : > { %v4740_v55 = vpop.eup %3723 }
 0x20a   : > { %v986_v15 = vmul.f32 1.442695, %v981_v54  ;;  %v1092_v8 = vpack.c.bf16 %v4740_v55, %v4736_v34  ;;  %v3726_v6 = vpop.eup %3725 }
 0x20b   : > { %v1003_v17 = vpack.c.bf16 %v3726_v6, %v3720_v46  ;;  %v994_v19 = vsel %vm960_vm2, %v3726_v6, 0.0 }
 0x20c   : > { %3320 = vmatmul.msk.bf16.vlgmr.msra.gmra.mxu3 %vm960_vm2, %v1092_v8  ;;  %3727 = vpow2.f32 %v986_v15  ;;  %995 = vadd.xlane.f32.xlu1 %v994_v19 }
 0x20d   : > { %1370 = vmatpush.bf16.msra.mxu3 %v4536_v42  ;;  %3318 = vmatmul.msk.bf16.vlgmr.msra.gmra.mxu1 %vm960_vm2, %v1003_v17 }
 0x20e   : > { %v1138_v22 = vpop.xlane.xlu0 %1137  ;;  %1556 = vmatpush.bf16.msra.mxu1 %v1541_v52 }
 0x20f   : > { %v4751_v11 = vmax.f32 %v4715_v24, %v1138_v22  ;;  %v1135_v26 = vpop.xlane.xlu2 %1134 }
 0x210   : > { %v4754_v20 = vmax.f32 %v4703_v59, %v1135_v26 }
 0x211   : > { %v1142_v27 = vsub.f32 %v4715_v24, %v4751_v11  ;;  %v1148_v18 = vsub.f32 %v4617_v62, %v4751_v11 }
 0x212   : > { %v1141_v42 = vsub.f32 %v4703_v59, %v4754_v20  ;;  %v1147_v31 = vsub.f32 %v4611_v49, %v4754_v20  ;;  %v3728_v35 = vpop.eup %3727 }
 0x213   : > { %v1151_v36 = vmul.f32 1.442695, %v1148_v18  ;;  %v997_v38 = vsel %vm960_vm2, %v3728_v35, 0.0  ;;  %v1004_v15 = vpack.c.bf16 %v3728_v35, %v3728_v35  ;;  %v767_v35 = vadd.f32 %v4555_v1, %v4543_v51 }
 0x214   : > { %v1149_v46 = vmul.f32 1.442695, %v1147_v31  ;;  %998 = vadd.xlane.f32.xlu2 %v997_v38  ;;  %v1801_v1 = vunpack.c.h.b16 %v4732_v29 }
 0x215   : > { %3729 = vpow2.f32 %v1151_v36  ;;  %v785_v36 = vadd.f32 %v4550_v61, %v4539_v48  ;;  %v1800_v61 = vunpack.c.h.b16 %v4730_v41 }
 0x216   : > { %3731 = vpow2.f32 %v1149_v46  ;;  %v4771_v8 = vpop.xlane.xlu0 %1328 }
 0x217   : > { %v4765_v54 = vpop.xlane.xlu1 %1227  ;;  %v4800_v38 = vpack.c.bf16 %v785_v36, %v767_v35  ;;  %v1802_v41 = vpack.c.b16 %v1801_v1, %v1800_v61 }
 0x218   : > { %v1244_v56 = vsub.f32 %v4625_v58, %v4765_v54  ;;  %v1339_v58 = vsub.f32 %v4623_v57, %v4771_v8 }
 0x21a   : > { %v1247_v62 = vmul.f32 1.442695, %v1244_v56  ;;  %v1341_v57 = vmul.f32 1.442695, %v1339_v58  ;;  %v1628_v58 = vunpack.c.l.b16 %v4800_v38 }
 0x21b   : > { %v4769_v9 = vpop.eup %3729 }
 0x21c   : > { %3733 = vpow2.f32 %v1247_v62  ;;  %v4773_v49 = vpop.eup %3731 }
 0x21d   : > { %3319 = vmatmul.msk.bf16.gmra.mxu1 %vm960_vm2, %v1004_v15  ;;  %v1165_v6 = vpack.c.bf16 %v4769_v9, %v4773_v49 }
 0x21f   : > { %v4778_v17 = vpop.xlane.xlu1 %1331  ;;  %v4780_v19 = vpop.xlane.xlu2 %1230  ;;  %3321 = vmatmul.msk.bf16.vlgmr.msrb.gmra.mxu3 %vm1132_vm3, %v1165_v6  ;;  %v1627_v6 = vunpack.c.l.b16 %v4548_v60 }
 0x220   : > { %v1340_v52 = vsub.f32 %v4631_v4, %v4778_v17  ;;  %v1245_v22 = vsub.f32 %v4633_v5, %v4780_v19  ;;  %1442 = vmatpush.bf16.msrb.mxu3 %v4553_v63 }
 0x222   : > { %v1343_v26 = vmul.f32 1.442695, %v1340_v52  ;;  %v1249_v18 = vmul.f32 1.442695, %v1245_v22  ;;  %v3734_v31 = vpop.eup %3733 }
 0x223   : > { %v1256_v46 = vsel %vm960_vm2, %v3734_v31, 0.0 }
 0x224   : > { %3735 = vpow2.f32 %v1343_v26  ;;  %1257 = vadd.xlane.f32.xlu1 %v1256_v46 }
 0x225   : > { %3737 = vpow2.f32 %v1249_v18 }
 0x226   : > { %v1395_v4 = vpop.xlane.xlu0 %1394  ;;  %3739 = vpow2.f32 %v1341_v57 }
 0x227   : > { %v4796_v5 = vmax.f32 %v4771_v8, %v1395_v4  ;;  %v4798_v63 = vpop.xlane.xlu2 %1233 }
 0x228   : > { %v1246_v51 = vsub.f32 %v4641_v14, %v4798_v63 }
 0x229   : > { %v1401_v48 = vsub.f32 %v4771_v8, %v4796_v5  ;;  %v1407_v22 = vsub.f32 %v4639_v13, %v4796_v5 }
 0x22a   : > { %v4808_v56 = vpop.eup %3735  ;;  %v1251_v62 = vmul.f32 1.442695, %v1246_v51 }
 0x22b   : > { %v3738_v15 = vpop.eup %3737  ;;  %v1409_v36 = vmul.f32 1.442695, %v1407_v22 }
 0x22c   : > { %v1268_v52 = vpack.c.bf16 %v3738_v15, %v3734_v31  ;;  %v1259_v14 = vsel %vm960_vm2, %v3738_v15, 0.0  ;;  %v4815_v26 = vpop.eup %3739  ;;  %3741 = vpow2.f32 %v1251_v62  ;;  %v1629_v31 = vpack.c.b16 %v1628_v58, %v1627_v6 }
 0x22d   : > { %1260 = vadd.xlane.f32.xlu2 %v1259_v14  ;;  %v1355_v35 = vpack.c.bf16 %v4808_v56, %v4815_v26  ;;  %3743 = vpow2.f32 %v1409_v36 }
 0x22e   : > { %v1398_v18 = vpop.xlane.xlu1 %1397  ;;  %3322 = vmatmul.msk.bf16.vlgmr.msrb.gmra.mxu1 %vm960_vm2, %v1268_v52 }
 0x22f   : > { %v4819_v29 = vmax.f32 %v4778_v17, %v1398_v18  ;;  %1817 = vmatpush.bf16.msrb.mxu1 %v1802_v41  ;;  %3324 = vmatmul.msk.bf16.vlgmr.msra.gmra.mxu3 %vm960_vm2, %v1355_v35 }
 0x230   : > { %1641 = vmatpush.bf16.msra.mxu3 %v1629_v31 }
 0x231   : > { %v1402_v13 = vsub.f32 %v4778_v17, %v4819_v29  ;;  %v1408_v57 = vsub.f32 %v4647_v2, %v4819_v29 }
 0x232   : > { %v3742_v4 = vpop.eup %3741 }
 0x233   : > { %v1411_v46 = vmul.f32 1.442695, %v1408_v57  ;;  %v1262_v51 = vsel %vm960_vm2, %v3742_v4, 0.0  ;;  %v4837_v6 = vpop.eup %3743  ;;  %v1269_v22 = vpack.c.bf16 %v3742_v4, %v3742_v4 }
 0x234   : > { %1263 = vadd.xlane.f32.xlu0 %v1262_v51 }
 0x235   : > { %3745 = vpow2.f32 %v1411_v46 }
 0x236   : > { %v4829_v61 = vpop.xlane.xlu1 %1597 }
 0x237   : > { %v1608_v1 = vsub.f32 %v4651_v3, %v4829_v61  ;;  %v4833_v62 = vpop.xlane.xlu2 %1494 }
 0x238   : > { %v1511_v2 = vsub.f32 %v4653_v7, %v4833_v62 }
 0x239   : > { %v1610_v15 = vmul.f32 1.442695, %v1608_v1 }
 0x23a   : > { %v1514_v14 = vmul.f32 1.442695, %v1511_v2 }
 0x23b   : > { %3747 = vpow2.f32 %v1610_v15  ;;  %v4839_v58 = vpop.eup %3745 }
 0x23c   : > { %v1425_v52 = vpack.c.bf16 %v4839_v58, %v4837_v6  ;;  %3749 = vpow2.f32 %v1514_v14  ;;  %v1886_v14 = vunpack.c.h.b16 %v4548_v60 }
 0x23e   : > { %3323 = vmatmul.msk.bf16.gmra.mxu1 %vm960_vm2, %v1269_v22 }
 0x23f   : > { %v4844_v41 = vpop.xlane.xlu2 %1600  ;;  %v4846_v3 = vpop.xlane.xlu0 %1497  ;;  %3325 = vmatmul.msk.bf16.vlgmr.msrb.gmra.mxu3 %vm1132_vm3, %v1425_v52 }
 0x240   : > { %v1609_v18 = vsub.f32 %v4659_v0, %v4844_v41  ;;  %v1512_v7 = vsub.f32 %v4661_v23, %v4846_v3  ;;  %1710 = vmatpush.bf16.msrb.mxu3 %v4568_v33 }
 0x241   : > { %v3748_v35 = vpop.eup %3747 }
 0x242   : > { %v1612_v31 = vmul.f32 1.442695, %v1609_v18  ;;  %v1516_v36 = vmul.f32 1.442695, %v1512_v7  ;;  %v1616_v57 = vsel %vm960_vm2, %v3748_v35, 0.0  ;;  %v3750_v23 = vpop.eup %3749  ;;  %v1887_v18 = vunpack.c.h.b16 %v4800_v38 }
 0x243   : > { %1617 = vadd.xlane.f32.xlu1 %v1616_v57  ;;  %v1523_v2 = vsel %vm960_vm2, %v3750_v23, 0.0 }
 0x244   : > { %3751 = vpow2.f32 %v1612_v31 }
 0x245   : > { %3753 = vpow2.f32 %v1516_v36 }
 0x246   : > { %v1666_v46 = vpop.xlane.xlu1 %1665 }
 0x247   : > { %v4856_v4 = vmax.f32 %v4829_v61, %v1666_v46  ;;  %v4858_v0 = vpop.xlane.xlu0 %1500  ;;  %v1888_v46 = vpack.c.b16 %v1887_v18, %v1886_v14 }
 0x248   : > { %v1513_v51 = vsub.f32 %v4669_v25, %v4858_v0 }
 0x249   : > { %v1672_v33 = vsub.f32 %v4829_v61, %v4856_v4  ;;  %v1678_v25 = vsub.f32 %v4667_v16, %v4856_v4  ;;  %v1405_v4 = vmul.f32 1.442695, %v1402_v13 }
 0x24a   : > { %v3752_v1 = vpop.eup %3751  ;;  %v1518_v15 = vmul.f32 1.442695, %v1513_v51 }
 0x24b   : > { %v1619_v52 = vsel %vm960_vm2, %v3752_v1, 0.0  ;;  %v3754_v22 = vpop.eup %3753  ;;  %1524 = vadd.xlane.f32.xlu1 %v1523_v2  ;;  %v1624_v57 = vpack.c.bf16 %v3752_v1, %v3748_v35  ;;  %v1680_v51 = vmul.f32 1.442695, %v1678_v25 }
 0x24c   : > { %1620 = vadd.xlane.f32.xlu2 %v1619_v52  ;;  %v1535_v7 = vpack.c.bf16 %v3754_v22, %v3750_v23  ;;  %3755 = vpow2.f32 %v1518_v15  ;;  %v1087_v23 = vsel %vm960_vm2, %v4740_v55, 0.0  ;;  %v1526_v15 = vsel %vm960_vm2, %v3754_v22, 0.0 }
 0x24d   : > { %3757 = vpow2.f32 %v1680_v51  ;;  %v1347_v22 = vsel %vm960_vm2, %v4815_v26, 0.0 }
 0x24e   : > { %v1669_v31 = vpop.xlane.xlu2 %1668  ;;  %3326 = vmatmul.msk.bf16.vlgmr.msra.gmra.mxu1 %vm960_vm2, %v1535_v7 }
 0x24f   : > { %v4872_v36 = vmax.f32 %v4844_v41, %v1669_v31  ;;  %3328 = vmatmul.msk.bf16.vlgmr.msra.gmra.mxu3 %vm960_vm2, %v1624_v57 }
 0x250   : > { %1900 = vmatpush.bf16.msra.mxu3 %v1888_v46 }
 0x251   : > { %v1673_v60 = vsub.f32 %v4844_v41, %v4872_v36  ;;  %v1679_v38 = vsub.f32 %v4675_v28, %v4872_v36 }
 0x252   : > { %v3756_v35 = vpop.eup %3755 }
 0x253   : > { %v1682_v16 = vmul.f32 1.442695, %v1679_v38  ;;  %1088 = vadd.xlane.f32.xlu1 %v1087_v23  ;;  %v1529_v1 = vsel %vm960_vm2, %v3756_v35, 0.0  ;;  %v4889_v18 = vpop.eup %3757  ;;  %v1536_v31 = vpack.c.bf16 %v3756_v35, %v3756_v35  ;;  %v4913_v23 = vld [vmem:[%s5611_s4 + $0x38] sm:$0xff] }
 0x254   : > { %1527 = vadd.xlane.f32.xlu2 %v1526_v15  ;;  %1530 = vadd.xlane.f32.xlu0 %v1529_v1 }
 0x255   : > { %3759 = vpow2.f32 %v1682_v16  ;;  %2286 = vmatpush.bf16.msra.mxu0 %v4913_v23 }
 0x256   : > { %v4885_v28 = vpop.xlane.xlu2 %1858 }
 0x257   : > { %v4883_v2 = vpop.xlane.xlu0 %1757  ;;  %v1869_v55 = vsub.f32 %v4679_v32, %v4885_v28 }
 0x258   : > { %v1774_v52 = vsub.f32 %v4681_v21, %v4883_v2 }
 0x259   : > { %v1871_v57 = vmul.f32 1.442695, %v1869_v55 }
 0x25a   : > { %v1777_v14 = vmul.f32 1.442695, %v1774_v52 }
 0x25b   : > { %v4895_v7 = vpop.eup %3759  ;;  %1348 = vadd.xlane.f32.xlu1 %v1347_v22 }
 0x25c   : > { %v1696_v25 = vpack.c.bf16 %v4895_v7, %v4889_v18  ;;  %3761 = vpow2.f32 %v1777_v14  ;;  %v4929_v14 = vld [vmem:[%s5611_s4 + $0x30] sm:$0xff] }
 0x25d   : > { %3763 = vpow2.f32 %v1871_v57  ;;  %2287 = vmatpush.bf16.msra.mxu0 %v4929_v14 }
 0x25e   : > { %3327 = vmatmul.msk.bf16.gmra.mxu1 %vm960_vm2, %v1536_v31 }
 0x25f   : > { %v4900_v21 = vpop.xlane.xlu0 %1861  ;;  %v4902_v46 = vpop.xlane.xlu1 %1760  ;;  %3329 = vmatmul.msk.bf16.vlgmr.msrb.gmra.mxu3 %vm1132_vm3, %v1696_v25 }
 0x260   : > { %v1870_v32 = vsub.f32 %v4687_v30, %v4900_v21  ;;  %v1775_v26 = vsub.f32 %v4689_v43, %v4902_v46  ;;  %1972 = vmatpush.bf16.msrb.mxu3 %v4573_v50 }
 0x262   : > { %v1873_v51 = vmul.f32 1.442695, %v1870_v32  ;;  %v1779_v38 = vmul.f32 1.442695, %v1775_v26  ;;  %v3762_v16 = vpop.eup %3761  ;;  %v4939_v26 = vld [vmem:[%s5611_s4 + $0x28] sm:$0xff] }
 0x263   : > { %v1786_v15 = vsel %vm960_vm2, %v3762_v16, 0.0  ;;  %v3764_v1 = vpop.eup %3763  ;;  %2288 = vmatpush.bf16.msra.mxu0 %v4939_v26 }
 0x264   : > { %3765 = vpow2.f32 %v1873_v51  ;;  %1787 = vadd.xlane.f32.xlu2 %v1786_v15  ;;  %v1877_v31 = vsel %vm960_vm2, %v3764_v1, 0.0 }
 0x265   : > { %3767 = vpow2.f32 %v1779_v38 }
 0x266   : > { %v1925_v30 = vpop.xlane.xlu2 %1924 }
 0x267   : > { %v4918_v43 = vmax.f32 %v4885_v28, %v1925_v30  ;;  %v4920_v50 = vpop.xlane.xlu1 %1763 }
 0x268   : > { %v1776_v35 = vsub.f32 %v4697_v53, %v4920_v50 }
 0x269   : > { %v1931_v52 = vsub.f32 %v4885_v28, %v4918_v43  ;;  %v1937_v53 = vsub.f32 %v4695_v47, %v4918_v43  ;;  %v970_v47 = vsub.f32 -inf, %v4705_v40  ;;  %v1350_v40 = vsel %vm960_vm2, %v4808_v56, 0.0 }
 0x26a   : > { %v3766_v55 = vpop.eup %3765  ;;  %v1781_v22 = vmul.f32 1.442695, %v1776_v35  ;;  %v971_v56 = vsub.f32 -inf, %v4719_v10  ;;  %v1070_v10 = vsub.f32 -inf, %v4703_v59 }
 0x26b   : > { %v3768_v25 = vpop.eup %3767  ;;  %v1885_v38 = vpack.c.bf16 %v3766_v55, %v3764_v1  ;;  %v4955_v1 = vld [vmem:[%s5611_s4 + $0x20] sm:$0xff] }
 0x26c   : > { %v1798_v57 = vpack.c.bf16 %v3768_v25, %v3762_v16  ;;  %1878 = vadd.xlane.f32.xlu2 %v1877_v31  ;;  %v1789_v32 = vsel %vm960_vm2, %v3768_v25, 0.0  ;;  %3769 = vpow2.f32 %v1781_v22  ;;  %v1939_v16 = vmul.f32 1.442695, %v1937_v53  ;;  %2289 = vmatpush.bf16.msra.mxu0 %v4955_v1 }
 0x26d   : > { %1790 = vadd.xlane.f32.xlu0 %v1789_v32  ;;  %v973_v25 = vmul.f32 1.442695, %v970_v47  ;;  %v4973_v32 = vld [vmem:[%s5611_s4 + $0x10] sm:$0xff]  ;;  %v1155_v47 = vsel %vm1132_vm3, %v4773_v49, 0.0  ;;  %v972_v49 = vsub.f32 -inf, %v4734_v37  ;;  %v1686_v37 = vsel %vm1132_vm3, %v4889_v18, 0.0 }
 0x26e   : > { %v1928_v51 = vpop.xlane.xlu0 %1927  ;;  %3330 = vmatmul.msk.bf16.vlgmr.msrb.gmra.mxu1 %vm960_vm2, %v1798_v57  ;;  %3771 = vpow2.f32 %v1939_v16  ;;  %v4965_v57 = vld [vmem:[%s5611_s4 + $0x18] sm:$0xff] }
 0x26f   : > { %v4943_v15 = vmax.f32 %v4900_v21, %v1928_v51  ;;  %3332 = vmatmul.msk.bf16.vlgmr.msra.gmra.mxu3 %vm960_vm2, %v1885_v38  ;;  %v975_v38 = vmul.f32 1.442695, %v971_v56  ;;  %v4994_v56 = vld [vmem:[%s5611_s4] sm:$0xff] }
 0x270   : > { %2290 = vmatpush.bf16.msra.mxu0 %v4965_v57 }
 0x271   : > { %v1932_v30 = vsub.f32 %v4900_v21, %v4943_v15  ;;  %v1938_v35 = vsub.f32 %v4709_v12, %v4943_v15  ;;  %v1084_v12 = vsel %vm960_vm2, %v4736_v34, 0.0 }
 0x272   : > { %v3770_v31 = vpop.eup %3769 }
 0x273   : > { %v1941_v22 = vmul.f32 1.442695, %v1938_v35  ;;  %v1792_v53 = vsel %vm960_vm2, %v3770_v31, 0.0  ;;  %v1880_v35 = vsel %vm960_vm2, %v3766_v55, 0.0 }
 0x274   : > { %1351 = vadd.xlane.f32.xlu2 %v1350_v40  ;;  %1793 = vadd.xlane.f32.xlu1 %v1792_v53  ;;  %v3772_v34 = vpop.eup %3771  ;;  %v1072_v53 = vmul.f32 1.442695, %v1070_v10  ;;  %v1143_v10 = vmul.f32 1.442695, %v1141_v42 }
 0x275   : > { %3773 = vpow2.f32 %v1941_v22  ;;  %1085 = vadd.xlane.f32.xlu0 %v1084_v12  ;;  %2291 = vmatpush.bf16.msra.mxu0 %v4973_v32  ;;  %v1799_v22 = vpack.c.bf16 %v3770_v31, %v3770_v31  ;;  %v1689_v12 = vsel %vm1132_vm3, %v4895_v7, 0.0  ;;  %v977_v7 = vmul.f32 1.442695, %v972_v49 }
 0x276   : > { %3775 = vpow2.f32 %v973_v25  ;;  %v4983_v25 = vld [vmem:[%s5611_s4 + $0x8] sm:$0xff] }
 0x277   : > { %3777 = vpow2.f32 %v975_v38  ;;  %v993_v55 = vpop.xlane.xlu0 %992  ;;  %v1071_v38 = vsub.f32 -inf, %v4715_v24 }
 0x278   : > { %3779 = vpow2.f32 %v1072_v53  ;;  %v5024_v53 = vld [vmem:[%s5611_s4 + $0x68] sm:$0xff] }
 0x279   : > { %2292 = vmatpush.bf16.msra.mxu0 %v4983_v25 }
 0x27b   : > { %v3774_v51 = vpop.eup %3773 }
 0x27c   : > { %v1955_v16 = vpack.c.bf16 %v3774_v51, %v3772_v34  ;;  %1156 = vadd.xlane.f32.xlu2 %v1155_v47  ;;  %v3776_v40 = vpop.eup %3775  ;;  %1690 = vadd.xlane.f32.xlu1 %v1689_v12  ;;  %v1074_v12 = vmul.f32 1.442695, %v1071_v38 }
 0x27d   : > { %1881 = vadd.xlane.f32.xlu0 %v1880_v35  ;;  %v988_v31 = vmul.f32 0.0, %v3776_v40  ;;  %v1948_v35 = vsel %vm1132_vm3, %v3774_v51, 0.0  ;;  %2293 = vmatpush.bf16.msra.mxu0 %v4994_v56  ;;  %v1945_v51 = vsel %vm1132_vm3, %v3772_v34, 0.0 }
 0x27e   : > { %3331 = vmatmul.msk.bf16.gmra.mxu1 %vm960_vm2, %v1799_v22  ;;  %v3778_v22 = vpop.eup %3777 }
 0x27f   : > { %3333 = vmatmul.msk.bf16.vlgmr.msrb.gmra.mxu3 %vm1132_vm3, %v1955_v16  ;;  %v1000_v47 = vadd.f32 %v993_v55, %v988_v31  ;;  %v5004_v16 = vld [vmem:[%s5611_s4 + $0x78] sm:$0xff]  ;;  %v996_v18 = vpop.xlane.xlu1 %995  ;;  %v989_v40 = vmul.f32 0.0, %v3778_v22  ;;  %v3780_v34 = vpop.eup %3779  ;;  %v1158_v55 = vsel %vm1132_vm3, %v4769_v9, 0.0  ;;  %v1145_v9 = vmul.f32 1.442695, %v1142_v27 }
 0x280   : > { %2304 = vmatpush.bf16.msra.mxu1 %v5004_v16 }
 0x281   : > { %2382 = vmatpush.bf16.msrb.mxu0 %v4913_v23  ;;  %3781 = vrcp.f32 %v1000_v47  ;;  %v5015_v23 = vld [vmem:[%s5611_s4 + $0x70] sm:$0xff]  ;;  %v1001_v49 = vadd.f32 %v996_v18, %v989_v40 }
 0x282   : > { %3783 = vpow2.f32 %v977_v7  ;;  %v1418_v7 = vsel %vm1132_vm3, %v4839_v58, 0.0 }
 0x283   : > { %3785 = vpow2.f32 %v1143_v10  ;;  %v5042_v10 = vld [vmem:[%s5611_s4 + $0x60] sm:$0xff] }
 0x284   : > { %1949 = vadd.xlane.f32.xlu2 %v1948_v35  ;;  %1946 = vadd.xlane.f32.xlu1 %v1945_v51  ;;  %3787 = vpow2.f32 %v1074_v12  ;;  %v5029_v35 = vmul.f32 0.0, %v3780_v34  ;;  %v1235_v51 = vsub.f32 -inf, %v4765_v54 }
 0x285   : > { %1687 = vadd.xlane.f32.xlu0 %v1686_v37  ;;  %2383 = vmatpush.bf16.msrb.mxu0 %v4929_v14  ;;  %3789 = vrcp.f32 %v1001_v49  ;;  %v1415_v49 = vsel %vm1132_vm3, %v4837_v6, 0.0  ;;  %v1236_v6 = vsub.f32 -inf, %v4780_v19  ;;  %v5073_v19 = vld [vmem:[%s5611_s4 + $0x48] sm:$0xff] }
 0x286   : > { %2305 = vmatpush.bf16.msra.mxu1 %v5015_v23  ;;  %3791 = vpow2.f32 %v1145_v9  ;;  %v1238_v54 = vmul.f32 1.442695, %v1235_v51  ;;  %v1237_v51 = vsub.f32 -inf, %v4798_v63 }
 0x287   : > { %v3782_v42 = vpop.eup %3781  ;;  %v999_v37 = vpop.xlane.xlu2 %998 }
 0x288   : > { %v3784_v14 = vpop.eup %3783 }
 0x289   : > { %2384 = vmatpush.bf16.msrb.mxu0 %v4939_v26  ;;  %v5036_v22 = vpop.eup %3785  ;;  %v990_v58 = vmul.f32 0.0, %v3784_v14 }
 0x28a   : > { %v1026_v59 = vpop.f32.mrf.mxu1  ;;  %2306 = vmatpush.bf16.msra.mxu1 %v5024_v53  ;;  %v3788_v11 = vpop.eup %3787 }
 0x28b   : > { %v1035_v20 = vadd.f32 %v1026_v59, %v988_v31  ;;  %v1002_v27 = vadd.f32 %v999_v37, %v990_v58  ;;  %v3790_v34 = vpop.eup %3789  ;;  %v5052_v59 = vld [vmem:[%s5611_s4 + $0x58] sm:$0xff]  ;;  %v1240_v37 = vmul.f32 1.442695, %v1236_v6 }
 0x28c   : > { %1419 = vadd.xlane.f32.xlu1 %v1418_v7  ;;  %v5059_v14 = vpop.eup %3791 }
 0x28d   : > { %v1041_v47 = vmul.f32 %v3782_v42, %v1035_v20  ;;  %1159 = vadd.xlane.f32.xlu0 %v1158_v55  ;;  %2385 = vmatpush.bf16.msrb.mxu0 %v4955_v1  ;;  %v5055_v20 = vmul.f32 0.0, %v3788_v11  ;;  %3793 = vrcp.f32 %v1002_v27 }
 0x28e   : > { %2307 = vmatpush.bf16.msra.mxu1 %v5042_v10  ;;  %3795 = vpow2.f32 %v1238_v54 }
 0x28f   : > { %v1111_v31 = vpop.f32.mrf.mxu3  ;;  %v1044_v38 = vpack.c.bf16 %v1041_v47, %v1041_v47  ;;  %3797 = vpow2.f32 %v1240_v37  ;;  %v1403_v37 = vmul.f32 1.442695, %v1401_v48 }
 0x290   : > { %v1116_v26 = vadd.f32 %v1111_v31, %v5029_v35 }
 0x291   : > { %1047 = vst [vmem:[#allocation2] sm:$0xf] %v1044_v38  ;;  %2386 = vmatpush.bf16.msrb.mxu0 %v4965_v57  ;;  %v5065_v57 = vld [vmem:[%s5611_s4 + $0x50] sm:$0xff] }
 0x292   : > { %v1163_v24 = vmul.f32 %v5036_v22, %v1116_v26  ;;  %v1028_v18 = vpop.f32.mrf.mxu1  ;;  %2308 = vmatpush.bf16.msra.mxu1 %v5052_v59 }
 0x293   : > { %v1036_v12 = vadd.f32 %v1028_v18, %v989_v40  ;;  %v3794_v31 = vpop.eup %3793  ;;  %v5081_v18 = vld [vmem:[%s5611_s4 + $0x40] sm:$0xff] }
 0x294   : > { %v3796_v26 = vpop.eup %3795 }
 0x295   : > { %v1042_v1 = vmul.f32 %v3790_v34, %v1036_v12  ;;  %1416 = vadd.xlane.f32.xlu0 %v1415_v49  ;;  %2387 = vmatpush.bf16.msrb.mxu0 %v4973_v32  ;;  %v1253_v12 = vmul.f32 0.0, %v3796_v26  ;;  %v1333_v34 = vsub.f32 -inf, %v4771_v8  ;;  %v3798_v6 = vpop.eup %3797 }
 0x296   : > { %2309 = vmatpush.bf16.msra.mxu1 %v5065_v57 }
 0x297   : > { %v1113_v42 = vpop.f32.mrf.mxu3  ;;  %v1045_v40 = vpack.c.bf16 %v1042_v1, %v1042_v1  ;;  %v1258_v11 = vpop.xlane.xlu1 %1257  ;;  %v1242_v1 = vmul.f32 1.442695, %v1237_v51 }
 0x298   : > { %v1117_v55 = vadd.f32 %v1113_v42, %v5055_v20  ;;  %v3336_v27 = vld [vmem:[#allocation2] sm:$0xf]  ;;  %v1265_v49 = vadd.f32 %v1258_v11, %v1253_v12  ;;  %v1603_v11 = vsub.f32 -inf, %v4844_v41  ;;  %v5157_v41 = vld [vmem:[%s5611_s4 + $0x90] sm:$0xff] }
 0x299   : > { %1048 = vst [vmem:[#allocation2 + $0x10] sm:$0xf] %v1045_v40  ;;  %2388 = vmatpush.bf16.msrb.mxu0 %v4983_v25  ;;  %v1602_v40 = vsub.f32 -inf, %v4829_v61 }
 0x29a   : > { %v1164_v47 = vmul.f32 %v5059_v14, %v1117_v55  ;;  %v1031_v7 = vpop.f32.mrf.mxu1  ;;  %2310 = vmatpush.bf16.msra.mxu1 %v5073_v19  ;;  %v1335_v55 = vmul.f32 1.442695, %v1333_v34  ;;  %3799 = vrcp.f32 %v1265_v49  ;;  %v5125_v49 = vld [vmem:[%s5611_s4 + $0xa0] sm:$0xff] }
 0x29b   : > { %v1037_v9 = vadd.f32 %v1031_v7, %v990_v58  ;;  %3801 = vpow2.f32 %v1242_v1 }
 0x29c   : > { %3803 = vpow2.f32 %v1335_v55 }
 0x29d   : > { %v1043_v38 = vmul.f32 %v3794_v31, %v1037_v9  ;;  %2389 = vmatpush.bf16.msrb.mxu0 %v4994_v56  ;;  %v5093_v56 = vld [vmem:[%s5611_s4 + $0xb8] sm:$0xff]  ;;  %v1254_v9 = vmul.f32 0.0, %v3798_v6  ;;  %v1334_v31 = vsub.f32 -inf, %v4778_v17 }
 0x29e   : > { %2311 = vmatpush.bf16.msra.mxu1 %v5081_v18  ;;  %2322 = vmatpush.bf16.msrb.mxu2 %v5093_v56  ;;  %v5140_v17 = vld [vmem:[%s5611_s4 + $0x98] sm:$0xff] }
 0x29f   : > { %v1046_v32 = vpack.c.bf16 %v1043_v38, %v1043_v38  ;;  %v1337_v5 = vmul.f32 1.442695, %v1334_v31 }
 0x2a0   : > { %v3637_v58 = vld [vmem:[#allocation2 + $0xc] sm:$0xf0]  ;;  %v1261_v7 = vpop.xlane.xlu2 %1260  ;;  %v3800_v8 = vpop.eup %3799 }
 0x2a1   : > { %1049 = vst [vmem:[#allocation2 + $0x20] sm:$0xf] %v1046_v32  ;;  %v3337_v25 = vor.u32 %v3637_v58, %v3336_v27  ;;  %v1266_v38 = vadd.f32 %v1261_v7, %v1254_v9  ;;  %v5114_v27 = vld [vmem:[%s5611_s4 + $0xa8] sm:$0xff]  ;;  %v3802_v48 = vpop.eup %3801  ;;  %v1674_v58 = vmul.f32 1.442695, %v1672_v33 }
 0x2a2   : > { %v1033_v54 = vpop.f32.mrf.mxu1  ;;  %v1182_v63 = vpop.f32.mrf.mxu3  ;;  %2396 = vmatpush.bf16.msrb.mxu1 %v5004_v16  ;;  %v1604_v16 = vmul.f32 1.442695, %v1602_v40 }
 0x2a3   : > { %2294 = vmatmul.bf16.vlgmr.msra.gmra.mxu0 %v3337_v25  ;;  %v5087_v42 = vadd.f32 %v1182_v63, %v1163_v24  ;;  %v5100_v24 = vld [vmem:[%s5611_s4 + $0xb0] sm:$0xff]  ;;  %v1606_v54 = vmul.f32 1.442695, %v1603_v11  ;;  %v1255_v63 = vmul.f32 0.0, %v3802_v48 }
 0x2a4   : > { %2323 = vmatpush.bf16.msrb.mxu2 %v5100_v24  ;;  %3805 = vpow2.f32 %v1604_v16 }
 0x2a5   : > { %3807 = vpow2.f32 %v1403_v37 }
 0x2a6   : > { %2397 = vmatpush.bf16.msrb.mxu1 %v5015_v23  ;;  %3809 = vrcp.f32 %v1266_v38 }
 0x2a7   : > { %v1264_v25 = vpop.xlane.xlu0 %1263  ;;  %3811 = vpow2.f32 %v1337_v5 }
 0x2a8   : > { %2324 = vmatpush.bf16.msrb.mxu2 %v5114_v27  ;;  %3813 = vpow2.f32 %v1674_v58 }
 0x2a9   : > { %3815 = vpow2.f32 %v1606_v54 }
 0x2aa   : > { %v1184_v23 = vpop.f32.mrf.mxu3  ;;  %2398 = vmatpush.bf16.msrb.mxu1 %v5024_v53  ;;  %3817 = vpow2.f32 %v1405_v4 }
 0x2ab   : > { %v1289_v26 = vpop.f32.mrf.mxu1  ;;  %v5108_v32 = vadd.f32 %v1184_v23, %v1164_v47  ;;  %v3804_v47 = vpop.eup %3803 }
 0x2ac   : > { %v1298_v51 = vadd.f32 %v1289_v26, %v1253_v12  ;;  %v1502_v12 = vsub.f32 -inf, %v4833_v62  ;;  %v3806_v61 = vpop.eup %3805  ;;  %v5130_v33 = vmul.f32 0.0, %v3804_v47  ;;  %2325 = vmatpush.bf16.msrb.mxu2 %v5125_v49  ;;  %v1267_v62 = vadd.f32 %v1264_v25, %v1255_v63 }
 0x2ad   : > { %v5134_v40 = vpop.eup %3807  ;;  %v5142_v13 = vmul.f32 0.0, %v3806_v61  ;;  %v1503_v26 = vsub.f32 -inf, %v4846_v3 }
 0x2ae   : > { %v1304_v53 = vmul.f32 %v3800_v8, %v1298_v51  ;;  %2399 = vmatpush.bf16.msrb.mxu1 %v5042_v10  ;;  %v1505_v55 = vmul.f32 1.442695, %v1502_v12  ;;  %v3810_v29 = vpop.eup %3809  ;;  %3819 = vrcp.f32 %v1267_v62  ;;  %v1504_v62 = vsub.f32 -inf, %v4858_v0 }
 0x2af   : > { %v3812_v37 = vpop.eup %3811  ;;  %v1507_v5 = vmul.f32 1.442695, %v1503_v26 }
 0x2b0   : > { %v1307_v34 = vpack.c.bf16 %v1304_v53, %v1304_v53  ;;  %2326 = vmatpush.bf16.msrb.mxu2 %v5140_v17  ;;  %v5151_v23 = vpop.eup %3813  ;;  %3821 = vpow2.f32 %v1505_v55  ;;  %v5162_v11 = vmul.f32 0.0, %v3812_v37  ;;  %v5172_v53 = vld [vmem:[%s5611_s4 + $0x88] sm:$0xff]  ;;  %v1509_v0 = vmul.f32 1.442695, %v1504_v62 }
 0x2b2   : > { %1310 = vst [vmem:[#allocation2 + $0x4] sm:$0xf] %v1307_v34  ;;  %v1372_v1 = vpop.f32.mrf.mxu3  ;;  %2400 = vmatpush.bf16.msrb.mxu1 %v5052_v59  ;;  %v1676_v59 = vmul.f32 1.442695, %v1673_v60  ;;  %v3816_v60 = vpop.eup %3815 }
 0x2b3   : > { %v1291_v10 = vpop.f32.mrf.mxu1  ;;  %v1377_v7 = vadd.f32 %v1372_v1, %v5130_v33  ;;  %v5166_v3 = vpop.eup %3817  ;;  %v5174_v12 = vmul.f32 0.0, %v3816_v60  ;;  %v5188_v1 = vld [vmem:[%s5611_s4 + $0x80] sm:$0xff] }
 0x2b4   : > { %v1299_v6 = vadd.f32 %v1291_v10, %v1254_v9  ;;  %3823 = vpow2.f32 %v1676_v59  ;;  %2327 = vmatpush.bf16.msrb.mxu2 %v5157_v41  ;;  %v3820_v47 = vpop.eup %3819 }
 0x2b5   : > { %v1423_v9 = vmul.f32 %v5134_v40, %v1377_v7  ;;  %3825 = vpow2.f32 %v1507_v5 }
 0x2b6   : > { %v1305_v16 = vmul.f32 %v3810_v29, %v1299_v6  ;;  %v1618_v31 = vpop.xlane.xlu1 %1617  ;;  %2401 = vmatpush.bf16.msrb.mxu1 %v5065_v57  ;;  %v3822_v25 = vpop.eup %3821 }
 0x2b7   : > { %v1622_v38 = vadd.f32 %v1618_v31, %v5142_v13  ;;  %v1520_v55 = vmul.f32 0.0, %v3822_v25 }
 0x2b8   : > { %v1308_v51 = vpack.c.bf16 %v1305_v16, %v1305_v16  ;;  %2328 = vmatpush.bf16.msrb.mxu2 %v5172_v53 }
 0x2b9   : > { %v5160_v36 = vmul.f32 %v5151_v23, %v1622_v38  ;;  %v3635_v6 = vld [vmem:[#allocation2 + $0x4] sm:$0xf]  ;;  %v5200_v38 = vld [vmem:[%s5611_s4 + $0xf8] sm:$0xff] }
 0x2ba   : > { %1311 = vst [vmem:[#allocation2 + $0x14] sm:$0xf] %v1308_v51  ;;  %v1374_v8 = vpop.f32.mrf.mxu3  ;;  %2402 = vmatpush.bf16.msrb.mxu1 %v5073_v19  ;;  %v5182_v4 = vpop.eup %3823  ;;  %2340 = vmatpush.bf16.msra.mxu3 %v5200_v38 }
 0x2bb   : > { %v1294_v57 = vpop.f32.mrf.mxu1  ;;  %v1378_v58 = vadd.f32 %v1374_v8, %v5162_v11  ;;  %v3826_v26 = vpop.eup %3825 }
 0x2bc   : > { %v1300_v48 = vadd.f32 %v1294_v57, %v1255_v63  ;;  %2329 = vmatpush.bf16.msrb.mxu2 %v5188_v1  ;;  %v1521_v57 = vmul.f32 0.0, %v3826_v26 }
 0x2bd   : > { %v5177_v19 = vmul.f32 %v5166_v3, %v1378_v58 }
 0x2be   : > { %v1306_v34 = vmul.f32 %v3820_v47, %v1300_v48  ;;  %v1525_v54 = vpop.xlane.xlu1 %1524  ;;  %2403 = vmatpush.bf16.msrb.mxu1 %v5081_v18 }
 0x2bf   : > { %v1621_v61 = vpop.xlane.xlu2 %1620  ;;  %v1532_v18 = vadd.f32 %v1525_v54, %v1520_v55 }
 0x2c0   : > { %v1623_v63 = vadd.f32 %v1621_v61, %v5174_v12  ;;  %v1309_v10 = vpack.c.bf16 %v1306_v34, %v1306_v34  ;;  %2410 = vmatpush.bf16.msra.mxu2 %v5093_v56  ;;  %v5220_v34 = vld [vmem:[%s5611_s4 + $0xe8] sm:$0xff] }
 0x2c1   : > { %v3338_v7 = vld [vmem:[#allocation2 + $0x10] sm:$0xf0]  ;;  %3827 = vrcp.f32 %v1532_v18 }
 0x2c2   : > { %v5191_v29 = vmul.f32 %v5182_v4, %v1623_v63  ;;  %1312 = vst [vmem:[#allocation2 + $0x24] sm:$0xf] %v1309_v10  ;;  %v3341_v59 = vor.u32 %v3635_v6, %v3338_v7  ;;  %v1444_v31 = vpop.f32.mrf.mxu3  ;;  %3829 = vpow2.f32 %v1509_v0 }
 0x2c3   : > { %v1296_v16 = vpop.f32.mrf.mxu1  ;;  %v5195_v37 = vadd.f32 %v1444_v31, %v1423_v9  ;;  %v5208_v9 = vld [vmem:[%s5611_s4 + $0xf0] sm:$0xff] }
 0x2c4   : > { %2312 = vmatmul.bf16.vlgmr.msra.gmra.mxu1 %v3341_v59  ;;  %2411 = vmatpush.bf16.msra.mxu2 %v5100_v24  ;;  %v5230_v59 = vld [vmem:[%s5611_s4 + $0xe0] sm:$0xff] }
 0x2c5   : > { %2341 = vmatpush.bf16.msra.mxu3 %v5208_v9 }
 0x2c6   : > { %v1089_v51 = vpop.xlane.xlu1 %1088 }
 0x2c7   : > { %v1091_v60 = vadd.f32 %v1089_v51, %v5055_v20  ;;  %v1528_v56 = vpop.xlane.xlu2 %1527  ;;  %v3828_v54 = vpop.eup %3827 }
 0x2c8   : > { %v1533_v58 = vadd.f32 %v1528_v56, %v1521_v57  ;;  %2412 = vmatpush.bf16.msra.mxu2 %v5114_v27  ;;  %v3830_v61 = vpop.eup %3829  ;;  %v1531_v6 = vpop.xlane.xlu0 %1530  ;;  %v5241_v56 = vld [vmem:[%s5611_s4 + $0xd8] sm:$0xff] }
 0x2c9   : > { %v2057_v8 = vld [vmem:[#allocation2 + $0x20] sm:$0xff]  ;;  %v5211_v5 = vmul.f32 %v5059_v14, %v1091_v60  ;;  %v1863_v14 = vsub.f32 -inf, %v4885_v28  ;;  %2342 = vmatpush.bf16.msra.mxu3 %v5220_v34  ;;  %v1522_v18 = vmul.f32 0.0, %v3830_v61 }
 0x2ca   : > { %v2074_v48 = vunpack.c.l.b16 %v2057_v8  ;;  %v5214_v47 = vpop.f32.mrf.mxu3  ;;  %v2075_v10 = vunpack.c.h.b16 %v2057_v8  ;;  %3831 = vrcp.f32 %v1533_v58 }
 0x2cb   : > { %v1558_v20 = vpop.f32.mrf.mxu1  ;;  %v1865_v16 = vmul.f32 1.442695, %v1863_v14 }
 0x2cc   : > { %v1567_v24 = vadd.f32 %v1558_v20, %v1520_v55  ;;  %v2082_v25 = vpack.c.b16 %v2074_v48, %v2074_v48  ;;  %2413 = vmatpush.bf16.msra.mxu2 %v5125_v49  ;;  %v1765_v55 = vsub.f32 -inf, %v4883_v2  ;;  %v2083_v0 = vpack.c.b16 %v2075_v10, %v2075_v10  ;;  %v5255_v20 = vld [vmem:[%s5611_s4 + $0xd0] sm:$0xff] }
 0x2cd   : > { %2343 = vmatpush.bf16.msra.mxu3 %v5230_v59  ;;  %3833 = vpow2.f32 %v1865_v16 }
 0x2ce   : > { %v1573_v63 = vmul.f32 %v3828_v54, %v1567_v24  ;;  %2299 = vmatmul.bf16.gmra.mxu0 %v2082_v25  ;;  %v1349_v62 = vpop.xlane.xlu1 %1348  ;;  %v1768_v2 = vmul.f32 1.442695, %v1765_v55 }
 0x2cf   : > { %v1353_v27 = vadd.f32 %v1349_v62, %v5130_v33  ;;  %v1534_v33 = vadd.f32 %v1531_v6, %v1522_v18  ;;  %v1864_v62 = vsub.f32 -inf, %v4900_v21  ;;  %v5278_v6 = vld [vmem:[%s5611_s4 + $0xc0] sm:$0xff] }
 0x2d0   : > { %v1576_v7 = vpack.c.bf16 %v1573_v63, %v1573_v63  ;;  %2414 = vmatpush.bf16.msra.mxu2 %v5140_v17  ;;  %v1933_v17 = vmul.f32 1.442695, %v1931_v52 }
 0x2d1   : > { %v5233_v31 = vmul.f32 %v5134_v40, %v1353_v27  ;;  %v3832_v40 = vpop.eup %3831  ;;  %2344 = vmatpush.bf16.msra.mxu3 %v5241_v56  ;;  %3835 = vrcp.f32 %v1534_v33 }
 0x2d2   : > { %1579 = vst [vmem:[#allocation2 + $0x8] sm:$0xf] %v1576_v7  ;;  %v1643_v26 = vpop.f32.mrf.mxu3  ;;  %3837 = vpow2.f32 %v1768_v2 }
 0x2d3   : > { %v1560_v49 = vpop.f32.mrf.mxu1  ;;  %v1648_v60 = vadd.f32 %v1643_v26, %v5142_v13  ;;  %3839 = vpow2.f32 %v1933_v17 }
 0x2d4   : > { %v1568_v51 = vadd.f32 %v1560_v49, %v1521_v57  ;;  %2317 = vmatmul.bf16.gmra.mxu1 %v2083_v0  ;;  %2415 = vmatpush.bf16.msra.mxu2 %v5157_v41  ;;  %v1766_v57 = vsub.f32 -inf, %v4902_v46  ;;  %v5263_v46 = vld [vmem:[%s5611_s4 + $0xc8] sm:$0xff] }
 0x2d5   : > { %v5244_v48 = vmul.f32 %v5151_v23, %v1648_v60  ;;  %2345 = vmatpush.bf16.msra.mxu3 %v5255_v20  ;;  %v3834_v23 = vpop.eup %3833 }
 0x2d6   : > { %v1574_v8 = vmul.f32 %v3832_v40, %v1568_v51  ;;  %v1770_v52 = vmul.f32 1.442695, %v1766_v57  ;;  %v5265_v61 = vmul.f32 0.0, %v3834_v23  ;;  %v1935_v40 = vmul.f32 1.442695, %v1932_v30 }
 0x2d7   : > { %v1788_v13 = vpop.xlane.xlu2 %1787  ;;  %v3836_v25 = vpop.eup %3835 }
 0x2d8   : > { %v1577_v58 = vpack.c.bf16 %v1574_v8, %v1574_v8  ;;  %2416 = vmatpush.bf16.msra.mxu2 %v5172_v53  ;;  %v3838_v54 = vpop.eup %3837  ;;  %3841 = vpow2.f32 %v1770_v52 }
 0x2d9   : > { %2346 = vmatpush.bf16.msra.mxu3 %v5263_v46  ;;  %v1783_v7 = vmul.f32 0.0, %v3838_v54 }
 0x2da   : > { %1580 = vst [vmem:[#allocation2 + $0x18] sm:$0xf] %v1577_v58  ;;  %v1645_v43 = vpop.f32.mrf.mxu3 }
 0x2db   : > { %v1563_v28 = vpop.f32.mrf.mxu1  ;;  %v1649_v24 = vadd.f32 %v1645_v43, %v5174_v12  ;;  %v1767_v12 = vsub.f32 -inf, %v4920_v50  ;;  %v1795_v50 = vadd.f32 %v1788_v13, %v1783_v7 }
 0x2dc   : > { %v1569_v41 = vadd.f32 %v1563_v28, %v1522_v18  ;;  %2417 = vmatpush.bf16.msra.mxu2 %v5188_v1  ;;  %v3344_v18 = vld [vmem:[#allocation2 + $0x8] sm:$0xf]  ;;  %v1867_v1 = vmul.f32 1.442695, %v1864_v62 }
 0x2dd   : > { %v5268_v63 = vmul.f32 %v5182_v4, %v1649_v24  ;;  %v5280_v4 = vpop.eup %3839  ;;  %2347 = vmatpush.bf16.msra.mxu3 %v5278_v6  ;;  %v1772_v2 = vmul.f32 1.442695, %v1767_v12 }
 0x2de   : > { %v1575_v14 = vmul.f32 %v3836_v25, %v1569_v41  ;;  %v3842_v51 = vpop.eup %3841  ;;  %3843 = vpow2.f32 %v1867_v1 }
 0x2df   : > { %v1879_v53 = vpop.xlane.xlu2 %1878  ;;  %3845 = vrcp.f32 %v1795_v50  ;;  %v1784_v13 = vmul.f32 0.0, %v3842_v51 }
 0x2e0   : > { %v1578_v10 = vpack.c.bf16 %v1575_v14, %v1575_v14  ;;  %v1883_v27 = vadd.f32 %v1879_v53, %v5265_v61  ;;  %v1791_v55 = vpop.xlane.xlu0 %1790  ;;  %3847 = vpow2.f32 %v1772_v2 }
 0x2e1   : > { %v3638_v16 = vld [vmem:[#allocation2 + $0x14] sm:$0xf0]  ;;  %2424 = vmatpush.bf16.msrb.mxu3 %v5200_v38  ;;  %v1796_v23 = vadd.f32 %v1791_v55, %v1784_v13  ;;  %3849 = vpow2.f32 %v1935_v40 }
 0x2e2   : > { %1581 = vst [vmem:[#allocation2 + $0x28] sm:$0xf] %v1578_v10  ;;  %v3345_v0 = vor.u32 %v3638_v16, %v3344_v18  ;;  %v5283_v33 = vmul.f32 %v5280_v4, %v1883_v27  ;;  %v5286_v26 = vpop.f32.mrf.mxu3 }
 0x2e3   : > { %v1565_v49 = vpop.f32.mrf.mxu1  ;;  %3851 = vrcp.f32 %v1796_v23 }
 0x2e4   : > { %2330 = vmatmul.bf16.vlgmr.msrb.gmra.mxu2 %v3345_v0  ;;  %v3844_v52 = vpop.eup %3843 }
 0x2e5   : > { %2425 = vmatpush.bf16.msrb.mxu3 %v5208_v9  ;;  %v3846_v15 = vpop.eup %3845 }
 0x2e6   : > { %v3848_v30 = vpop.eup %3847 }
 0x2e7   : > { %v1352_v60 = vpop.xlane.xlu2 %1351  ;;  %v1794_v38 = vpop.xlane.xlu1 %1793  ;;  %v1785_v54 = vmul.f32 0.0, %v3848_v30 }
 0x2e8   : > { %v1354_v8 = vadd.f32 %v1352_v60, %v5162_v11  ;;  %v1086_v17 = vpop.xlane.xlu0 %1085 }
 0x2e9   : > { %v1090_v57 = vadd.f32 %v1086_v17, %v5029_v35  ;;  %2426 = vmatpush.bf16.msrb.mxu3 %v5220_v34  ;;  %v1876_v35 = vmul.f32 0.0, %v3844_v52  ;;  %v1797_v53 = vadd.f32 %v1794_v38, %v1785_v54 }
 0x2ea   : > { %v5296_v58 = vmul.f32 %v5166_v3, %v1354_v8  ;;  %v1714_v28 = vpop.f32.mrf.mxu3 }
 0x2eb   : > { %v1819_v43 = vpop.f32.mrf.mxu1  ;;  %v1153_v9 = vmul.f32 %v5036_v22, %v1090_v57  ;;  %v3850_v22 = vpop.eup %3849  ;;  %v1718_v50 = vadd.f32 %v1714_v28, %v5268_v63 }
 0x2ec   : > { %v1828_v21 = vadd.f32 %v1819_v43, %v1783_v7  ;;  %v3852_v7 = vpop.eup %3851 }
 0x2ed   : > { %2427 = vmatpush.bf16.msrb.mxu3 %v5230_v59 }
 0x2ee   : > { %v1834_v11 = vmul.f32 %v3846_v15, %v1828_v21 }
 0x2ef   : > { %v1157_v41 = vpop.xlane.xlu2 %1156  ;;  %v1691_v62 = vpop.xlane.xlu1 %1690 }
 0x2f0   : > { %v1837_v3 = vpack.c.bf16 %v1834_v11, %v1834_v11  ;;  %v1161_v24 = vadd.f32 %v1157_v41, %v1153_v9  ;;  %v1882_v25 = vpop.xlane.xlu0 %1881  ;;  %v1693_v34 = vadd.f32 %v1691_v62, %v5191_v29 }
 0x2f1   : > { %v1884_v14 = vadd.f32 %v1882_v25, %v1876_v35  ;;  %2428 = vmatpush.bf16.msrb.mxu3 %v5241_v56 }
 0x2f2   : > { %1840 = vst [vmem:[#allocation2 + $0xc] sm:$0xf] %v1837_v3  ;;  %3853 = vrcp.f32 %v1161_v24  ;;  %v1902_v10 = vpop.f32.mrf.mxu3 }
 0x2f3   : > { %v1821_v12 = vpop.f32.mrf.mxu1  ;;  %v1944_v27 = vmul.f32 %v3850_v22, %v1884_v14  ;;  %3855 = vrcp.f32 %v1693_v34  ;;  %v1907_v59 = vadd.f32 %v1902_v10, %v5265_v61 }
 0x2f4   : > { %v1829_v55 = vadd.f32 %v1821_v12, %v1784_v13  ;;  %3857 = vrcp.f32 %v1797_v53 }
 0x2f5   : > { %v1953_v16 = vmul.f32 %v5280_v4, %v1907_v59  ;;  %2429 = vmatpush.bf16.msrb.mxu3 %v5255_v20 }
 0x2f6   : > { %v1835_v18 = vmul.f32 %v3852_v7, %v1829_v55 }
 0x2f7   : > { %v1947_v2 = vpop.xlane.xlu1 %1946  ;;  %v1950_v38 = vpop.xlane.xlu2 %1949 }
 0x2f8   : > { %v3854_v0 = vpop.eup %3853  ;;  %v1838_v1 = vpack.c.bf16 %v1835_v18, %v1835_v18  ;;  %v1688_v29 = vpop.xlane.xlu0 %1687  ;;  %v1951_v4 = vadd.f32 %v1947_v2, %v5283_v33  ;;  %v1952_v11 = vadd.f32 %v1950_v38, %v1944_v27 }
 0x2f9   : > { %v1191_v49 = vmul.f32 %v3854_v0, %v5087_v42  ;;  %v1692_v56 = vadd.f32 %v1688_v29, %v5160_v36  ;;  %v3856_v51 = vpop.eup %3855  ;;  %2430 = vmatpush.bf16.msrb.mxu3 %v5263_v46  ;;  %v1717_v36 = vadd.f32 %v5286_v26, %v5244_v48  ;;  %v3636_v9 = vld [vmem:[#allocation2 + $0xc] sm:$0xf] }
 0x2fa   : > { %1841 = vst [vmem:[#allocation2 + $0x1c] sm:$0xf] %v1838_v1  ;;  %v1722_v60 = vmul.f32 %v3856_v51, %v1718_v50  ;;  %v1904_v8 = vpop.f32.mrf.mxu3  ;;  %v3858_v13 = vpop.eup %3857 }
 0x2fb   : > { %v1193_v61 = vpack.c.bf16 %v1191_v49, %v1191_v49  ;;  %3859 = vrcp.f32 %v1692_v56  ;;  %v1824_v40 = vpop.f32.mrf.mxu1  ;;  %v1908_v17 = vadd.f32 %v1904_v8, %v1876_v35 }
 0x2fc   : > { %v1830_v20 = vadd.f32 %v1824_v40, %v1785_v54  ;;  %v1724_v63 = vpack.c.bf16 %v1722_v60, %v1722_v60  ;;  %3861 = vrcp.f32 %v1951_v4  ;;  %v1450_v54 = vadd.f32 %v5214_v47, %v5177_v19 }
 0x2fd   : > { %1195 = vst [vmem:[#allocation3] sm:$0xf] %v1193_v61  ;;  %v1954_v57 = vmul.f32 %v3850_v22, %v1908_v17  ;;  %2431 = vmatpush.bf16.msrb.mxu3 %v5278_v6 }
 0x2fe   : > { %v1836_v42 = vmul.f32 %v3858_v13, %v1830_v20  ;;  %1726 = vst [vmem:[#allocation3 + $0x18] sm:$0xf] %v1724_v63  ;;  %v5324_v20 = vld [vmem:[%s5615_s8] ss:$0 sm:$0xff] }
 0x2ff   : > { %v1420_v43 = vpop.xlane.xlu1 %1419 }
 0x300   : > { %v1839_v33 = vpack.c.bf16 %v1836_v42, %v1836_v42  ;;  %v1160_v23 = vpop.xlane.xlu0 %1159  ;;  %v1422_v15 = vadd.f32 %v1420_v43, %v5296_v58 }
 0x301   : > { %v3860_v28 = vpop.eup %3859  ;;  %v1162_v46 = vadd.f32 %v1160_v23, %v5211_v5  ;;  %v3346_v52 = vld [vmem:[#allocation2 + $0x18] sm:$0xf0] }
 0x302   : > { %v1721_v21 = vmul.f32 %v3860_v28, %v1717_v36  ;;  %1842 = vst [vmem:[#allocation2 + $0x2c] sm:$0xf] %v1839_v33  ;;  %v3349_v30 = vor.u32 %v3636_v9, %v3346_v52  ;;  %v1974_v41 = vpop.f32.mrf.mxu3  ;;  %v3862_v26 = vpop.eup %3861  ;;  %v3650_v28 = vld [vmem:[%s5613_s6 + $0x18] sm:$0xff] }
 0x303   : > { %3863 = vrcp.f32 %v1162_v46  ;;  %v1826_v6 = vpop.f32.mrf.mxu1  ;;  %v1979_v48 = vadd.f32 %v1974_v41, %v1953_v16  ;;  %v3646_v46 = vld [vmem:[%s5612_s5 + $0x18] sm:$0xff]  ;;  %2506 = vmatpush.bf16.msra.mxu0 %v3650_v28  ;;  %2844 = vmatpush.bf16.msrb.mxu2 %v3650_v28  ;;  %v3647_v41 = vld [vmem:[%s5613_s6] sm:$0xff] }
 0x304   : > { %v1723_v35 = vpack.c.bf16 %v1721_v21, %v1721_v21  ;;  %3865 = vrcp.f32 %v1422_v15  ;;  %2348 = vmatmul.bf16.vlgmr.msra.gmra.mxu3 %v3349_v30  ;;  %v3480_v1 = vld [vmem:[#allocation3] sm:$0xf]  ;;  %2548 = vmatpush.bf16.msra.mxu1 %v3646_v46  ;;  %v3644_v6 = vld [vmem:[%s5612_s5 + $0x8] sm:$0xff] }
 0x305   : > { %v1983_v3 = vmul.f32 %v3862_v26, %v1979_v48  ;;  %3867 = vrcp.f32 %v1952_v11  ;;  %v3642_v56 = vld [vmem:[#allocation3 + $0x14] sm:$0xf0]  ;;  %2858 = vmatpush.bf16.msra.mxu3 %v3646_v46  ;;  %v3649_v15 = vld [vmem:[%s5613_s6 + $0x10] sm:$0xff] }
 0x306   : > { %1725 = vst [vmem:[#allocation3 + $0x8] sm:$0xf] %v1723_v35  ;;  %v3645_v30 = vld [vmem:[%s5612_s5 + $0x10] sm:$0xff]  ;;  %v3648_v11 = vld [vmem:[%s5613_s6 + $0x8] sm:$0xff]  ;;  %v3643_v35 = vld [vmem:[%s5612_s5] sm:$0xff] }
 0x307   : > { %v1985_v5 = vpack.c.bf16 %v1983_v3, %v1983_v3  ;;  %2507 = vmatpush.bf16.msra.mxu0 %v3649_v15  ;;  %2845 = vmatpush.bf16.msrb.mxu2 %v3649_v15 }
 0x308   : > { %v1417_v24 = vpop.xlane.xlu0 %1416  ;;  %2549 = vmatpush.bf16.msra.mxu1 %v3645_v30 }
 0x309   : > { %v3864_v25 = vpop.eup %3863  ;;  %v1421_v58 = vadd.f32 %v1417_v24, %v5233_v31  ;;  %v2058_v14 = vld [vmem:[#allocation2 + $0x28] sm:$0xff]  ;;  %1987 = vst [vmem:[#allocation3 + $0xc] sm:$0xf] %v1985_v5  ;;  %2859 = vmatpush.bf16.msra.mxu3 %v3645_v30 }
 0x30a   : > { %v3866_v62 = vpop.eup %3865  ;;  %v1192_v22 = vmul.f32 %v3864_v25, %v5108_v32  ;;  %v2076_v34 = vunpack.c.l.b16 %v2058_v14  ;;  %v1976_v12 = vpop.f32.mrf.mxu3  ;;  %v2077_v19 = vunpack.c.h.b16 %v2058_v14 }
 0x30b   : > { %v1454_v53 = vmul.f32 %v3866_v62, %v1450_v54  ;;  %3869 = vrcp.f32 %v1421_v58  ;;  %v1980_v27 = vadd.f32 %v1976_v12, %v1954_v57  ;;  %v3868_v59 = vpop.eup %3867  ;;  %2508 = vmatpush.bf16.msra.mxu0 %v3648_v11  ;;  %2846 = vmatpush.bf16.msrb.mxu2 %v3648_v11 }
 0x30c   : > { %v1194_v10 = vpack.c.bf16 %v1192_v22, %v1192_v22  ;;  %v2084_v55 = vpack.c.b16 %v2076_v34, %v2076_v34  ;;  %v2085_v32 = vpack.c.b16 %v2077_v19, %v2077_v19  ;;  %2550 = vmatpush.bf16.msra.mxu1 %v3644_v6 }
 0x30d   : > { %v1456_v7 = vpack.c.bf16 %v1454_v53, %v1454_v53  ;;  %v1984_v18 = vmul.f32 %v3868_v59, %v1980_v27  ;;  %v3488_v49 = vld [vmem:[#allocation3 + $0x8] sm:$0xf]  ;;  %2860 = vmatpush.bf16.msra.mxu3 %v3644_v6 }
 0x30e   : > { %1196 = vst [vmem:[#allocation3 + $0x10] sm:$0xf] %v1194_v10  ;;  %2335 = vmatmul.bf16.gmra.mxu2 %v2084_v55  ;;  %v3489_v2 = vor.u32 %v3642_v56, %v3488_v49 }
 0x30f   : > { %1458 = vst [vmem:[#allocation3 + $0x14] sm:$0xf] %v1456_v7  ;;  %v1986_v47 = vpack.c.bf16 %v1984_v18, %v1984_v18  ;;  %2509 = vmatpush.bf16.msra.mxu0 %v3647_v41  ;;  %2847 = vmatpush.bf16.msrb.mxu2 %v3647_v41 }
 0x310   : > { %v3640_v40 = vld [vmem:[#allocation3 + $0xc] sm:$0xf]  ;;  %2551 = vmatpush.bf16.msra.mxu1 %v3643_v35 }
 0x311   : > { %v3870_v31 = vpop.eup %3869  ;;  %1988 = vst [vmem:[#allocation3 + $0x1c] sm:$0xf] %v1986_v47  ;;  %2861 = vmatpush.bf16.msra.mxu3 %v3643_v35 }
 0x312   : > { %v1453_v16 = vmul.f32 %v3870_v31, %v5195_v37 }
 0x314   : > { %v1455_v0 = vpack.c.bf16 %v1453_v16, %v1453_v16  ;;  %2353 = vmatmul.bf16.gmra.mxu3 %v2085_v32 }
 0x315   : > { %v3641_v29 = vld [vmem:[#allocation3 + $0xc] sm:$0xf0] }
 0x316   : > { %1457 = vst [vmem:[#allocation3 + $0x4] sm:$0xf] %v1455_v0  ;;  %v3481_v50 = vor.u32 %v3641_v29, %v3480_v1  ;;  %v3482_v61 = vld [vmem:[#allocation3 + $0x10] sm:$0xf0] }
 0x318   : > { %2390 = vmatmul.bf16.vlgmr.msrb.gmra.mxu0 %v3481_v50  ;;  %v3490_v4 = vld [vmem:[#allocation3 + $0x18] sm:$0xf0] }
 0x319   : > { %v3493_v37 = vor.u32 %v3640_v40, %v3490_v4 }
 0x31d   : > { %v3639_v51 = vld [vmem:[#allocation3 + $0x4] sm:$0xf] }
 0x31e   : > { %2418 = vmatmul.bf16.vlgmr.msra.gmra.mxu2 %v3489_v2  ;;  %v3485_v60 = vor.u32 %v3639_v51, %v3482_v61 }
 0x320   : > { %2404 = vmatmul.bf16.vlgmr.msrb.gmra.mxu1 %v3485_v60  ;;  %v2295_v8 = vpop.f32.mrf.mxu0  ;;  %v3715_v60 = vld [vmem:[%s5616_s9] ss:$0 sm:$0xff] }
 0x321   : > { %v2296_v17 = vadd.f32 %v5324_v20, %v2295_v8 }
 0x324   : > { %2432 = vmatmul.bf16.vlgmr.msrb.gmra.mxu3 %v3493_v37 }
 0x328   : > { %v2297_v42 = vpop.f32.mrf.mxu0 }
 0x329   : > { %v2298_v57 = vadd.f32 %v5324_v20, %v2297_v42 }
 0x330   : > { %3528 = vmatmul.msk.bf16.vlgmr.msra.gmra.mxu1 %vm640_vm0, %v4249_v44 }
 0x334   : > { %3563 = vmatmul.msk.bf16.vlgmr.msra.gmra.mxu3 %vm640_vm0, %v4451_v39 }
 0x340   : > { %3529 = vmatmul.msk.bf16.gmra.mxu1 %vm640_vm0, %v4251_v45 }
 0x341   : > { %v2313_v13 = vpop.f32.mrf.mxu1 }
 0x342   : > { %v2314_v63 = vadd.f32 %v2313_v13, %v2296_v17 }
 0x349   : > { %v2315_v36 = vpop.f32.mrf.mxu1 }
 0x34a   : > { %v2316_v38 = vadd.f32 %v2315_v36, %v2298_v57 }
 0x34b   : > { %v2300_v33 = vpop.f32.mrf.mxu0 }
 0x34c   : > { %v2301_v23 = vadd.f32 %v5324_v20, %v2300_v33 }
 0x351   : > { %v2318_v43 = vpop.f32.mrf.mxu1 }
 0x352   : > { %v2319_v9 = vadd.f32 %v2318_v43, %v2301_v23 }
 0x353   : > { %v2302_v52 = vpop.f32.mrf.mxu0 }
 0x354   : > { %v4004_v52 = vmov 128.0  }
 0x355   : > { %3871 = vrcp.f32 %v4004_v52 }
 0x359   : > { %v2320_v21 = vpop.f32.mrf.mxu1 }
 0x35b   : > { %v3872_v21 = vpop.eup %3871 }
 0x35c   : > { %v2573_v15 = vmul.f32 128.0, %v3872_v21  ;;  %vm2577_vm4 = vweird.f32 %v3872_v21 }
 0x35e   : > { %v2574_v30 = vsub.f32 1.0, %v2573_v15 }
 0x360   : > { %v2575_v11 = vmul.f32 %v3872_v21, %v2574_v30 }
 0x362   : > { %v2576_v6 = vadd.f32 %v3872_v21, %v2575_v11 }
 0x364   : > { %v5367_v41 = vsel %vm2577_vm4, %v3872_v21, %v2576_v6  ;;  %v3657_v21 = vld [vmem:[%s5614_s7 + $0x30] sm:$0xff] }
 0x367   : > { %v2331_v48 = vpop.f32.mrf.mxu2 }
 0x368   : > { %v2332_v5 = vadd.f32 %v2331_v48, %v2314_v63 }
 0x36f   : > { %v2333_v3 = vpop.f32.mrf.mxu2 }
 0x370   : > { %v2334_v24 = vadd.f32 %v2333_v3, %v2316_v38 }
 0x387   : > { %v2349_v26 = vpop.f32.mrf.mxu3 }
 0x388   : > { %v2350_v54 = vadd.f32 %v2349_v26, %v2332_v5 }
 0x38f   : > { %v2351_v25 = vpop.f32.mrf.mxu3 }
 0x390   : > { %v2352_v58 = vadd.f32 %v2351_v25, %v2334_v24 }
 0x391   : > { %v2336_v14 = vpop.f32.mrf.mxu2 }
 0x392   : > { %v2470_v62 = vpack.c.bf16 %v2352_v58, %v2350_v54  ;;  %v2337_v34 = vadd.f32 %v2336_v14, %v2319_v9 }
 0x394   : > { %3510 = vmatmul.msk.bf16.vlgmr.msra.gmra.mxu0 %vm640_vm0, %v2470_v62 }
 0x395   : > { %v2391_v53 = vpop.f32.mrf.mxu0 }
 0x396   : > { %v2392_v18 = vadd.f32 %v5324_v20, %v2391_v53 }
 0x397   : > { %v2354_v22 = vpop.f32.mrf.mxu3 }
 0x398   : > { %v2355_v39 = vadd.f32 %v2354_v22, %v2337_v34 }
 0x399   : > { %v2338_v44 = vpop.f32.mrf.mxu2 }
 0x39a   : > { %v2471_v45 = vpack.c.bf16 %v2355_v39, %v2355_v39 }
 0x39d   : > { %v2405_v12 = vpop.f32.mrf.mxu1  ;;  %v2393_v55 = vpop.f32.mrf.mxu0 }
 0x39e   : > { %v2394_v19 = vadd.f32 %v5324_v20, %v2393_v55  ;;  %v2406_v31 = vadd.f32 %v2405_v12, %v2392_v18 }
 0x39f   : > { %v2356_v10 = vpop.f32.mrf.mxu3 }
 0x3a1   : > { %v2419_v27 = vpop.f32.mrf.mxu2 }
 0x3a2   : > { %v2420_v32 = vadd.f32 %v2419_v27, %v2406_v31 }
 0x3a4   : > { %3511 = vmatmul.msk.bf16.gmra.mxu0 %vm640_vm0, %v2471_v45 }
 0x3a5   : > { %v2407_v7 = vpop.f32.mrf.mxu1 }
 0x3a6   : > { %v2408_v16 = vadd.f32 %v2407_v7, %v2394_v19 }
 0x3a7   : > { %v2433_v59 = vpop.f32.mrf.mxu3 }
 0x3a8   : > { %v2434_v29 = vadd.f32 %v2433_v59, %v2420_v32 }
 0x3a9   : > { %v2421_v47 = vpop.f32.mrf.mxu2 }
 0x3aa   : > { %v2422_v0 = vadd.f32 %v2421_v47, %v2408_v16 }
 0x3ad   : > { %v2553_v56 = vpop.f32.mrf.mxu1 }
 0x3af   : > { %v2435_v1 = vpop.f32.mrf.mxu3 }
 0x3b0   : > { %v2436_v50 = vadd.f32 %v2435_v1, %v2422_v0 }
 0x3b2   : > { %v2836_v49 = vpack.c.bf16 %v2436_v50, %v2434_v29 }
 0x3b4   : > { %3562 = vmatmul.msk.bf16.vlgmr.msrb.gmra.mxu2 %vm640_vm0, %v2836_v49 }
 0x3b5   : > { %v2555_v2 = vpop.f32.mrf.mxu1 }
 0x3b7   : > { %v2863_v36 = vpop.f32.mrf.mxu3 }
 0x3bd   : > { %v2558_v51 = vpop.f32.mrf.mxu1 }
 0x3bf   : > { %v2865_v46 = vpop.f32.mrf.mxu3 }
 0x3c5   : > { %v2560_v61 = vpop.f32.mrf.mxu1 }
 0x3c6   : > { %v5392_v61 = vld [vmem:[%s5616_s9 + $0x1] ss:$0 sm:$0xff] }
 0x411   : > { %v2511_v4 = vpop.f32.mrf.mxu0 }
 0x412   : > { %v2554_v40 = vadd.f32 %v2553_v56, %v2511_v4 }
 0x414   : > { %v2563_v37 = vadd.f32 %v3715_v60, %v2554_v40  ;;  %v5397_v40 = vld [vmem:[%s5616_s9 + $0x2] ss:$0 sm:$0xff] }
 0x416   : > { %2566 = vadd.xlane.f32.xlu2 %v2563_v37 }
 0x419   : > { %v2513_v8 = vpop.f32.mrf.mxu0 }
 0x41a   : > { %v2556_v20 = vadd.f32 %v2555_v2, %v2513_v8 }
 0x41c   : > { %v2564_v17 = vadd.f32 %v3715_v60, %v2556_v20 }
 0x41e   : > { %2568 = vadd.xlane.f32.xlu0 %v2564_v17 }
 0x421   : > { %v2516_v13 = vpop.f32.mrf.mxu0 }
 0x422   : > { %v2559_v63 = vadd.f32 %v2558_v51, %v2516_v13 }
 0x424   : > { %v2565_v42 = vadd.f32 %v3715_v60, %v2559_v63 }
 0x426   : > { %2570 = vadd.xlane.f32.xlu0 %v2565_v42 }
 0x429   : > { %v2518_v57 = vpop.f32.mrf.mxu0 }
 0x437   : > { %v2849_v38 = vpop.f32.mrf.mxu2 }
 0x438   : > { %v2864_v33 = vadd.f32 %v2863_v36, %v2849_v38  ;;  %v3658_v38 = vld [vmem:[%s5614_s7 + $0x38] sm:$0xff] }
 0x439   : > { %2812 = vmatpush.bf16.msrb.mxu0 %v3658_v38  ;;  %2995 = vmatpush.bf16.msrb.mxu1 %v3658_v38 }
 0x43a   : > { %v2868_v23 = vadd.f32 %v3715_v60, %v2864_v33 }
 0x43c   : > { %2870 = vadd.xlane.f32.xlu1 %v2868_v23 }
 0x43d   : > { %2813 = vmatpush.bf16.msrb.mxu0 %v3657_v21  ;;  %2996 = vmatpush.bf16.msrb.mxu1 %v3657_v21 }
 0x43f   : > { %v2851_v28 = vpop.f32.mrf.mxu2 }
 0x440   : > { %v2866_v43 = vadd.f32 %v2865_v46, %v2851_v28 }
 0x442   : > { %v2869_v9 = vadd.f32 %v3715_v60, %v2866_v43 }
 0x444   : > { %2872 = vadd.xlane.f32.xlu2 %v2869_v9 }
 0x489   : > { %v2567_v35 = vpop.xlane.xlu2 %2566 }
 0x48a   : > { %v2579_v48 = vmul.f32 %v5367_v41, %v2567_v35 }
 0x48c   : > { %v2582_v26 = vsub.f32 %v2563_v37, %v2579_v48  ;;  %v3656_v48 = vld [vmem:[%s5614_s7 + $0x28] sm:$0xff] }
 0x48d   : > { %2814 = vmatpush.bf16.msrb.mxu0 %v3656_v48  ;;  %2997 = vmatpush.bf16.msrb.mxu1 %v3656_v48 }
 0x48e   : > { %v2585_v3 = vmul.f32 %v2582_v26, %v2582_v26 }
 0x490   : > { %2588 = vadd.xlane.f32.xlu1 %v2585_v3 }
 0x491   : > { %v2569_v5 = vpop.xlane.xlu0 %2568 }
 0x492   : > { %v2580_v24 = vmul.f32 %v5367_v41, %v2569_v5 }
 0x494   : > { %v2583_v25 = vsub.f32 %v2564_v17, %v2580_v24 }
 0x496   : > { %v2586_v54 = vmul.f32 %v2583_v25, %v2583_v25 }
 0x498   : > { %2590 = vadd.xlane.f32.xlu2 %v2586_v54 }
 0x499   : > { %v2571_v58 = vpop.xlane.xlu0 %2570 }
 0x49a   : > { %v2581_v14 = vmul.f32 %v5367_v41, %v2571_v58  ;;  %v3655_v58 = vld [vmem:[%s5614_s7 + $0x20] sm:$0xff] }
 0x49b   : > { %2815 = vmatpush.bf16.msrb.mxu0 %v3655_v58  ;;  %2998 = vmatpush.bf16.msrb.mxu1 %v3655_v58 }
 0x49c   : > { %v5372_v62 = vsub.f32 %v2565_v42, %v2581_v14 }
 0x49e   : > { %v2587_v22 = vmul.f32 %v5372_v62, %v5372_v62 }
 0x4a0   : > { %2592 = vadd.xlane.f32.xlu2 %v2587_v22 }
 0x4af   : > { %v2871_v44 = vpop.xlane.xlu1 %2870 }
 0x4b0   : > { %v2874_v34 = vmul.f32 %v2871_v44, %v5367_v41 }
 0x4b2   : > { %v5377_v53 = vsub.f32 %v2868_v23, %v2874_v34 }
 0x4b4   : > { %v2878_v39 = vmul.f32 %v5377_v53, %v5377_v53 }
 0x4b6   : > { %2880 = vadd.xlane.f32.xlu0 %v2878_v39 }
 0x4b7   : > { %v2873_v12 = vpop.xlane.xlu2 %2872 }
 0x4b8   : > { %v2875_v10 = vmul.f32 %v2873_v12, %v5367_v41  ;;  %v3654_v12 = vld [vmem:[%s5614_s7 + $0x18] sm:$0xff] }
 0x4b9   : > { %2816 = vmatpush.bf16.msrb.mxu0 %v3654_v12  ;;  %2999 = vmatpush.bf16.msrb.mxu1 %v3654_v12 }
 0x4ba   : > { %v5382_v27 = vsub.f32 %v2869_v9, %v2875_v10 }
 0x4bc   : > { %v2879_v45 = vmul.f32 %v5382_v27, %v5382_v27 }
 0x4be   : > { %2882 = vadd.xlane.f32.xlu1 %v2879_v45 }
 0x503   : > { %v2589_v55 = vpop.xlane.xlu1 %2588 }
 0x504   : > { %v2594_v59 = vmul.f32 %v2589_v55, %v5367_v41 }
 0x506   : > { %v2597_v7 = vadd.f32 1e-05, %v2594_v59 }
 0x508   : > { %3873 = vrsqrt.f32 %v2597_v7  ;;  %vm2606_vm6 = vweird.f32 %v2597_v7 }
 0x50b   : > { %v2591_v18 = vpop.xlane.xlu2 %2590 }
 0x50c   : > { %v2595_v19 = vmul.f32 %v2591_v18, %v5367_v41 }
 0x50e   : > { %v3874_v47 = vpop.eup %3873  ;;  %v2598_v31 = vadd.f32 1e-05, %v2595_v19 }
 0x50f   : > { %v2601_v16 = vmul.f32 %v3874_v47, %v2597_v7  ;;  %vm2607_vm5 = vweird.f32 %v3874_v47 }
 0x510   : > { %3875 = vrsqrt.f32 %v2598_v31  ;;  %vm2608_vm7 = vmor %vm2606_vm6, %vm2607_vm5  ;;  %vm2616_vm9 = vweird.f32 %v2598_v31 }
 0x511   : > { %v2602_v32 = vmul.f32 %v3874_v47, %v2601_v16 }
 0x513   : > { %v2603_v0 = vmul.f32 0.5, %v2602_v32  ;;  %v2593_v1 = vpop.xlane.xlu2 %2592  ;;  %v3653_v32 = vld [vmem:[%s5614_s7 + $0x10] sm:$0xff] }
 0x514   : > { %v2596_v29 = vmul.f32 %v2593_v1, %v5367_v41  ;;  %2817 = vmatpush.bf16.msrb.mxu0 %v3653_v32  ;;  %3000 = vmatpush.bf16.msrb.mxu1 %v3653_v32 }
 0x515   : > { %v2604_v50 = vsub.f32 1.5, %v2603_v0 }
 0x516   : > { %v3876_v49 = vpop.eup %3875  ;;  %v2599_v56 = vadd.f32 1e-05, %v2596_v29 }
 0x517   : > { %v2605_v2 = vmul.f32 %v3874_v47, %v2604_v50  ;;  %v2611_v51 = vmul.f32 %v3876_v49, %v2598_v31  ;;  %vm2617_vm8 = vweird.f32 %v3876_v49 }
 0x518   : > { %3877 = vrsqrt.f32 %v2599_v56  ;;  %vm2618_vm10 = vmor %vm2616_vm9, %vm2617_vm8  ;;  %vm2626_vm12 = vweird.f32 %v2599_v56 }
 0x519   : > { %v2609_v60 = vsel %vm2608_vm7, %v3874_v47, %v2605_v2  ;;  %v2612_v4 = vmul.f32 %v3876_v49, %v2611_v51 }
 0x51a   : > { %v2630_v37 = vmul.f32 %v2609_v60, %v2582_v26 }
 0x51b   : > { %v2613_v8 = vmul.f32 0.5, %v2612_v4 }
 0x51c   : > { %v2634_v20 = vmul.f32 %v5392_v61, %v2630_v37  ;;  %v3652_v37 = vld [vmem:[%s5614_s7 + $0x8] sm:$0xff] }
 0x51d   : > { %v2614_v17 = vsub.f32 1.5, %v2613_v8  ;;  %2818 = vmatpush.bf16.msrb.mxu0 %v3652_v37  ;;  %3001 = vmatpush.bf16.msrb.mxu1 %v3652_v37 }
 0x51e   : > { %v3878_v13 = vpop.eup %3877  ;;  %v5401_v63 = vadd.f32 %v5397_v40, %v2634_v20 }
 0x51f   : > { %v2615_v42 = vmul.f32 %v3876_v49, %v2614_v17  ;;  %v2621_v57 = vmul.f32 %v3878_v13, %v2599_v56  ;;  %vm2627_vm11 = vweird.f32 %v3878_v13 }
 0x520   : > { %v5404_v36 = vmul.f32 0.70710677, %v5401_v63  ;;  %vm2628_vm13 = vmor %vm2626_vm12, %vm2627_vm11 }
 0x521   : > { %v2619_v33 = vsel %vm2618_vm10, %v3876_v49, %v2615_v42  ;;  %v2622_v23 = vmul.f32 %v3878_v13, %v2621_v57 }
 0x522   : > { %v5410_v28 = vand.u32 2147483647, %v5404_v36  ;;  %v2631_v46 = vmul.f32 %v2619_v33, %v2583_v25 }
 0x523   : > { %v2623_v43 = vmul.f32 0.5, %v2622_v23 }
 0x524   : > { %v2650_v9 = vmul.f32 0.3275911, %v5410_v28  ;;  %v2635_v52 = vmul.f32 %v5392_v61, %v2631_v46  ;;  %v2728_v31 = vsub.f32 0.0, %v5410_v28 }
 0x525   : > { %v2624_v15 = vsub.f32 1.5, %v2623_v43  ;;  %v3651_v43 = vld [vmem:[%s5614_s7] sm:$0xff] }
 0x526   : > { %v2653_v30 = vadd.f32 1.0, %v2650_v9  ;;  %v5418_v11 = vadd.f32 %v5397_v40, %v2635_v52  ;;  %v2731_v60 = vmul.f32 %v2728_v31, %v5410_v28  ;;  %2819 = vmatpush.bf16.msrb.mxu0 %v3651_v43  ;;  %3002 = vmatpush.bf16.msrb.mxu1 %v3651_v43 }
 0x527   : > { %v2625_v6 = vmul.f32 %v3878_v13, %v2624_v15 }
 0x528   : > { %3879 = vrcp.f32 %v2653_v30  ;;  %v5421_v35 = vmul.f32 0.70710677, %v5418_v11  ;;  %v2667_v7 = vand.u32 2147483648, %v2653_v30  ;;  %v2665_v19 = vand.u32 2147483647, %v2653_v30 }
 0x529   : > { %v2629_v26 = vsel %vm2628_vm13, %v3878_v13, %v2625_v6  ;;  %v2881_v3 = vpop.xlane.xlu0 %2880  ;;  %vm2661_vm15 = vweird.f32 %v2653_v30  ;;  %v2734_v28 = vmul.f32 1.442695, %v2731_v60 }
 0x52a   : > { %v5427_v5 = vand.u32 2147483647, %v5421_v35  ;;  %v2632_v24 = vmul.f32 %v2629_v26, %v5372_v62  ;;  %v2884_v25 = vmul.f32 %v2881_v3, %v5367_v41  ;;  %v2668_v49 = vor.u32 1.1754944e-38, %v2667_v7 }
 0x52b   : > { %vm2666_vm2 = vcmp.eq.f32.partialorder %v2665_v19, 8.507059e+37 }
 0x52c   : > { %v2651_v54 = vmul.f32 0.3275911, %v5427_v5  ;;  %v2636_v14 = vmul.f32 %v5392_v61, %v2632_v24  ;;  %v5436_v22 = vadd.f32 1e-05, %v2884_v25  ;;  %v2729_v15 = vsub.f32 0.0, %v5427_v5 }
 0x52e   : > { %v3880_v44 = vpop.eup %3879  ;;  %v5438_v34 = vadd.f32 1.0, %v2651_v54  ;;  %v5441_v62 = vadd.f32 %v5397_v40, %v2636_v14  ;;  %3881 = vrsqrt.f32 %v5436_v22  ;;  %vm2894_vm6 = vweird.f32 %v5436_v22 }
 0x52f   : > { %v2657_v39 = vmul.f32 %v3880_v44, %v2653_v30  ;;  %vm2662_vm14 = vweird.f32 %v3880_v44 }
 0x530   : > { %3883 = vrcp.f32 %v5438_v34  ;;  %v5449_v55 = vmul.f32 0.70710677, %v5441_v62  ;;  %vm2663_vm1 = vmor %vm2661_vm15, %vm2662_vm14  ;;  %v2682_v42 = vand.u32 2147483648, %v5438_v34  ;;  %v2680_v38 = vand.u32 2147483647, %v5438_v34 }
 0x531   : > { %v2658_v10 = vsub.f32 1.0, %v2657_v39  ;;  %v2883_v45 = vpop.xlane.xlu1 %2882  ;;  %vm2676_vm5 = vweird.f32 %v5438_v34  ;;  %v2732_v39 = vmul.f32 %v2729_v15, %v5427_v5 }
 0x532   : > { %v2885_v59 = vmul.f32 %v2883_v45, %v5367_v41  ;;  %v5453_v47 = vand.u32 2147483647, %v5449_v55  ;;  %v2683_v6 = vor.u32 1.1754944e-38, %v2682_v42  ;;  %vm2681_vm9 = vcmp.eq.f32.partialorder %v2680_v38, 8.507059e+37 }
 0x533   : > { %v2659_v18 = vmul.f32 %v3880_v44, %v2658_v10 }
 0x534   : > { %v5456_v16 = vadd.f32 1e-05, %v2885_v59  ;;  %v3882_v0 = vpop.eup %3881  ;;  %v2652_v41 = vmul.f32 0.3275911, %v5453_v47 }
 0x535   : > { %v2660_v1 = vadd.f32 %v3880_v44, %v2659_v18  ;;  %v2889_v50 = vmul.f32 %v3882_v0, %v5436_v22  ;;  %vm2895_vm4 = vweird.f32 %v3882_v0 }
 0x536   : > { %v3884_v29 = vpop.eup %3883  ;;  %3885 = vrsqrt.f32 %v5456_v16  ;;  %v5465_v51 = vadd.f32 1.0, %v2652_v41  ;;  %vm2896_vm8 = vmor %vm2894_vm6, %vm2895_vm4  ;;  %vm2904_vm11 = vweird.f32 %v5456_v16  ;;  %v2736_v41 = vmul.f32 1.442695, %v2732_v39 }
 0x537   : > { %v2672_v56 = vmul.f32 %v3884_v29, %v5438_v34  ;;  %v2664_v2 = vsel %vm2663_vm1, %v3880_v44, %v2660_v1  ;;  %v2890_v4 = vmul.f32 %v3882_v0, %v2889_v50  ;;  %vm2677_vm3 = vweird.f32 %v3884_v29 }
 0x538   : > { %v5471_v8 = vsel %vm2666_vm2, %v2668_v49, %v2664_v2  ;;  %3887 = vrcp.f32 %v5465_v51  ;;  %vm2678_vm7 = vmor %vm2676_vm5, %vm2677_vm3  ;;  %v2697_v10 = vand.u32 2147483648, %v5465_v51  ;;  %vm2691_vm14 = vweird.f32 %v5465_v51 }
 0x539   : > { %v2673_v20 = vsub.f32 1.0, %v2672_v56  ;;  %v2701_v17 = vmul.f32 1.0614054, %v5471_v8  ;;  %v2891_v13 = vmul.f32 0.5, %v2890_v4  ;;  %3889 = vpow2.f32 %v2734_v28 }
 0x53a   : > { %v2698_v56 = vor.u32 1.1754944e-38, %v2697_v10  ;;  %3891 = vpow2.f32 %v2736_v41  ;;  %vm2746_vm2 = vcmp.lt.f32.partialorder %v5404_v36, 0.0  ;;  %vm2747_vm3 = vcmp.lt.f32.partialorder %v5421_v35, 0.0 }
 0x53b   : > { %v2674_v57 = vmul.f32 %v3884_v29, %v2673_v20  ;;  %v2704_v33 = vadd.f32 -1.4531521, %v2701_v17  ;;  %v2892_v46 = vsub.f32 1.5, %v2891_v13  ;;  %v2730_v13 = vsub.f32 0.0, %v5453_v47 }
 0x53c   : > { %v3886_v23 = vpop.eup %3885 }
 0x53d   : > { %v2899_v9 = vmul.f32 %v3886_v23, %v5456_v16  ;;  %v2675_v52 = vadd.f32 %v3884_v29, %v2674_v57  ;;  %v2707_v21 = vmul.f32 %v2704_v33, %v5471_v8  ;;  %v2893_v30 = vmul.f32 %v3882_v0, %v2892_v46 }
 0x53e   : > { %v3888_v48 = vpop.eup %3887  ;;  %vm2905_vm10 = vweird.f32 %v3886_v23 }
 0x53f   : > { %v2900_v26 = vmul.f32 %v3886_v23, %v2899_v9  ;;  %v2679_v3 = vsel %vm2678_vm7, %v3884_v29, %v2675_v52  ;;  %v2710_v24 = vadd.f32 1.4214138, %v2707_v21  ;;  %v2897_v25 = vsel %vm2896_vm8, %v3882_v0, %v2893_v30  ;;  %v3890_v1 = vpop.eup %3889  ;;  %vm2906_vm13 = vmor %vm2904_vm11, %vm2905_vm10 }
 0x540   : > { %v2684_v54 = vsel %vm2681_vm9, %v2683_v6, %v2679_v3  ;;  %v2687_v58 = vmul.f32 %v3888_v48, %v5465_v51  ;;  %v2908_v14 = vmul.f32 %v2897_v25, %v5377_v53  ;;  %vm2692_vm12 = vweird.f32 %v3888_v48 }
 0x541   : > { %v2901_v44 = vmul.f32 0.5, %v2900_v26  ;;  %v2702_v22 = vmul.f32 1.0614054, %v2684_v54  ;;  %v2713_v34 = vmul.f32 %v2710_v24, %v5471_v8  ;;  %v2695_v53 = vand.u32 2147483647, %v5465_v51  ;;  %vm2693_vm15 = vmor %vm2691_vm14, %vm2692_vm12  ;;  %v3892_v26 = vpop.eup %3891 }
 0x542   : > { %v2688_v12 = vsub.f32 1.0, %v2687_v58  ;;  %v2910_v45 = vmul.f32 %v5392_v61, %v2908_v14  ;;  %v2733_v9 = vmul.f32 %v2730_v13, %v5453_v47  ;;  %vm2748_vm9 = vcmp.lt.f32.partialorder %v5449_v55, 0.0 }
 0x543   : > { %v2902_v59 = vsub.f32 1.5, %v2901_v44  ;;  %v2705_v7 = vadd.f32 -1.4531521, %v2702_v22  ;;  %v2716_v18 = vadd.f32 -0.28449672, %v2713_v34  ;;  %vm2696_vm1 = vcmp.eq.f32.partialorder %v2695_v53, 8.507059e+37 }
 0x544   : > { %v2689_v19 = vmul.f32 %v3888_v48, %v2688_v12  ;;  %v5495_v31 = vadd.f32 %v5397_v40, %v2910_v45  ;;  %v2643_v55 = vmul.f32 0.5, %v5441_v62 }
 0x545   : > { %v2903_v32 = vmul.f32 %v3886_v23, %v2902_v59  ;;  %v2708_v5 = vmul.f32 %v2705_v7, %v2684_v54  ;;  %v2719_v0 = vmul.f32 %v2716_v18, %v5471_v8  ;;  %v2642_v7 = vmul.f32 0.5, %v5418_v11 }
 0x546   : > { %v2690_v29 = vadd.f32 %v3888_v48, %v2689_v19  ;;  %v5501_v16 = vmul.f32 0.70710677, %v5495_v31 }
 0x547   : > { %v2907_v50 = vsel %vm2906_vm13, %v3886_v23, %v2903_v32  ;;  %v2711_v49 = vadd.f32 1.4214138, %v2708_v5  ;;  %v2722_v60 = vadd.f32 0.2548296, %v2719_v0 }
 0x548   : > { %v2909_v2 = vmul.f32 %v2907_v50, %v5382_v27  ;;  %v2694_v4 = vsel %vm2693_vm15, %v3888_v48, %v2690_v29  ;;  %v5505_v37 = vand.u32 2147483647, %v5501_v16  ;;  %v2738_v48 = vmul.f32 1.442695, %v2733_v9 }
 0x549   : > { %v2714_v20 = vmul.f32 %v2711_v49, %v2684_v54  ;;  %v2699_v17 = vsel %vm2696_vm1, %v2698_v56, %v2694_v4  ;;  %v2725_v42 = vmul.f32 %v2722_v60, %v5471_v8  ;;  %vm2984_vm13 = vcmp.lt.f32.partialorder %v5501_v16, 0.0  ;;  %v3718_v16 = vld [vmem:[%s5615_s8 + $0x1] ss:$0 sm:$0xff] }
 0x54a   : > { %v2911_v51 = vmul.f32 %v5392_v61, %v2909_v2  ;;  %v2703_v57 = vmul.f32 1.0614054, %v2699_v17  ;;  %v2920_v38 = vmul.f32 0.3275911, %v5505_v37  ;;  %v2972_v60 = vsub.f32 0.0, %v5505_v37 }
 0x54b   : > { %v2717_v33 = vadd.f32 -0.28449672, %v2714_v20  ;;  %v2740_v23 = vmul.f32 %v3890_v1, %v2725_v42 }
 0x54c   : > { %v5512_v27 = vadd.f32 %v5397_v40, %v2911_v51  ;;  %v2706_v28 = vadd.f32 -1.4531521, %v2703_v57  ;;  %v2922_v46 = vadd.f32 1.0, %v2920_v38 }
 0x54d   : > { %v2720_v43 = vmul.f32 %v2717_v33, %v2684_v54  ;;  %v2743_v61 = vsub.f32 1.0, %v2740_v23  ;;  %v2974_v33 = vmul.f32 %v2972_v60, %v5505_v37 }
 0x54e   : > { %v5516_v52 = vmul.f32 0.70710677, %v5512_v27  ;;  %v2709_v21 = vmul.f32 %v2706_v28, %v2699_v17  ;;  %3893 = vrcp.f32 %v2922_v46  ;;  %v2933_v18 = vand.u32 2147483647, %v2922_v46 }
 0x54f   : > { %v2723_v8 = vadd.f32 0.2548296, %v2720_v43  ;;  %v2749_v40 = vsub.f32 0.0, %v2743_v61  ;;  %3895 = vpow2.f32 %v2738_v48  ;;  %v2935_v19 = vand.u32 2147483648, %v2922_v46 }
 0x550   : > { %v5519_v15 = vand.u32 2147483647, %v5516_v52  ;;  %v2712_v30 = vadd.f32 1.4214138, %v2709_v21  ;;  %vm2929_vm5 = vweird.f32 %v2922_v46  ;;  %vm2934_vm7 = vcmp.eq.f32.partialorder %v2933_v18, 8.507059e+37 }
 0x551   : > { %v2726_v6 = vmul.f32 %v2723_v8, %v2684_v54  ;;  %v2752_v22 = vsel %vm2746_vm2, %v2749_v40, %v2743_v61  ;;  %v2641_v54 = vmul.f32 0.5, %v5401_v63  ;;  %v2936_v49 = vor.u32 1.1754944e-38, %v2935_v19 }
 0x552   : > { %v2921_v3 = vmul.f32 0.3275911, %v5519_v15  ;;  %v2715_v24 = vmul.f32 %v2712_v30, %v2699_v17  ;;  %v2755_v45 = vadd.f32 1.0, %v2752_v22  ;;  %v2973_v61 = vsub.f32 0.0, %v5519_v15 }
 0x553   : > { %v2741_v25 = vmul.f32 %v3892_v26, %v2726_v6  ;;  %v2976_v6 = vmul.f32 1.442695, %v2974_v33  ;;  %vm2985_vm14 = vcmp.lt.f32.partialorder %v5516_v52, 0.0 }
 0x554   : > { %v2923_v47 = vadd.f32 1.0, %v2921_v3  ;;  %v2718_v58 = vadd.f32 -0.28449672, %v2715_v24  ;;  %v3894_v14 = vpop.eup %3893  ;;  %v2758_v41 = vmul.f32 %v2755_v45, %v2641_v54  ;;  %v2975_v37 = vmul.f32 %v2973_v61, %v5519_v15 }
 0x555   : > { %v2744_v44 = vsub.f32 1.0, %v2741_v25  ;;  %v2925_v34 = vmul.f32 %v3894_v14, %v2922_v46  ;;  %vm2930_vm4 = vweird.f32 %v3894_v14  ;;  %v3896_v0 = vpop.eup %3895 }
 0x556   : > { %3897 = vrcp.f32 %v2923_v47  ;;  %v2721_v39 = vmul.f32 %v2718_v58, %v2699_v17  ;;  %vm2931_vm6 = vmor %vm2929_vm5, %vm2930_vm4  ;;  %v2950_v13 = vand.u32 2147483648, %v2923_v47  ;;  %v2948_v57 = vand.u32 2147483647, %v2923_v47 }
 0x557   : > { %v2750_v12 = vsub.f32 0.0, %v2744_v44  ;;  %v2926_v10 = vsub.f32 1.0, %v2925_v34  ;;  %vm2944_vm10 = vweird.f32 %v2923_v47  ;;  %3899 = vpow2.f32 %v2976_v6 }
 0x558   : > { %v2724_v59 = vadd.f32 0.2548296, %v2721_v39  ;;  %v2951_v46 = vor.u32 1.1754944e-38, %v2950_v13  ;;  %vm2949_vm12 = vcmp.eq.f32.partialorder %v2948_v57, 8.507059e+37 }
 0x559   : > { %v2753_v36 = vsel %vm2747_vm3, %v2750_v12, %v2744_v44  ;;  %v2927_v53 = vmul.f32 %v3894_v14, %v2926_v10 }
 0x55a   : > { %v2756_v32 = vadd.f32 1.0, %v2753_v36  ;;  %v2727_v5 = vmul.f32 %v2724_v59, %v2699_v17 }
 0x55b   : > { %v2928_v50 = vadd.f32 %v3894_v14, %v2927_v53 }
 0x55c   : > { %v3898_v1 = vpop.eup %3897  ;;  %v2759_v63 = vmul.f32 %v2756_v32, %v2642_v7  ;;  %v2742_v29 = vmul.f32 %v3896_v0, %v2727_v5 }
 0x55d   : > { %v2940_v35 = vmul.f32 %v3898_v1, %v2923_v47  ;;  %v2932_v11 = vsel %vm2931_vm6, %v3894_v14, %v2928_v50  ;;  %vm2945_vm8 = vweird.f32 %v3898_v1  ;;  %v2978_v14 = vmul.f32 1.442695, %v2975_v37  ;;  %v3900_v54 = vpop.eup %3899 }
 0x55e   : > { %v2761_v56 = vpack.c.bf16 %v2759_v63, %v2758_v41  ;;  %v2745_v2 = vsub.f32 1.0, %v2742_v29  ;;  %v2937_v20 = vsel %vm2934_vm7, %v2936_v49, %v2932_v11  ;;  %vm2946_vm11 = vmor %vm2944_vm10, %vm2945_vm8  ;;  %v2915_v41 = vmul.f32 0.5, %v5512_v27  ;;  %v3904_v11 = vld [vmem:[%s4216_s19 + $0x8] sm:$0xff] }
 0x55f   : > { %v2941_v4 = vsub.f32 1.0, %v2940_v35  ;;  %v2954_v51 = vmul.f32 1.0614054, %v2937_v20  ;;  %3901 = vpow2.f32 %v2978_v14 }
 0x560   : > { %2820 = vmatmul.bf16.vlgmr.msrb.gmra.mxu0 %v2761_v56  ;;  %v2751_v17 = vsub.f32 0.0, %v2745_v2 }
 0x561   : > { %v2942_v42 = vmul.f32 %v3898_v1, %v2941_v4  ;;  %v2956_v38 = vadd.f32 -1.4531521, %v2954_v51 }
 0x562   : > { %v2754_v23 = vsel %vm2748_vm9, %v2751_v17, %v2745_v2  ;;  %v3905_v17 = vld [vmem:[%s4216_s19 + $0x10] sm:$0xff] }
 0x563   : > { %v2943_v28 = vadd.f32 %v3898_v1, %v2942_v42  ;;  %v2958_v43 = vmul.f32 %v2956_v38, %v2937_v20  ;;  %v2757_v21 = vadd.f32 1.0, %v2754_v23 }
 0x565   : > { %v2947_v9 = vsel %vm2946_vm11, %v3898_v1, %v2943_v28  ;;  %v2960_v30 = vadd.f32 1.4214138, %v2958_v43  ;;  %v2760_v3 = vmul.f32 %v2757_v21, %v2643_v55  ;;  %v3902_v36 = vpop.eup %3901  ;;  %v2914_v1 = vmul.f32 0.5, %v5495_v31  ;;  %v3903_v31 = vld [vmem:[%s4216_s19] sm:$0xff] }
 0x566   : > { %v2952_v8 = vsel %vm2949_vm12, %v2951_v46, %v2947_v9 }
 0x567   : > { %v2955_v40 = vmul.f32 1.0614054, %v2952_v8  ;;  %v2962_v48 = vmul.f32 %v2960_v30, %v2937_v20  ;;  %v2762_v44 = vpack.c.bf16 %v2760_v3, %v2760_v3 }
 0x569   : > { %v2957_v26 = vadd.f32 -1.4531521, %v2955_v40  ;;  %v2964_v24 = vadd.f32 -0.28449672, %v2962_v48 }
 0x56b   : > { %v2959_v25 = vmul.f32 %v2957_v26, %v2952_v8  ;;  %v2966_v47 = vmul.f32 %v2964_v24, %v2937_v20 }
 0x56d   : > { %v2961_v58 = vadd.f32 1.4214138, %v2959_v25  ;;  %v2968_v22 = vadd.f32 0.2548296, %v2966_v47 }
 0x56f   : > { %v2963_v34 = vmul.f32 %v2961_v58, %v2952_v8  ;;  %v2970_v39 = vmul.f32 %v2968_v22, %v2937_v20 }
 0x570   : > { %2825 = vmatmul.bf16.gmra.mxu0 %v2762_v44 }
 0x571   : > { %v2965_v12 = vadd.f32 -0.28449672, %v2963_v34  ;;  %v2980_v62 = vmul.f32 %v3900_v54, %v2970_v39 }
 0x573   : > { %v2967_v10 = vmul.f32 %v2965_v12, %v2952_v8  ;;  %v2982_v45 = vsub.f32 1.0, %v2980_v62 }
 0x575   : > { %v2969_v59 = vadd.f32 0.2548296, %v2967_v10  ;;  %v2986_v7 = vsub.f32 0.0, %v2982_v45 }
 0x577   : > { %v2971_v15 = vmul.f32 %v2969_v59, %v2952_v8  ;;  %v2988_v53 = vsel %vm2984_vm13, %v2986_v7, %v2982_v45 }
 0x578   : > { %v2990_v5 = vadd.f32 1.0, %v2988_v53 }
 0x579   : > { %v2981_v18 = vmul.f32 %v3902_v36, %v2971_v15 }
 0x57a   : > { %v2992_v29 = vmul.f32 %v2990_v5, %v2914_v1 }
 0x57b   : > { %v2983_v19 = vsub.f32 1.0, %v2981_v18 }
 0x57d   : > { %v2987_v32 = vsub.f32 0.0, %v2983_v19 }
 0x57f   : > { %v2989_v0 = vsel %vm2985_vm14, %v2987_v32, %v2983_v19 }
 0x580   : > { %v2991_v63 = vadd.f32 1.0, %v2989_v0 }
 0x582   : > { %v2993_v50 = vmul.f32 %v2991_v63, %v2915_v41 }
 0x584   : > { %v2994_v35 = vpack.c.bf16 %v2993_v50, %v2992_v29 }
 0x586   : > { %3003 = vmatmul.bf16.vlgmr.msrb.gmra.mxu1 %v2994_v35 }
 0x5dd   : > { %v2821_v52 = vpop.f32.mrf.mxu0 }
 0x5de   : > { %v2822_v49 = vadd.f32 %v3718_v16, %v2821_v52 }
 0x5e0   : > { %v2830_v27 = vadd.f32 %v3903_v31, %v2822_v49 }
 0x5e2   : > { %2833 = vst.msk [vmem:[%s398_s30] sm:$0xff] %vm640_vm0, %v2830_v27 }
 0x5e5   : > { %v2823_v56 = vpop.f32.mrf.mxu0 }
 0x5e6   : > { %v2824_v2 = vadd.f32 %v3718_v16, %v2823_v56 }
 0x5e8   : > { %v2831_v60 = vadd.f32 %v3904_v11, %v2824_v2 }
 0x5ea   : > { %2834 = vst.msk [vmem:[%s398_s30 + $0x8] sm:$0xff] %vm640_vm0, %v2831_v60 }
 0x5ed   : > { %v2826_v4 = vpop.f32.mrf.mxu0 }
 0x5ee   : > { %v2827_v20 = vadd.f32 %v3718_v16, %v2826_v4 }
 0x5f0   : > { %v2832_v13 = vadd.f32 %v3905_v17, %v2827_v20 }
 0x5f2   : > { %2835 = vst.msk [vmem:[%s398_s30 + $0x10] sm:$0xff] %vm640_vm0, %v2832_v13 }
 0x5f3   : > { %3935 = shalt.err (!%p3932_p3)
}
 0x5f4   : > { %s4005_s19 = smov 128   ;;  %s4006_s30 = smov 8   ;;  %v3906_v38 = vld [vmem:[%s4440_s13] sm:$0xff]  ;;  %v3907_v46 = vld [vmem:[%s4440_s13 + $0x8] sm:$0xff] }
 0x5f5   : > { %3667 = dma.vmem_to_hbm [thread:$0]  (%p4105_p5), %s3032_s23, 384, %s3034_s25, %s3014_s26, %s4005_s19, %s4005_s19, %s4006_s30   ;;  %v2828_v51 = vpop.f32.mrf.mxu0 }
 0x5f6   : > { %s3162_s15 = sshll.u32 %s5537_s29, 4  ;;  %s3659_s0 = sshll.u32 %s4088_s21, 4 }
 0x5f7   : > { %s405_s22 = scalar_lea.vmem [#allocation6], %s3162_s15  ;;  %s3047_s16 = scalar_lea.hbm %s5618_s11, %s3659_s0 }
 0x5f8   : > { %s3048_s24 = sshll.u32 %s405_s22, 4  ;;  %s3050_s1 = sshll.u32 %s3047_s16, 4  ;;  %s3049_s24 = int_to_ptr.vmem [resolvable:$true] %s3048_s24  ;;  %s3051_s1 = int_to_ptr.hbm [resolvable:$true] %s3050_s1 }
 0x5f9   : > { %s3019_s21 = scalar_lea.sflag [#allocation7], %s5537_s29  ;;  %s3950_s23 = sshra.s32 %s3051_s1, 4  ;;  %s3951_s23 = int_to_ptr.hbm [resolvable:$true] %s3950_s23 }
 0x5fa   : > { %s3952_s25 = scalar_lea.hbm %s3951_s23, 16  ;;  %s3956_s0 = scalar_lea.hbm %s5618_s11, 32 }
 0x5fb   : > { %p3953_p4 = scmp.ne.s32.totalorder %s3951_s23, %s3952_s25  ;;  %p3957_p9 = scmp.lt.s32.totalorder %s3951_s23, %s5618_s11 }
 0x5fc   : > { %p3958_p10 = scmp.lt.s32.totalorder %s3956_s0, %s3952_s25 }
 0x5fd   : > { %p3954_p7 = pnand %p3953_p4, %p4105_p5 }
 0x5fe   : > { %p3959_p11 = por %p3958_p10, %p3957_p9 }
 0x5ff   : > { %p3955_p8 = pneg %p3954_p7 }
 0x601   : > { %p3960_p12 = pnand %p3959_p11, %p3955_p8 }
 0x603   : > { %v3004_v42 = vpop.f32.mrf.mxu1 }
 0x604   : > { %v3005_v57 = vadd.f32 %v3718_v16, %v3004_v42 }
 0x606   : > { %v3009_v33 = vadd.f32 %v3906_v38, %v3005_v57 }
 0x608   : > { %3011 = vst.msk [vmem:[%s405_s22] sm:$0xff] %vm640_vm0, %v3009_v33 }
 0x60b   : > { %v3006_v23 = vpop.f32.mrf.mxu1 }
 0x60c   : > { %v3007_v28 = vadd.f32 %v3718_v16, %v3006_v23 }
 0x60e   : > { %v3010_v43 = vadd.f32 %v3907_v46, %v3007_v28 }
 0x610   : > { %3012 = vst.msk [vmem:[%s405_s22 + $0x8] sm:$0xff] %vm640_vm0, %v3010_v43 }
 0x611   : > { %3963 = shalt.err (!%p3960_p12)
}
 0x612   : > { %3668 = dma.vmem_to_hbm [thread:$0]  (%p4105_p5), %s3049_s24, 256, %s3051_s1, %s3019_s21, %s4005_s19, %s4005_s19, %s4006_s30  }
 0x613 PF: > { %p3678_p13 = scmp.ge.s32.totalorder %s4002_s20, 2  ;;  %s3065_s13 = sand.u32 1, %s3990_s17  }
 0x614   : > { %s3066_s29 = scalar_lea.sflag [#allocation5], %s3065_s13 }
 0x615   : > { %p3672_p0 = pnand %p3678_p13, %p4109_p6 }
 0x617   : > { %p3673_p1 = pneg %p3672_p0 }
 0x619   : > { %3981 = dma.done.wait (%p3673_p1), %s3066_s29, 384  }
 0x61a   : > { %3983 = vsyncadd (%p3673_p1), %s3066_s29, 4294966912  ;;  %s3076_s22 = scalar_lea.sflag [#allocation7], %s3065_s13 }
 0x61b   : > { %3985 = dma.done.wait (%p3673_p1), %s3076_s22, 256  }
 0x61c   : > { %3987 = vsyncadd (%p3673_p1), %s3076_s22, 4294967040  ;;  %s5631_s20 = sld [smem:[#allocation11_spill]]  ;;  %s5634_s17 = smov %s3994_s18 }
 0x61d   : > { %s5632_s27 = sld [smem:[#allocation10_spill]] }
 0x61e   : > { %s5633_s19 = sld [smem:[#allocation12_spill]] }
 0x622   : > { %p25_p5 = scmp.ge.s32.totalorder %s5631_s20, 4  }
 0x623   : > { %s5635_s18 = smov %s5632_s27 }
 0x624   :  { %27 = sbr.rel (!%p25_p5) target bundleno = 8 (0x8), region = 115 }
 0x629   :  { %3082 = vsyncpa [#allocation5], 1 }
 0x62a   :  { %3084 = vsyncpa [#allocation5 + $0x1], 1 }
 0x62b   :  { %3085 = vsyncpa [#allocation7], 1 }
 0x62c   :  { %3087 = vsyncpa [#allocation7 + $0x1], 1 }

</bundles_post_ra>
